<compile_context>
chip_gen: v5e
topology: v5e:2x2
jax: 0.10.0
libtpu: 0.0.40
codegen_flags: <defaults>
</compile_context>

<pallas_src>
import functools

import jax
import jax.numpy as jnp
from jax.experimental import pallas as pl
from jax.experimental.pallas import tpu as pltpu


def _round_up(n, m):
    return ((n + m - 1) // m) * m


# --------------------------------------------------------------------------------------
# Kernel
# --------------------------------------------------------------------------------------
def _mmoe_kernel(x_ref, w_in_ref, b_in_ref, wh_ref, bh_ref, wo_ref, bo_ref,
                 out_ref, *, exp_layers, E, EHp):
    cd = w_in_ref.dtype                        # matmul operand dtype (bf16 by default)

    # Fused layer-0: all E expert embedding layers + both gate projections in ONE
    # lane-dense matmul:  (TB, D) x (D, Wp)  with Wp a multiple of 128.
    z = jnp.dot(x_ref[...].astype(cd), w_in_ref[...],
                preferred_element_type=jnp.float32) + b_in_ref[...]

    # Sigmoid as a single tanh EUP push: sigmoid(x) == 0.5*(tanh(x/2)+1).
    h = 0.5 * (jnp.tanh(0.5 * z[:, :EHp]) + 1.0)     # (TB, EHp) expert activations
    logits = z[:, EHp:EHp + 2 * E]                   # (TB, 2E)  gate logits

    # Shared hidden layer, fused across experts as one block-diagonal matmul.
    wh = wh_ref[...]                                  # loaded once per grid step
    bh = jnp.broadcast_to(bh_ref[...], h.shape)       # hoisted out of the unrolled loop
    for _ in range(exp_layers):                       # small & static: unrolled
        h = jnp.dot(jnp.maximum(h, 0.0).astype(cd), wh,
                    preferred_element_type=jnp.float32) + bh

    # All E output heads (H -> 1) as one block-structured (EHp, E) matmul.
    f = jnp.dot(h.astype(cd), wo_ref[...],
                preferred_element_type=jnp.float32) + bo_ref[...]   # (TB, E)

    # Gate softmaxes over the expert axis; the divide goes to the EUP slot.
    def _softmax(l):
        m = jnp.max(l, axis=-1, keepdims=True)
        e = jnp.exp(l - m)
        return e * pl.reciprocal(jnp.sum(e, axis=-1, keepdims=True), approx=True)

    g1 = _softmax(logits[:, :E])
    g2 = _softmax(logits[:, E:])

    # Gated mixtures; direct column stores (no lane-axis concat/relayout).
    out_ref[:, 0:1] = jnp.sum(g1 * f, axis=-1, keepdims=True)
    out_ref[:, 1:2] = jnp.sum(g2 * f, axis=-1, keepdims=True)


# --------------------------------------------------------------------------------------
# One-time weight packing (call at init, NOT per forward)
# --------------------------------------------------------------------------------------
def pack_params(params, *, use_bf16=True):
    """Pack per-expert weights into the fused, lane-aligned layouts the kernel expects.

    Do this ONCE at model-init time and reuse the result for every forward call.
    """
    E, D, H = params["w0"].shape
    EH = E * H
    EHp = _round_up(EH, 128)            # lane-tile aligned split: expert acts | gate logits
    Wp = _round_up(EHp + 2 * E, 128)    # lane-dense fused layer-0 output width

    # expert layer-0 + both gates -> one (D, Wp) weight (zero-padded)
    w_in = jnp.zeros((D, Wp), jnp.float32)
    w_in = w_in.at[:, :EH].set(jnp.transpose(params["w0"], (1, 0, 2)).reshape(D, EH))
    w_in = w_in.at[:, EHp:EHp + E].set(params["wg1"])
    w_in = w_in.at[:, EHp + E:EHp + 2 * E].set(params["wg2"])
    b_in = jnp.zeros((1, Wp), jnp.float32)
    b_in = b_in.at[:, :EH].set(params["b0"].reshape(1, EH))
    b_in = b_in.at[:, EHp:EHp + E].set(params["bg1"])
    b_in = b_in.at[:, EHp + E:EHp + 2 * E].set(params["bg2"])

    # shared hidden layer -> block-diagonal (EHp, EHp); padded rows/cols are zero so the
    # padded activation lanes (sigmoid(0)=0.5) never contaminate real columns.
    wh_blk = jnp.zeros((EHp, EHp), jnp.float32)
    for e in range(E):
        wh_blk = wh_blk.at[e * H:(e + 1) * H, e * H:(e + 1) * H].set(params["wh"][e])
    bh = jnp.zeros((1, EHp), jnp.float32).at[:, :EH].set(params["bh"].reshape(1, EH))

    # output heads -> block-structured (EHp, E)
    wo_blk = jnp.zeros((EHp, E), jnp.float32)
    for e in range(E):
        wo_blk = wo_blk.at[e * H:(e + 1) * H, e].set(params["wo"][e, :, 0])
    bo = params["bo"]                                   # (1, E), stays f32

    cd = jnp.bfloat16 if use_bf16 else jnp.float32      # matmul-operand dtype; acc stays f32
    return dict(
        w_in=w_in.astype(cd), b_in=b_in,
        wh=wh_blk.astype(cd), bh=bh,
        wo=wo_blk.astype(cd), bo=bo,
        E=E, H=H, D=D, EHp=EHp, Wp=Wp,
    )


# --------------------------------------------------------------------------------------
# Forward wrapper: a single pallas_call, no per-call weight prep
# --------------------------------------------------------------------------------------
def multi_gate_mix_experts(x, packed, *, exp_layers, tb=None):
    B, D = x.shape
    assert D == packed["D"]
    E, EHp = packed["E"], packed["EHp"]
    w_in, b_in = packed["w_in"], packed["b_in"]
    wh, bh = packed["wh"], packed["bh"]
    wo, bo = packed["wo"], packed["bo"]

    # ---- batch tiling ----
    # Small B: one grid step (per-step overhead ~0.35 us dominates the ~MFLOP compute).
    # Large B: MXU-row-aligned big tiles (multiples of 256) to amortize step overhead;
    # the x tile is only tb*D*4 bytes, so VMEM is never the constraint (even v7x 64 MiB).
    if tb is None:
        if B <= 1024:
            tb = B
        else:
            tb = B
            for cand in (2048, 1024, 512, 256):
                if B % cand == 0:
                    tb = cand
                    break
    assert B % tb == 0

    def full(a):
        shape = a.shape
        n = len(shape)
        return pl.BlockSpec(shape, lambda i, n=n: (0,) * n)

    kernel = functools.partial(_mmoe_kernel, exp_layers=exp_layers, E=E, EHp=EHp)

    out = pl.pallas_call(
        kernel,
        grid=(B // tb,),
        in_specs=[
            pl.BlockSpec((tb, D), lambda i: (i, 0)),   # x (batch-tiled)
            full(w_in), full(b_in),                    # fused layer-0 + gates
            full(wh), full(bh),                        # block-diag shared hidden
            full(wo), full(bo),                        # block-structured heads
        ],
        out_specs=pl.BlockSpec((tb, 2), lambda i: (i, 0)),
        out_shape=jax.ShapeDtypeStruct((B, 2), jnp.float32),
        compiler_params=pltpu.CompilerParams(
            dimension_semantics=("parallel",)),        # megacore only kicks in when grid >= 2
    )(x, w_in, b_in, wh, bh, wo, bo)
    return out[:, 0], out[:, 1]


# --------------------------------------------------------------------------------------
# Test harness
# --------------------------------------------------------------------------------------
def init_params(key, D, H, E):
    ks = jax.random.split(key, 10)

    def s(k, shape):
        return 0.1 * jax.random.normal(k, shape, jnp.float32)

    return dict(
        w0=s(ks[0], (E, D, H)), b0=s(ks[1], (E, H)),
        wh=s(ks[2], (E, H, H)), bh=s(ks[3], (E, H)),
        wo=s(ks[4], (E, H, 1)), bo=s(ks[5], (1, E)),
        wg1=s(ks[6], (D, E)),   bg1=s(ks[7], (1, E)),
        wg2=s(ks[8], (D, E)),   bg2=s(ks[9], (1, E)),
    )


def _reference(x, p, exp_layers):
    E = p["w0"].shape[0]
    f_cols = []
    for e in range(E):
        h = jax.nn.sigmoid(x @ p["w0"][e] + p["b0"][e])
        for _ in range(exp_layers):
            h = jnp.maximum(h, 0.0) @ p["wh"][e] + p["bh"][e]
        f_cols.append(h @ p["wo"][e] + p["bo"][0, e])
    f = jnp.concatenate(f_cols, axis=1)
    g1 = jax.nn.softmax(x @ p["wg1"] + p["bg1"], axis=-1)
    g2 = jax.nn.softmax(x @ p["wg2"] + p["bg2"], axis=-1)
    return jnp.sum(g1 * f, axis=-1), jnp.sum(g2 * f, axis=-1)


if __name__ == "__main__":
    B, D, H, E, EXP_LAYERS = 256, 32, 32, 4, 2
    key = jax.random.PRNGKey(0)
    kx, kp = jax.random.split(key)
    x = jax.random.normal(kx, (B, D), jnp.float32)
    params = init_params(kp, D, H, E)
    ref1, ref2 = _reference(x, params, EXP_LAYERS)

    # f32-operand path: tight tolerance (only the approx-reciprocal softmax differs).
    packed_f32 = pack_params(params, use_bf16=False)
    o1, o2 = multi_gate_mix_experts(x, packed_f32, exp_layers=EXP_LAYERS)
    jax.block_until_ready((o1, o2))
    assert jnp.allclose(o1, ref1, atol=2e-3, rtol=2e-3)
    assert jnp.allclose(o2, ref2, atol=2e-3, rtol=2e-3)

    # Default bf16-operand path (f32 accumulation): relaxed tolerance vs the f32 reference.
    packed = pack_params(params)                     # use_bf16=True by default
    out1, out2 = multi_gate_mix_experts(x, packed, exp_layers=EXP_LAYERS)
    jax.block_until_ready((out1, out2))
    assert jnp.allclose(out1, ref1, atol=2e-2, rtol=2e-2)
    assert jnp.allclose(out2, ref2, atol=2e-2, rtol=2e-2)

    print("KERNEL_OK")
</pallas_src>

<mosaic_0001>
module attributes {stable_mosaic.version = 11 : i64} {
  func.func @_mmoe_kernel(%arg0: i32, %arg1: memref<256x32xf32, #tpu.memory_space<vmem>>, %arg2: memref<32x256xf32, #tpu.memory_space<vmem>>, %arg3: memref<1x256xf32, #tpu.memory_space<vmem>>, %arg4: memref<128x128xf32, #tpu.memory_space<vmem>>, %arg5: memref<1x128xf32, #tpu.memory_space<vmem>>, %arg6: memref<128x4xf32, #tpu.memory_space<vmem>>, %arg7: memref<1x4xf32, #tpu.memory_space<vmem>>, %arg8: memref<256x2xf32, #tpu.memory_space<vmem>>) attributes {dimension_semantics = [#tpu.dimension_semantics<parallel>], iteration_bounds = array<i64: 1>, scalar_prefetch = 0 : i64, scratch_operands = 0 : i64, tpu.core_type = #tpu.core_type<tc>, window_params = [{transform_indices = @transform_0, window_bounds = array<i64: 256, 32>}, {pipeline_mode = #tpu.pipeline_mode<synchronous>, transform_indices = @transform_1, window_bounds = array<i64: 32, 256>}, {pipeline_mode = #tpu.pipeline_mode<synchronous>, transform_indices = @transform_2, window_bounds = array<i64: 1, 256>}, {pipeline_mode = #tpu.pipeline_mode<synchronous>, transform_indices = @transform_3, window_bounds = array<i64: 128, 128>}, {pipeline_mode = #tpu.pipeline_mode<synchronous>, transform_indices = @transform_4, window_bounds = array<i64: 1, 128>}, {pipeline_mode = #tpu.pipeline_mode<synchronous>, transform_indices = @transform_5, window_bounds = array<i64: 128, 4>}, {pipeline_mode = #tpu.pipeline_mode<synchronous>, transform_indices = @transform_6, window_bounds = array<i64: 1, 4>}, {transform_indices = @transform_7, window_bounds = array<i64: 256, 2>}]} {
    %c0 = arith.constant 0 : index
    %c0_0 = arith.constant 0 : index
    %0 = vector.load %arg1[%c0, %c0_0] : memref<256x32xf32, #tpu.memory_space<vmem>>, vector<256x32xf32>
    %c0_1 = arith.constant 0 : index
    %c0_2 = arith.constant 0 : index
    %1 = vector.load %arg2[%c0_1, %c0_2] : memref<32x256xf32, #tpu.memory_space<vmem>>, vector<32x256xf32>
    %cst = arith.constant dense<0.000000e+00> : vector<256x256xf32>
    %2 = tpu.matmul %0, %1, %cst {dimension_numbers = #tpu.dot_dimension_numbers<[1], [0], [0], [1], [0, 0, 1, 1], [], []>} : vector<256x32xf32>, vector<32x256xf32>, vector<256x256xf32> -> vector<256x256xf32>
    %c0_3 = arith.constant 0 : index
    %c0_4 = arith.constant 0 : index
    %3 = vector.load %arg3[%c0_3, %c0_4] : memref<1x256xf32, #tpu.memory_space<vmem>>, vector<1x256xf32>
    %4 = vector.broadcast %3 : vector<1x256xf32> to vector<256x256xf32>
    %5 = arith.addf %2, %4 : vector<256x256xf32>
    %6 = vector.extract_strided_slice %5 {offsets = [0, 0], sizes = [256, 128], strides = [1, 1]} : vector<256x256xf32> to vector<256x128xf32>
    %cst_5 = arith.constant 5.000000e-01 : f32
    %7 = vector.broadcast %cst_5 : f32 to vector<256x128xf32>
    %8 = arith.mulf %7, %6 : vector<256x128xf32>
    %9 = math.tanh %8 : vector<256x128xf32>
    %cst_6 = arith.constant 1.000000e+00 : f32
    %10 = vector.broadcast %cst_6 : f32 to vector<256x128xf32>
    %11 = arith.addf %9, %10 : vector<256x128xf32>
    %cst_7 = arith.constant 5.000000e-01 : f32
    %12 = vector.broadcast %cst_7 : f32 to vector<256x128xf32>
    %13 = arith.mulf %12, %11 : vector<256x128xf32>
    %14 = vector.extract_strided_slice %5 {offsets = [0, 128], sizes = [256, 8], strides = [1, 1]} : vector<256x256xf32> to vector<256x8xf32>
    %c0_8 = arith.constant 0 : index
    %c0_9 = arith.constant 0 : index
    %15 = vector.load %arg4[%c0_8, %c0_9] : memref<128x128xf32, #tpu.memory_space<vmem>>, vector<128x128xf32>
    %c0_10 = arith.constant 0 : index
    %c0_11 = arith.constant 0 : index
    %16 = vector.load %arg5[%c0_10, %c0_11] : memref<1x128xf32, #tpu.memory_space<vmem>>, vector<1x128xf32>
    %17 = vector.shape_cast %16 : vector<1x128xf32> to vector<1x128xf32>
    %18 = vector.broadcast %17 : vector<1x128xf32> to vector<256x128xf32>
    %cst_12 = arith.constant 0.000000e+00 : f32
    %19 = vector.broadcast %cst_12 : f32 to vector<256x128xf32>
    %20 = arith.maximumf %13, %19 : vector<256x128xf32>
    %cst_13 = arith.constant dense<0.000000e+00> : vector<256x128xf32>
    %21 = tpu.matmul %20, %15, %cst_13 {dimension_numbers = #tpu.dot_dimension_numbers<[1], [0], [0], [1], [0, 0, 1, 1], [], []>} : vector<256x128xf32>, vector<128x128xf32>, vector<256x128xf32> -> vector<256x128xf32>
    %22 = arith.addf %21, %18 : vector<256x128xf32>
    %cst_14 = arith.constant 0.000000e+00 : f32
    %23 = vector.broadcast %cst_14 : f32 to vector<256x128xf32>
    %24 = arith.maximumf %22, %23 : vector<256x128xf32>
    %cst_15 = arith.constant dense<0.000000e+00> : vector<256x128xf32>
    %25 = tpu.matmul %24, %15, %cst_15 {dimension_numbers = #tpu.dot_dimension_numbers<[1], [0], [0], [1], [0, 0, 1, 1], [], []>} : vector<256x128xf32>, vector<128x128xf32>, vector<256x128xf32> -> vector<256x128xf32>
    %26 = arith.addf %25, %18 : vector<256x128xf32>
    %c0_16 = arith.constant 0 : index
    %c0_17 = arith.constant 0 : index
    %27 = vector.load %arg6[%c0_16, %c0_17] : memref<128x4xf32, #tpu.memory_space<vmem>>, vector<128x4xf32>
    %cst_18 = arith.constant dense<0.000000e+00> : vector<256x4xf32>
    %28 = tpu.matmul %26, %27, %cst_18 {dimension_numbers = #tpu.dot_dimension_numbers<[1], [0], [0], [1], [0, 0, 1, 1], [], []>} : vector<256x128xf32>, vector<128x4xf32>, vector<256x4xf32> -> vector<256x4xf32>
    %c0_19 = arith.constant 0 : index
    %c0_20 = arith.constant 0 : index
    %29 = vector.load %arg7[%c0_19, %c0_20] : memref<1x4xf32, #tpu.memory_space<vmem>>, vector<1x4xf32>
    %30 = vector.broadcast %29 : vector<1x4xf32> to vector<256x4xf32>
    %31 = arith.addf %28, %30 : vector<256x4xf32>
    %32 = vector.extract_strided_slice %14 {offsets = [0, 0], sizes = [256, 4], strides = [1, 1]} : vector<256x8xf32> to vector<256x4xf32>
    %cst_21 = arith.constant dense<0xFF800000> : vector<256xf32>
    %33 = vector.multi_reduction <maximumf>, %32, %cst_21 [1] : vector<256x4xf32> to vector<256xf32>
    %34 = vector.shape_cast %33 : vector<256xf32> to vector<256x1xf32>
    %35 = vector.broadcast %34 : vector<256x1xf32> to vector<256x4xf32>
    %36 = arith.subf %32, %35 : vector<256x4xf32>
    %37 = math.exp %36 : vector<256x4xf32>
    %cst_22 = arith.constant dense<0.000000e+00> : vector<256xf32>
    %38 = vector.multi_reduction <add>, %37, %cst_22 [1] : vector<256x4xf32> to vector<256xf32>
    %39 = vector.shape_cast %38 : vector<256xf32> to vector<256x1xf32>
    %40 = tpu.reciprocal %39 {approx = true} : vector<256x1xf32> -> vector<256x1xf32>
    %41 = vector.broadcast %40 : vector<256x1xf32> to vector<256x4xf32>
    %42 = arith.mulf %37, %41 : vector<256x4xf32>
    %43 = vector.extract_strided_slice %14 {offsets = [0, 4], sizes = [256, 4], strides = [1, 1]} : vector<256x8xf32> to vector<256x4xf32>
    %cst_23 = arith.constant dense<0xFF800000> : vector<256xf32>
    %44 = vector.multi_reduction <maximumf>, %43, %cst_23 [1] : vector<256x4xf32> to vector<256xf32>
    %45 = vector.shape_cast %44 : vector<256xf32> to vector<256x1xf32>
    %46 = vector.broadcast %45 : vector<256x1xf32> to vector<256x4xf32>
    %47 = arith.subf %43, %46 : vector<256x4xf32>
    %48 = math.exp %47 : vector<256x4xf32>
    %cst_24 = arith.constant dense<0.000000e+00> : vector<256xf32>
    %49 = vector.multi_reduction <add>, %48, %cst_24 [1] : vector<256x4xf32> to vector<256xf32>
    %50 = vector.shape_cast %49 : vector<256xf32> to vector<256x1xf32>
    %51 = tpu.reciprocal %50 {approx = true} : vector<256x1xf32> -> vector<256x1xf32>
    %52 = vector.broadcast %51 : vector<256x1xf32> to vector<256x4xf32>
    %53 = arith.mulf %48, %52 : vector<256x4xf32>
    %54 = arith.mulf %42, %31 : vector<256x4xf32>
    %cst_25 = arith.constant dense<0.000000e+00> : vector<256xf32>
    %55 = vector.multi_reduction <add>, %54, %cst_25 [1] : vector<256x4xf32> to vector<256xf32>
    %56 = vector.shape_cast %55 : vector<256xf32> to vector<256x1xf32>
    %c0_26 = arith.constant 0 : index
    %c0_27 = arith.constant 0 : index
    %57 = vector.load %arg8[%c0_26, %c0_27] : memref<256x2xf32, #tpu.memory_space<vmem>>, vector<256x1xf32>
    tpu.vector_store %arg8[%c0_26, %c0_27], %56 {strides = array<i32>} : memref<256x2xf32, #tpu.memory_space<vmem>>, vector<256x1xf32>,
    %58 = arith.mulf %53, %31 : vector<256x4xf32>
    %cst_28 = arith.constant dense<0.000000e+00> : vector<256xf32>
    %59 = vector.multi_reduction <add>, %58, %cst_28 [1] : vector<256x4xf32> to vector<256xf32>
    %60 = vector.shape_cast %59 : vector<256xf32> to vector<256x1xf32>
    %c0_29 = arith.constant 0 : index
    %c1 = arith.constant 1 : index
    %61 = vector.load %arg8[%c0_29, %c1] : memref<256x2xf32, #tpu.memory_space<vmem>>, vector<256x1xf32>
    tpu.vector_store %arg8[%c0_29, %c1], %60 {strides = array<i32>} : memref<256x2xf32, #tpu.memory_space<vmem>>, vector<256x1xf32>,
    return
  }
  func.func @transform_0(%arg0: i32) -> (i32, i32) {
    %c0_i32 = arith.constant 0 : i32
    %c0_i32_0 = arith.constant 0 : i32
    return %arg0, %c0_i32 : i32, i32
  }
  func.func @transform_1(%arg0: i32) -> (i32, i32) {
    %c0_i32 = arith.constant 0 : i32
    %c0_i32_0 = arith.constant 0 : i32
    %c0_i32_1 = arith.constant 0 : i32
    return %c0_i32, %c0_i32_0 : i32, i32
  }
  func.func @transform_2(%arg0: i32) -> (i32, i32) {
    %c0_i32 = arith.constant 0 : i32
    %c0_i32_0 = arith.constant 0 : i32
    %c0_i32_1 = arith.constant 0 : i32
    return %c0_i32, %c0_i32_0 : i32, i32
  }
  func.func @transform_3(%arg0: i32) -> (i32, i32) {
    %c0_i32 = arith.constant 0 : i32
    %c0_i32_0 = arith.constant 0 : i32
    %c0_i32_1 = arith.constant 0 : i32
    return %c0_i32, %c0_i32_0 : i32, i32
  }
  func.func @transform_4(%arg0: i32) -> (i32, i32) {
    %c0_i32 = arith.constant 0 : i32
    %c0_i32_0 = arith.constant 0 : i32
    %c0_i32_1 = arith.constant 0 : i32
    return %c0_i32, %c0_i32_0 : i32, i32
  }
  func.func @transform_5(%arg0: i32) -> (i32, i32) {
    %c0_i32 = arith.constant 0 : i32
    %c0_i32_0 = arith.constant 0 : i32
    %c0_i32_1 = arith.constant 0 : i32
    return %c0_i32, %c0_i32_0 : i32, i32
  }
  func.func @transform_6(%arg0: i32) -> (i32, i32) {
    %c0_i32 = arith.constant 0 : i32
    %c0_i32_0 = arith.constant 0 : i32
    %c0_i32_1 = arith.constant 0 : i32
    return %c0_i32, %c0_i32_0 : i32, i32
  }
  func.func @transform_7(%arg0: i32) -> (i32, i32) {
    %c0_i32 = arith.constant 0 : i32
    %c0_i32_0 = arith.constant 0 : i32
    return %arg0, %c0_i32 : i32, i32
  }
}

</mosaic_0001>

<bundles_post_ra>
// kernel: tpu_custom_call.1
= control target key start
LH: loop header
LB: loop body
LE: loop exit
PB: predicated region body
PF: predicated region fallthrough
CT: control target
= control target key end

     0   :  { %vm72_vm0 = vcmask 261120   ;;  %vm1319_vm1 = vcmask 64544   ;;  %vm966_vm2 = vcmask 31744   ;;  %s2800_s18 = smov 124   ;;  %s2801_s27 = smov 4   ;;  %vm1928_vm3 = vcmask 7168   ;;  %s4904_s1 = inlined_call_operand.vmem [shape: f32[32,256], index: 1, kind: input, shape index: {}]   ;;  %s4905_s0 = inlined_call_operand.vmem [shape: f32[256,32], index: 0, kind: input, shape index: {}]   ;;  %s4906_s3 = inlined_call_operand.vmem [shape: f32[128,128], index: 3, kind: input, shape index: {}]   ;;  %s4907_s2 = inlined_call_operand.vmem [shape: f32[1,256], index: 2, kind: input, shape index: {}]   ;;  %s4908_s4 = inlined_call_operand.vmem [shape: f32[1,128], index: 4, kind: input, shape index: {}]   ;;  %s4909_s5 = inlined_call_operand.vmem [shape: f32[128,4], index: 5, kind: input, shape index: {}]   ;;  %s4910_s6 = inlined_call_operand.vmem [shape: f32[1,4], index: 6, kind: input, shape index: {}]   ;;  %s4911_s7 = inlined_call_operand.vmem [shape: f32[256,2], index: 7, kind: output, shape index: {}]  }
   0x1   :  { %v64_v0 = vld [vmem:[%s4904_s1 + $0x30] sm:$0xff]  ;;  %v62_v1 = vld [vmem:[%s4904_s1 + $0x20] sm:$0xff]  ;;  %v65_v6 = vld [vmem:[%s4904_s1 + $0x38] sm:$0xff]  ;;  %vm2345_vm4 = vcmask 15368  }
   0x2   :  { %181 = vmatpush.msra.mxu0 %v64_v0  ;;  %2446 = vmatpush.msra.mxu1 %v64_v0  ;;  %v60_v2 = vld [vmem:[%s4904_s1 + $0x10] sm:$0xff]  ;;  %v58_v3 = vld [vmem:[%s4904_s1] sm:$0xff]  ;;  %v63_v7 = vld [vmem:[%s4904_s1 + $0x28] sm:$0xff] }
   0x3   :  { %2447 = vmatpush.msra.mxu2 %v64_v0  ;;  %2448 = vmatpush.msra.mxu3 %v64_v0  ;;  %v26_v4 = vld [vmem:[%s4905_s0] sm:$0xff]  ;;  %v2860_v5 = vld [vmem:[%s4905_s0 + $0x50] sm:$0xff]  ;;  %v61_v8 = vld [vmem:[%s4904_s1 + $0x18] sm:$0xff] }
   0x4   :  { %182 = vmatpush.msra.mxu0 %v62_v1  ;;  %2449 = vmatpush.msra.mxu1 %v62_v1  ;;  %v27_v9 = vld [vmem:[%s4905_s0 + $0x8] sm:$0xff]  ;;  %v2880_v10 = vld [vmem:[%s4905_s0 + $0x58] sm:$0xff]  ;;  %v28_v11 = vld [vmem:[%s4905_s0 + $0x10] sm:$0xff] }
   0x5   :  { %2450 = vmatpush.msra.mxu2 %v62_v1  ;;  %2451 = vmatpush.msra.mxu3 %v62_v1  ;;  %v2891_v12 = vld [vmem:[%s4905_s0 + $0x60] sm:$0xff]  ;;  %v59_v13 = vld [vmem:[%s4904_s1 + $0x8] sm:$0xff]  ;;  %v2902_v14 = vld [vmem:[%s4905_s0 + $0x18] sm:$0xff] }
   0x6   :  { %183 = vmatpush.msra.mxu0 %v60_v2  ;;  %2452 = vmatpush.msra.mxu1 %v60_v2  ;;  %v2907_v15 = vld [vmem:[%s4905_s0 + $0x68] sm:$0xff]  ;;  %v2916_v16 = vld [vmem:[%s4905_s0 + $0x20] sm:$0xff]  ;;  %v2921_v17 = vld [vmem:[%s4905_s0 + $0x70] sm:$0xff] }
   0x7   :  { %2453 = vmatpush.msra.mxu2 %v60_v2  ;;  %2454 = vmatpush.msra.mxu3 %v60_v2  ;;  %v2930_v18 = vld [vmem:[%s4905_s0 + $0x28] sm:$0xff]  ;;  %v2935_v19 = vld [vmem:[%s4905_s0 + $0x78] sm:$0xff]  ;;  %v2951_v21 = vld [vmem:[%s4905_s0 + $0x30] sm:$0xff] }
   0x8   :  { %184 = vmatpush.msra.mxu0 %v58_v3  ;;  %2455 = vmatpush.msra.mxu1 %v58_v3  ;;  %v2944_v20 = vld [vmem:[%s4905_s0 + $0x98] sm:$0xff]  ;;  %v2956_v22 = vld [vmem:[%s4905_s0 + $0x80] sm:$0xff]  ;;  %v2977_v25 = vld [vmem:[%s4905_s0 + $0x88] sm:$0xff] }
   0x9   :  { %2382 = vmatmul.msk.f32.vlgmr.msra.gmra.mxu0 %vm72_vm0, %v26_v4  ;;  %2392 = vmatmul.msk.f32.vlgmr.msra.gmra.mxu1 %vm72_vm0, %v2860_v5  ;;  %v2965_v23 = vld [vmem:[%s4905_s0 + $0xa0] sm:$0xff]  ;;  %v2972_v24 = vld [vmem:[%s4905_s0 + $0x38] sm:$0xff]  ;;  %v2986_v26 = vld [vmem:[%s4905_s0 + $0xa8] sm:$0xff] }
   0xa   :  { %294 = vmatpush.msrb.mxu1 %v65_v6  ;;  %2456 = vmatpush.msra.mxu2 %v58_v3  ;;  %v2993_v27 = vld [vmem:[%s4905_s0 + $0x40] sm:$0xff]  ;;  %v2998_v28 = vld [vmem:[%s4905_s0 + $0x90] sm:$0xff]  ;;  %v3014_v30 = vld [vmem:[%s4905_s0 + $0x48] sm:$0xff] }
   0xb   :  { %2457 = vmatpush.msra.mxu3 %v58_v3  ;;  %2401 = vmatmul.msk.f32.vlgmr.msra.gmra.mxu2 %vm72_vm0, %v2944_v20  ;;  %v3007_v29 = vld [vmem:[%s4905_s0 + $0xb0] sm:$0xff]  ;;  %v3022_v31 = vld [vmem:[%s4905_s0 + $0xb8] sm:$0xff]  ;;  %v536_v34 = vld [vmem:[%s4906_s3 + $0x68] sm:$0xff] }
   0xc   :  { %295 = vmatpush.msrb.mxu1 %v63_v7  ;;  %v538_v32 = vld [vmem:[%s4906_s3 + $0x78] sm:$0xff]  ;;  %v537_v33 = vld [vmem:[%s4906_s3 + $0x70] sm:$0xff]  ;;  %v3039_v35 = vld [vmem:[%s4905_s0 + $0xc0] sm:$0xff] }
   0xd   :  { %575 = vmatpush.msrb.mxu2 %v538_v32  ;;  %720 = vmatpush.msrb.mxu3 %v538_v32  ;;  %v535_v36 = vld [vmem:[%s4906_s3 + $0x60] sm:$0xff]  ;;  %v534_v37 = vld [vmem:[%s4906_s3 + $0x58] sm:$0xff]  ;;  %v533_v38 = vld [vmem:[%s4906_s3 + $0x50] sm:$0xff] }
   0xe   :  { %296 = vmatpush.msrb.mxu1 %v61_v8  ;;  %v532_v39 = vld [vmem:[%s4906_s3 + $0x48] sm:$0xff]  ;;  %v531_v40 = vld [vmem:[%s4906_s3 + $0x40] sm:$0xff]  ;;  %v530_v42 = vld [vmem:[%s4906_s3 + $0x38] sm:$0xff] }
   0xf   :  { %576 = vmatpush.msrb.mxu2 %v537_v33  ;;  %721 = vmatpush.msrb.mxu3 %v537_v33  ;;  %v3062_v41 = vld [vmem:[%s4905_s0 + $0xc8] sm:$0xff]  ;;  %v529_v43 = vld [vmem:[%s4906_s3 + $0x30] sm:$0xff]  ;;  %v527_v45 = vld [vmem:[%s4906_s3 + $0x20] sm:$0xff] }
  0x10   :  { %297 = vmatpush.msrb.mxu1 %v59_v13  ;;  %v528_v44 = vld [vmem:[%s4906_s3 + $0x28] sm:$0xff]  ;;  %v3083_v46 = vld [vmem:[%s4905_s0 + $0xd0] sm:$0xff]  ;;  %v526_v47 = vld [vmem:[%s4906_s3 + $0x18] sm:$0xff] }
  0x11   :  { %2383 = vmatmul.msk.f32.gmra.mxu0 %vm72_vm0, %v27_v9  ;;  %2393 = vmatmul.msk.f32.gmra.mxu1 %vm72_vm0, %v2880_v10  ;;  %v525_v48 = vld [vmem:[%s4906_s3 + $0x10] sm:$0xff]  ;;  %v524_v49 = vld [vmem:[%s4906_s3 + $0x8] sm:$0xff]  ;;  %v523_v50 = vld [vmem:[%s4906_s3] sm:$0xff] }
  0x12   :  { %577 = vmatpush.msrb.mxu2 %v536_v34  ;;  %722 = vmatpush.msrb.mxu3 %v536_v34  ;;  %v3106_v51 = vld [vmem:[%s4907_s2] sm:$0x3] }
  0x13   :  { %2402 = vmatmul.msk.f32.gmra.mxu2 %vm72_vm0, %v2965_v23  ;;  %v3111_v52 = vperm.slane %v3106_v51, 0 }
  0x14   :  { %578 = vmatpush.msrb.mxu2 %v535_v36  ;;  %723 = vmatpush.msrb.mxu3 %v535_v36 }
  0x16   :  { %579 = vmatpush.msrb.mxu2 %v534_v37  ;;  %724 = vmatpush.msrb.mxu3 %v534_v37 }
  0x18   :  { %580 = vmatpush.msrb.mxu2 %v533_v38  ;;  %725 = vmatpush.msrb.mxu3 %v533_v38 }
  0x19   :  { %2384 = vmatmul.msk.f32.gmra.mxu0 %vm72_vm0, %v28_v11  ;;  %2394 = vmatmul.msk.f32.gmra.mxu1 %vm72_vm0, %v2891_v12 }
  0x1a   :  { %581 = vmatpush.msrb.mxu2 %v532_v39  ;;  %726 = vmatpush.msrb.mxu3 %v532_v39 }
  0x1b   :  { %2403 = vmatmul.msk.f32.gmra.mxu2 %vm72_vm0, %v2986_v26 }
  0x1c   :  { %582 = vmatpush.msrb.mxu2 %v531_v40  ;;  %727 = vmatpush.msrb.mxu3 %v531_v40 }
  0x1e   :  { %583 = vmatpush.msrb.mxu2 %v530_v42  ;;  %728 = vmatpush.msrb.mxu3 %v530_v42 }
  0x20   :  { %584 = vmatpush.msrb.mxu2 %v529_v43  ;;  %729 = vmatpush.msrb.mxu3 %v529_v43 }
  0x21   :  { %2385 = vmatmul.msk.f32.gmra.mxu0 %vm72_vm0, %v2902_v14  ;;  %2395 = vmatmul.msk.f32.gmra.mxu1 %vm72_vm0, %v2907_v15 }
  0x22   :  { %585 = vmatpush.msrb.mxu2 %v528_v44  ;;  %730 = vmatpush.msrb.mxu3 %v528_v44 }
  0x23   :  { %2404 = vmatmul.msk.f32.gmra.mxu2 %vm72_vm0, %v3007_v29 }
  0x24   :  { %586 = vmatpush.msrb.mxu2 %v527_v45  ;;  %731 = vmatpush.msrb.mxu3 %v527_v45 }
  0x26   :  { %587 = vmatpush.msrb.mxu2 %v526_v47  ;;  %732 = vmatpush.msrb.mxu3 %v526_v47 }
  0x28   :  { %588 = vmatpush.msrb.mxu2 %v525_v48  ;;  %733 = vmatpush.msrb.mxu3 %v525_v48 }
  0x29   :  { %2386 = vmatmul.msk.f32.gmra.mxu0 %vm72_vm0, %v2916_v16  ;;  %2396 = vmatmul.msk.f32.gmra.mxu1 %vm72_vm0, %v2921_v17 }
  0x2a   :  { %589 = vmatpush.msrb.mxu2 %v524_v49  ;;  %734 = vmatpush.msrb.mxu3 %v524_v49 }
  0x2b   :  { %2405 = vmatmul.msk.f32.gmra.mxu2 %vm72_vm0, %v3022_v31 }
  0x2c   :  { %590 = vmatpush.msrb.mxu2 %v523_v50  ;;  %735 = vmatpush.msrb.mxu3 %v523_v50 }
  0x31   :  { %2387 = vmatmul.msk.f32.gmra.mxu0 %vm72_vm0, %v2930_v18  ;;  %2397 = vmatmul.msk.f32.gmra.mxu1 %vm72_vm0, %v2935_v19 }
  0x33   :  { %2406 = vmatmul.msk.f32.gmra.mxu2 %vm72_vm0, %v3039_v35 }
  0x39   :  { %2388 = vmatmul.msk.f32.gmra.mxu0 %vm72_vm0, %v2951_v21  ;;  %2398 = vmatmul.msk.f32.gmra.mxu1 %vm72_vm0, %v2956_v22 }
  0x3b   :  { %2407 = vmatmul.msk.f32.gmra.mxu2 %vm72_vm0, %v3062_v41 }
  0x41   :  { %2389 = vmatmul.msk.f32.gmra.mxu0 %vm72_vm0, %v2972_v24  ;;  %2399 = vmatmul.msk.f32.gmra.mxu1 %vm72_vm0, %v2977_v25 }
  0x43   :  { %2408 = vmatmul.msk.f32.gmra.mxu2 %vm72_vm0, %v3083_v46 }
  0x49   :  { %2390 = vmatmul.msk.f32.gmra.mxu0 %vm72_vm0, %v2993_v27  ;;  %2400 = vmatmul.msk.f32.gmra.mxu1 %vm72_vm0, %v2998_v28 }
  0x51   :  { %2391 = vmatmul.msk.f32.gmra.mxu0 %vm72_vm0, %v3014_v30  ;;  %2414 = vmatmul.msk.f32.vlgmr.msrb.gmra.mxu1 %vm72_vm0, %v26_v4 }
  0x59   :  { %2415 = vmatmul.msk.f32.gmra.mxu1 %vm72_vm0, %v27_v9 }
  0x61   :  { %2416 = vmatmul.msk.f32.gmra.mxu1 %vm72_vm0, %v28_v11 }
  0x69   :  { %2417 = vmatmul.msk.f32.gmra.mxu1 %vm72_vm0, %v2902_v14 }
  0x71   :  { %2418 = vmatmul.msk.f32.gmra.mxu1 %vm72_vm0, %v2916_v16 }
  0x79   :  { %2419 = vmatmul.msk.f32.gmra.mxu1 %vm72_vm0, %v2930_v18 }
  0x81   :  { %2420 = vmatmul.msk.f32.gmra.mxu1 %vm72_vm0, %v2951_v21 }
  0x86   :  { %v186_v53 = vpop.f32.mrf.mxu0  ;;  %v3113_v54 = vpop.f32.mrf.mxu1 }
  0x87   :  { %v187_v55 = vadd.f32 %v186_v53, %v3111_v52 }
  0x89   :  { %v395_v56 = vmul.f32 0.5, %v187_v55  ;;  %2421 = vmatmul.msk.f32.gmra.mxu1 %vm72_vm0, %v2972_v24 }
  0x8b   :  { %2478 = vtanh.f32 %v395_v56 }
  0x8e   :  { %v189_v57 = vpop.f32.mrf.mxu0  ;;  %v3118_v58 = vpop.f32.mrf.mxu1 }
  0x8f   :  { %v190_v59 = vadd.f32 %v189_v57, %v3111_v52 }
  0x91   :  { %v2479_v60 = vpop.eup %2478  ;;  %v396_v61 = vmul.f32 0.5, %v190_v59  ;;  %2422 = vmatmul.msk.f32.gmra.mxu1 %vm72_vm0, %v2993_v27 }
  0x92   :  { %v459_v62 = vadd.f32 1.0, %v2479_v60 }
  0x93   :  { %2480 = vtanh.f32 %v396_v61 }
  0x94   :  { %v491_v63 = vmul.f32 0.5, %v459_v62 }
  0x96   :  { %v192_v0 = vpop.f32.mrf.mxu0  ;;  %v3123_v1 = vpop.f32.mrf.mxu1  ;;  %v543_v2 = vmax.f32 %v491_v63, 0.0 }
  0x97   :  { %v193_v3 = vadd.f32 %v192_v0, %v3111_v52 }
  0x98   :  { %591 = vmatmul.f32.vlgmr.msrb.gmra.mxu2 %v543_v2 }
  0x99   :  { %v2481_v4 = vpop.eup %2480  ;;  %v397_v6 = vmul.f32 0.5, %v193_v3  ;;  %2423 = vmatmul.msk.f32.gmra.mxu1 %vm72_vm0, %v3014_v30 }
  0x9a   :  { %v460_v7 = vadd.f32 1.0, %v2481_v4 }
  0x9b   :  { %2482 = vtanh.f32 %v397_v6 }
  0x9c   :  { %v492_v8 = vmul.f32 0.5, %v460_v7 }
  0x9e   :  { %v195_v9 = vpop.f32.mrf.mxu0  ;;  %v3128_v11 = vpop.f32.mrf.mxu1  ;;  %v544_v13 = vmax.f32 %v492_v8, 0.0 }
  0x9f   :  { %v196_v14 = vadd.f32 %v195_v9, %v3111_v52 }
  0xa0   :  { %594 = vmatmul.f32.gmra.mxu2 %v544_v13  ;;  %v3159_v13 = vperm.slane %v3106_v51, 1 }
  0xa1   :  { %v2483_v16 = vpop.eup %2482  ;;  %v398_v18 = vmul.f32 0.5, %v196_v14  ;;  %2424 = vmatmul.msk.f32.gmra.mxu1 %vm72_vm0, %v2860_v5 }
  0xa2   :  { %v461_v21 = vadd.f32 1.0, %v2483_v16  ;;  %v217_v16 = vadd.f32 %v3113_v54, %v3111_v52 }
  0xa3   :  { %2484 = vtanh.f32 %v398_v18 }
  0xa4   :  { %v493_v24 = vmul.f32 0.5, %v461_v21  ;;  %v405_v51 = vmul.f32 0.5, %v217_v16 }
  0xa6   :  { %v198_v27 = vpop.f32.mrf.mxu0  ;;  %v3133_v30 = vpop.f32.mrf.mxu1  ;;  %v545_v32 = vmax.f32 %v493_v24, 0.0 }
  0xa7   :  { %v199_v33 = vadd.f32 %v198_v27, %v3111_v52 }
  0xa8   :  { %597 = vmatmul.f32.gmra.mxu2 %v545_v32 }
  0xa9   :  { %v2485_v34 = vpop.eup %2484  ;;  %v399_v36 = vmul.f32 0.5, %v199_v33  ;;  %2425 = vmatmul.msk.f32.gmra.mxu1 %vm72_vm0, %v2880_v10 }
  0xaa   :  { %v462_v37 = vadd.f32 1.0, %v2485_v34 }
  0xab   :  { %2486 = vtanh.f32 %v399_v36 }
  0xac   :  { %v494_v38 = vmul.f32 0.5, %v462_v37 }
  0xae   :  { %v201_v39 = vpop.f32.mrf.mxu0  ;;  %v3138_v5 = vpop.f32.mrf.mxu1  ;;  %v546_v40 = vmax.f32 %v494_v38, 0.0  ;;  %v220_v38 = vadd.f32 %v3118_v58, %v3111_v52 }
  0xaf   :  { %v202_v42 = vadd.f32 %v201_v39, %v3111_v52 }
  0xb0   :  { %600 = vmatmul.f32.gmra.mxu2 %v546_v40 }
  0xb1   :  { %v2487_v43 = vpop.eup %2486  ;;  %v400_v44 = vmul.f32 0.5, %v202_v42  ;;  %2426 = vmatmul.msk.f32.gmra.mxu1 %vm72_vm0, %v2891_v12 }
  0xb2   :  { %v463_v45 = vadd.f32 1.0, %v2487_v43  ;;  %v3185_v43 = vld [vmem:[%s4905_s0 + $0xd8] sm:$0xff] }
  0xb3   :  { %2488 = vtanh.f32 %v400_v44  ;;  %2409 = vmatmul.msk.f32.vlgmr.msra.gmra.mxu3 %vm72_vm0, %v3185_v43 }
  0xb4   :  { %v495_v47 = vmul.f32 0.5, %v463_v45  ;;  %v406_v45 = vmul.f32 0.5, %v220_v38 }
  0xb6   :  { %v204_v48 = vpop.f32.mrf.mxu0  ;;  %v3143_v10 = vpop.f32.mrf.mxu1  ;;  %v547_v49 = vmax.f32 %v495_v47, 0.0 }
  0xb7   :  { %v205_v50 = vadd.f32 %v204_v48, %v3111_v52 }
  0xb8   :  { %603 = vmatmul.f32.gmra.mxu2 %v547_v49 }
  0xb9   :  { %v2489_v53 = vpop.eup %2488  ;;  %v401_v55 = vmul.f32 0.5, %v205_v50  ;;  %2427 = vmatmul.msk.f32.gmra.mxu1 %vm72_vm0, %v2907_v15 }
  0xba   :  { %v464_v56 = vadd.f32 1.0, %v2489_v53  ;;  %v223_v53 = vadd.f32 %v3123_v1, %v3111_v52 }
  0xbb   :  { %2490 = vtanh.f32 %v401_v55 }
  0xbc   :  { %v496_v57 = vmul.f32 0.5, %v464_v56 }
  0xbe   :  { %v207_v59 = vpop.f32.mrf.mxu0  ;;  %v3148_v12 = vpop.f32.mrf.mxu1  ;;  %v548_v60 = vmax.f32 %v496_v57, 0.0 }
  0xbf   :  { %v208_v61 = vadd.f32 %v207_v59, %v3111_v52 }
  0xc0   :  { %606 = vmatmul.f32.gmra.mxu2 %v548_v60 }
  0xc1   :  { %v2491_v62 = vpop.eup %2490  ;;  %v402_v63 = vmul.f32 0.5, %v208_v61  ;;  %2428 = vmatmul.msk.f32.gmra.mxu1 %vm72_vm0, %v2921_v17  ;;  %v3161_v17 = vpop.f32.mrf.mxu2  ;;  %v407_v61 = vmul.f32 0.5, %v223_v53 }
  0xc2   :  { %v465_v0 = vadd.f32 1.0, %v2491_v62 }
  0xc3   :  { %2492 = vtanh.f32 %v402_v63 }
  0xc4   :  { %v497_v2 = vmul.f32 0.5, %v465_v0 }
  0xc6   :  { %v210_v3 = vpop.f32.mrf.mxu0  ;;  %v3153_v15 = vpop.f32.mrf.mxu1  ;;  %v549_v4 = vmax.f32 %v497_v2, 0.0  ;;  %v226_v2 = vadd.f32 %v3128_v11, %v3111_v52 }
  0xc7   :  { %v211_v6 = vadd.f32 %v210_v3, %v3111_v52 }
  0xc8   :  { %609 = vmatmul.f32.gmra.mxu2 %v549_v4 }
  0xc9   :  { %v2493_v7 = vpop.eup %2492  ;;  %v403_v8 = vmul.f32 0.5, %v211_v6  ;;  %2429 = vmatmul.msk.f32.gmra.mxu1 %vm72_vm0, %v2935_v19  ;;  %v3177_v39 = vpop.f32.mrf.mxu2 }
  0xca   :  { %v466_v9 = vadd.f32 1.0, %v2493_v7 }
  0xcb   :  { %2494 = vtanh.f32 %v403_v8  ;;  %v3223_v8 = vld [vmem:[%s4905_s0 + $0xe8] sm:$0xff] }
  0xcc   :  { %v498_v14 = vmul.f32 0.5, %v466_v9 }
  0xce   :  { %v213_v18 = vpop.f32.mrf.mxu0  ;;  %v299_v21 = vpop.f32.mrf.mxu1  ;;  %v550_v24 = vmax.f32 %v498_v14, 0.0 }
  0xcf   :  { %v214_v27 = vadd.f32 %v213_v18, %v3111_v52  ;;  %v3167_v19 = vadd.f32 %v299_v21, %v3159_v13  ;;  %v229_v18 = vadd.f32 %v3133_v30, %v3111_v52 }
  0xd0   :  { %612 = vmatmul.f32.gmra.mxu2 %v550_v24 }
  0xd1   :  { %v2495_v32 = vpop.eup %2494  ;;  %v404_v33 = vmul.f32 0.5, %v214_v27  ;;  %2430 = vmatmul.msk.f32.gmra.mxu1 %vm72_vm0, %v2956_v22  ;;  %v1320_v54 = vsel %vm1319_vm1, %v3167_v19, -inf  ;;  %v967_v34 = vsel %vm966_vm2, %v3167_v19, -inf  ;;  %v3200_v60 = vpop.f32.mrf.mxu2 }
  0xd2   :  { %1321 = vmax.xlane.f32.xlu1 %v1320_v54  ;;  %968 = vmax.xlane.f32.xlu0 %v967_v34  ;;  %v467_v36 = vadd.f32 1.0, %v2495_v32 }
  0xd3   :  { %2496 = vtanh.f32 %v404_v33 }
  0xd4   :  { %v499_v37 = vmul.f32 0.5, %v467_v36  ;;  %2498 = vtanh.f32 %v405_v51  ;;  %v3241_v51 = vld [vmem:[%s4905_s0 + $0xf0] sm:$0xff] }
  0xd5   :  { %2500 = vtanh.f32 %v406_v45 }
  0xd6   :  { %v302_v40 = vpop.f32.mrf.mxu1  ;;  %v551_v42 = vmax.f32 %v499_v37, 0.0  ;;  %2502 = vtanh.f32 %v407_v61  ;;  %v232_v37 = vadd.f32 %v3138_v5, %v3111_v52 }
  0xd7   :  { %v3180_v22 = vadd.f32 %v302_v40, %v3159_v13 }
  0xd8   :  { %615 = vmatmul.f32.gmra.mxu2 %v551_v42  ;;  %v410_v45 = vmul.f32 0.5, %v232_v37 }
  0xd9   :  { %v2497_v44 = vpop.eup %2496  ;;  %v1323_v58 = vsel %vm1319_vm1, %v3180_v22, -inf  ;;  %v970_v47 = vsel %vm966_vm2, %v3180_v22, -inf  ;;  %2431 = vmatmul.msk.f32.gmra.mxu1 %vm72_vm0, %v2977_v25  ;;  %v3205_v25 = vld [vmem:[%s4905_s0 + $0xe0] sm:$0xff]  ;;  %v3229_v11 = vpop.f32.mrf.mxu2 }
  0xda   :  { %1324 = vmax.xlane.f32.xlu2 %v1323_v58  ;;  %971 = vmax.xlane.f32.xlu0 %v970_v47  ;;  %v468_v48 = vadd.f32 1.0, %v2497_v44  ;;  %v2499_v49 = vpop.eup %2498 }
  0xdb   :  { %v469_v57 = vadd.f32 1.0, %v2499_v49  ;;  %2410 = vmatmul.msk.f32.gmra.mxu3 %vm72_vm0, %v3205_v25  ;;  %v2501_v0 = vpop.eup %2500  ;;  %v235_v49 = vadd.f32 %v3143_v10, %v3111_v52 }
  0xdc   :  { %v500_v50 = vmul.f32 0.5, %v468_v48  ;;  %v470_v6 = vadd.f32 1.0, %v2501_v0  ;;  %v2503_v16 = vpop.eup %2502  ;;  %v238_v0 = vadd.f32 %v3148_v12, %v3111_v52 }
  0xdd   :  { %v501_v63 = vmul.f32 0.5, %v469_v57  ;;  %v471_v27 = vadd.f32 1.0, %v2503_v16  ;;  %v411_v61 = vmul.f32 0.5, %v235_v49 }
  0xde   :  { %v305_v55 = vpop.f32.mrf.mxu1  ;;  %v552_v56 = vmax.f32 %v500_v50, 0.0  ;;  %v502_v14 = vmul.f32 0.5, %v470_v6 }
  0xdf   :  { %v3198_v59 = vadd.f32 %v305_v55, %v3159_v13  ;;  %v553_v4 = vmax.f32 %v501_v63, 0.0  ;;  %v503_v54 = vmul.f32 0.5, %v471_v27 }
  0xe0   :  { %618 = vmatmul.f32.gmra.mxu2 %v552_v56  ;;  %v554_v24 = vmax.f32 %v502_v14, 0.0 }
  0xe1   :  { %v973_v1 = vsel %vm966_vm2, %v3198_v59, -inf  ;;  %v1326_v62 = vsel %vm1319_vm1, %v3198_v59, -inf  ;;  %2432 = vmatmul.msk.f32.gmra.mxu1 %vm72_vm0, %v2998_v28  ;;  %v408_v28 = vmul.f32 0.5, %v226_v2  ;;  %v3251_v36 = vpop.f32.mrf.mxu2  ;;  %v555_v40 = vmax.f32 %v503_v54, 0.0 }
  0xe2   :  { %974 = vmax.xlane.f32.xlu1 %v973_v1  ;;  %1327 = vmax.xlane.f32.xlu0 %v1326_v62 }
  0xe3   :  { %2411 = vmatmul.msk.f32.gmra.mxu3 %vm72_vm0, %v3223_v8  ;;  %2504 = vtanh.f32 %v408_v28 }
  0xe6   :  { %v308_v3 = vpop.f32.mrf.mxu1 }
  0xe7   :  { %v3218_v7 = vadd.f32 %v308_v3, %v3159_v13 }
  0xe8   :  { %621 = vmatmul.f32.gmra.mxu2 %v553_v4 }
  0xe9   :  { %v976_v9 = vsel %vm966_vm2, %v3218_v7, -inf  ;;  %2433 = vmatmul.msk.f32.gmra.mxu1 %vm72_vm0, %v2944_v20  ;;  %v409_v20 = vmul.f32 0.5, %v229_v18  ;;  %v1329_v30 = vsel %vm1319_vm1, %v3218_v7, -inf  ;;  %v2505_v34 = vpop.eup %2504  ;;  %v3273_v50 = vpop.f32.mrf.mxu2  ;;  %v241_v18 = vadd.f32 %v3153_v15, %v3111_v52 }
  0xea   :  { %977 = vmax.xlane.f32.xlu1 %v976_v9  ;;  %v472_v42 = vadd.f32 1.0, %v2505_v34  ;;  %v412_v9 = vmul.f32 0.5, %v238_v0 }
  0xeb   :  { %2412 = vmatmul.msk.f32.gmra.mxu3 %vm72_vm0, %v3241_v51  ;;  %2506 = vtanh.f32 %v409_v20 }
  0xec   :  { %v504_v47 = vmul.f32 0.5, %v472_v42  ;;  %2508 = vtanh.f32 %v410_v45  ;;  %v3318_v45 = vld [vmem:[%s4908_s4] ss:$0 sm:$0xff] }
  0xed   :  { %2510 = vtanh.f32 %v411_v61 }
  0xee   :  { %v311_v21 = vpop.f32.mrf.mxu1  ;;  %v556_v55 = vmax.f32 %v504_v47, 0.0  ;;  %2512 = vtanh.f32 %v412_v9 }
  0xef   :  { %v3236_v32 = vadd.f32 %v311_v21, %v3159_v13 }
  0xf0   :  { %624 = vmatmul.f32.gmra.mxu2 %v554_v24 }
  0xf1   :  { %v979_v33 = vsel %vm966_vm2, %v3236_v32, -inf  ;;  %2434 = vmatmul.msk.f32.gmra.mxu1 %vm72_vm0, %v2965_v23  ;;  %v3261_v23 = vld [vmem:[%s4905_s0 + $0xf8] sm:$0xff]  ;;  %v1332_v58 = vsel %vm1319_vm1, %v3236_v32, -inf  ;;  %v2507_v48 = vpop.eup %2506  ;;  %v3291_v28 = vpop.f32.mrf.mxu2 }
  0xf2   :  { %980 = vmax.xlane.f32.xlu2 %v979_v33  ;;  %1330 = vmax.xlane.f32.xlu1 %v1329_v30  ;;  %v473_v56 = vadd.f32 1.0, %v2507_v48  ;;  %v2509_v63 = vpop.eup %2508  ;;  %v413_v33 = vmul.f32 0.5, %v241_v18 }
  0xf3   :  { %2413 = vmatmul.msk.f32.gmra.mxu3 %vm72_vm0, %v3261_v23  ;;  %v474_v4 = vadd.f32 1.0, %v2509_v63  ;;  %v2511_v16 = vpop.eup %2510 }
  0xf4   :  { %v505_v10 = vmul.f32 0.5, %v473_v56  ;;  %v475_v21 = vadd.f32 1.0, %v2511_v16  ;;  %v2513_v34 = vpop.eup %2512  ;;  %2514 = vtanh.f32 %v413_v33 }
  0xf5   :  { %v506_v12 = vmul.f32 0.5, %v474_v4  ;;  %v476_v37 = vadd.f32 1.0, %v2513_v34 }
  0xf6   :  { %v314_v38 = vpop.f32.mrf.mxu1  ;;  %v557_v3 = vmax.f32 %v505_v10, 0.0  ;;  %v507_v15 = vmul.f32 0.5, %v475_v21 }
  0xf7   :  { %v3256_v44 = vadd.f32 %v314_v38, %v3159_v13  ;;  %v558_v27 = vmax.f32 %v506_v12, 0.0 }
  0xf8   :  { %627 = vmatmul.f32.gmra.mxu2 %v555_v40  ;;  %v559_v40 = vmax.f32 %v507_v15, 0.0 }
  0xf9   :  { %v1335_v5 = vsel %vm1319_vm1, %v3256_v44, -inf  ;;  %2435 = vmatmul.msk.f32.gmra.mxu1 %vm72_vm0, %v2986_v26  ;;  %v982_v26 = vsel %vm966_vm2, %v3256_v44, -inf  ;;  %v3308_v54 = vpop.f32.mrf.mxu2 }
  0xfa   :  { %1333 = vmax.xlane.f32.xlu2 %v1332_v58  ;;  %1336 = vmax.xlane.f32.xlu0 %v1335_v5  ;;  %v508_v5 = vmul.f32 0.5, %v476_v37  ;;  %v2515_v47 = vpop.eup %2514 }
  0xfc   :  { %v560_v61 = vmax.f32 %v508_v5, 0.0 }
  0xfe   :  { %v317_v53 = vpop.f32.mrf.mxu1 }
  0xff   :  { %v3276_v57 = vadd.f32 %v317_v53, %v3159_v13  ;;  %v477_v53 = vadd.f32 1.0, %v2515_v47 }
 0x100   :  { %630 = vmatmul.f32.gmra.mxu2 %v556_v55 }
 0x101   :  { %v1338_v1 = vsel %vm1319_vm1, %v3276_v57, -inf  ;;  %v985_v62 = vsel %vm966_vm2, %v3276_v57, -inf  ;;  %2436 = vmatmul.msk.f32.gmra.mxu1 %vm72_vm0, %v3007_v29 }
 0x102   :  { %983 = vmax.xlane.f32.xlu2 %v982_v26  ;;  %1339 = vmax.xlane.f32.xlu1 %v1338_v1 }
 0x103   :  { %986 = vmax.xlane.f32.xlu0 %v985_v62  ;;  %v509_v62 = vmul.f32 0.5, %v477_v53 }
 0x106   :  { %v320_v2 = vpop.f32.mrf.mxu1 }
 0x107   :  { %v3289_v6 = vadd.f32 %v320_v2, %v3159_v13  ;;  %v561_v2 = vmax.f32 %v509_v62, 0.0 }
 0x108   :  { %633 = vmatmul.f32.gmra.mxu2 %v557_v3 }
 0x109   :  { %v1341_v29 = vsel %vm1319_vm1, %v3289_v6, -inf  ;;  %v988_v14 = vsel %vm966_vm2, %v3289_v6, -inf  ;;  %2437 = vmatmul.msk.f32.gmra.mxu1 %vm72_vm0, %v3022_v31 }
 0x10a   :  { %1342 = vmax.xlane.f32.xlu2 %v1341_v29  ;;  %989 = vmax.xlane.f32.xlu1 %v988_v14 }
 0x10e   :  { %v323_v24 = vpop.f32.mrf.mxu1 }
 0x10f   :  { %v3302_v20 = vadd.f32 %v323_v24, %v3159_v13 }
 0x110   :  { %636 = vmatmul.f32.gmra.mxu2 %v558_v27 }
 0x111   :  { %v991_v30 = vsel %vm966_vm2, %v3302_v20, -inf  ;;  %v1344_v31 = vsel %vm1319_vm1, %v3302_v20, -inf  ;;  %2438 = vmatmul.msk.f32.gmra.mxu1 %vm72_vm0, %v3039_v35 }
 0x112   :  { %992 = vmax.xlane.f32.xlu2 %v991_v30  ;;  %1345 = vmax.xlane.f32.xlu0 %v1344_v31 }
 0x116   :  { %v326_v38 = vpop.f32.mrf.mxu1 }
 0x117   :  { %v3313_v42 = vadd.f32 %v326_v38, %v3159_v13 }
 0x118   :  { %639 = vmatmul.f32.gmra.mxu2 %v559_v40 }
 0x119   :  { %v1347_v35 = vsel %vm1319_vm1, %v3313_v42, -inf  ;;  %v994_v58 = vsel %vm966_vm2, %v3313_v42, -inf  ;;  %2439 = vmatmul.msk.f32.gmra.mxu1 %vm72_vm0, %v3062_v41 }
 0x11a   :  { %1348 = vmax.xlane.f32.xlu1 %v1347_v35  ;;  %995 = vmax.xlane.f32.xlu0 %v994_v58 }
 0x11b   :  { %v592_v48 = vpop.f32.mrf.mxu2 }
 0x11c   :  { %v593_v49 = vadd.f32 %v3318_v45, %v592_v48 }
 0x11e   :  { %v688_v55 = vmax.f32 %v593_v49, 0.0  ;;  %v329_v56 = vpop.f32.mrf.mxu1 }
 0x11f   :  { %v3328_v26 = vadd.f32 %v329_v56, %v3159_v13 }
 0x120   :  { %642 = vmatmul.f32.gmra.mxu2 %v560_v61  ;;  %736 = vmatmul.f32.vlgmr.msrb.gmra.mxu3 %v688_v55 }
 0x121   :  { %v1350_v1 = vsel %vm1319_vm1, %v3328_v26, -inf  ;;  %v997_v41 = vsel %vm966_vm2, %v3328_v26, -inf  ;;  %2440 = vmatmul.msk.f32.gmra.mxu1 %vm72_vm0, %v3083_v46 }
 0x122   :  { %1351 = vmax.xlane.f32.xlu2 %v1350_v1  ;;  %998 = vmax.xlane.f32.xlu1 %v997_v41 }
 0x123   :  { %v595_v10 = vpop.f32.mrf.mxu2 }
 0x124   :  { %v596_v63 = vadd.f32 %v3318_v45, %v595_v10 }
 0x126   :  { %v332_v0 = vpop.f32.mrf.mxu1  ;;  %v689_v3 = vmax.f32 %v596_v63, 0.0 }
 0x127   :  { %v3338_v4 = vadd.f32 %v332_v0, %v3159_v13 }
 0x128   :  { %645 = vmatmul.f32.gmra.mxu2 %v561_v2  ;;  %739 = vmatmul.f32.gmra.mxu3 %v689_v3 }
 0x129   :  { %v1000_v9 = vsel %vm966_vm2, %v3338_v4, -inf  ;;  %v1353_v46 = vsel %vm1319_vm1, %v3338_v4, -inf  ;;  %2441 = vmatmul.msk.f32.gmra.mxu1 %vm72_vm0, %v3185_v43 }
 0x12a   :  { %1001 = vmax.xlane.f32.xlu2 %v1000_v9  ;;  %1354 = vmax.xlane.f32.xlu0 %v1353_v46 }
 0x12b   :  { %v598_v29 = vpop.f32.mrf.mxu2 }
 0x12c   :  { %v599_v14 = vadd.f32 %v3318_v45, %v598_v29 }
 0x12e   :  { %v335_v12 = vpop.f32.mrf.mxu1  ;;  %v690_v16 = vmax.f32 %v599_v14, 0.0 }
 0x12f   :  { %v3348_v18 = vadd.f32 %v335_v12, %v3159_v13 }
 0x130   :  { %742 = vmatmul.f32.gmra.mxu3 %v690_v16 }
 0x131   :  { %v1356_v21 = vsel %vm1319_vm1, %v3348_v18, -inf  ;;  %v1003_v24 = vsel %vm966_vm2, %v3348_v18, -inf  ;;  %2442 = vmatmul.msk.f32.gmra.mxu1 %vm72_vm0, %v3205_v25 }
 0x132   :  { %1357 = vmax.xlane.f32.xlu1 %v1356_v21  ;;  %1004 = vmax.xlane.f32.xlu0 %v1003_v24 }
 0x133   :  { %v601_v43 = vpop.f32.mrf.mxu2 }
 0x134   :  { %v602_v27 = vadd.f32 %v3318_v45, %v601_v43 }
 0x136   :  { %v338_v33 = vpop.f32.mrf.mxu1  ;;  %v691_v30 = vmax.f32 %v602_v27, 0.0 }
 0x137   :  { %v3358_v31 = vadd.f32 %v338_v33, %v3159_v13 }
 0x138   :  { %745 = vmatmul.f32.gmra.mxu3 %v691_v30 }
 0x139   :  { %v1359_v15 = vsel %vm1319_vm1, %v3358_v31, -inf  ;;  %v1006_v34 = vsel %vm966_vm2, %v3358_v31, -inf  ;;  %2443 = vmatmul.msk.f32.gmra.mxu1 %vm72_vm0, %v3223_v8 }
 0x13a   :  { %1360 = vmax.xlane.f32.xlu2 %v1359_v15  ;;  %1007 = vmax.xlane.f32.xlu1 %v1006_v34 }
 0x13b   :  { %v604_v25 = vpop.f32.mrf.mxu2 }
 0x13c   :  { %v605_v37 = vadd.f32 %v3318_v45, %v604_v25 }
 0x13e   :  { %v341_v38 = vpop.f32.mrf.mxu1  ;;  %v692_v40 = vmax.f32 %v605_v37, 0.0 }
 0x13f   :  { %v3368_v35 = vadd.f32 %v341_v38, %v3159_v13 }
 0x140   :  { %748 = vmatmul.f32.gmra.mxu3 %v692_v40 }
 0x141   :  { %v1009_v58 = vsel %vm966_vm2, %v3368_v35, -inf  ;;  %v1362_v5 = vsel %vm1319_vm1, %v3368_v35, -inf  ;;  %2444 = vmatmul.msk.f32.gmra.mxu1 %vm72_vm0, %v3241_v51 }
 0x142   :  { %1010 = vmax.xlane.f32.xlu2 %v1009_v58  ;;  %1363 = vmax.xlane.f32.xlu0 %v1362_v5 }
 0x143   :  { %v607_v8 = vpop.f32.mrf.mxu2 }
 0x144   :  { %v608_v47 = vadd.f32 %v3318_v45, %v607_v8  ;;  %v848_v8 = vld [vmem:[%s4909_s5 + $0x78] sm:$0xff] }
 0x145   :  { %v969_v48 = vpop.xlane.xlu0 %968  ;;  %v1322_v62 = vpop.xlane.xlu1 %1321  ;;  %853 = vmatpush.msrb.mxu0 %v848_v8  ;;  %2458 = vmatpush.msra.mxu3 %v848_v8  ;;  %v834_v8 = vld [vmem:[%s4909_s5 + $0x8] sm:$0xff] }
 0x146   :  { %v1063_v49 = vsub.f32 %v3167_v19, %v969_v48  ;;  %v344_v53 = vpop.f32.mrf.mxu1  ;;  %v693_v55 = vmax.f32 %v608_v47, 0.0  ;;  %v1416_v2 = vsub.f32 %v3167_v19, %v1322_v62 }
 0x147   :  { %v3379_v56 = vadd.f32 %v344_v53, %v3159_v13 }
 0x148   :  { %v1095_v61 = vmul.f32 1.442695, %v1063_v49  ;;  %751 = vmatmul.f32.gmra.mxu3 %v693_v55  ;;  %v1448_v29 = vmul.f32 1.442695, %v1416_v2  ;;  %v847_v49 = vld [vmem:[%s4909_s5 + $0x70] sm:$0xff] }
 0x149   :  { %v1365_v1 = vsel %vm1319_vm1, %v3379_v56, -inf  ;;  %v1012_v51 = vsel %vm966_vm2, %v3379_v56, -inf  ;;  %2445 = vmatmul.msk.f32.gmra.mxu1 %vm72_vm0, %v3261_v23  ;;  %854 = vmatpush.msrb.mxu0 %v847_v49 }
 0x14a   :  { %1366 = vmax.xlane.f32.xlu1 %v1365_v1  ;;  %1013 = vmax.xlane.f32.xlu0 %v1012_v51  ;;  %2516 = vpow2.f32 %v1095_v61  ;;  %v846_v1 = vld [vmem:[%s4909_s5 + $0x68] sm:$0xff] }
 0x14b   :  { %v610_v41 = vpop.f32.mrf.mxu2  ;;  %2518 = vpow2.f32 %v1448_v29  ;;  %2459 = vmatpush.msra.mxu3 %v847_v49  ;;  %855 = vmatpush.msrb.mxu0 %v846_v1 }
 0x14c   :  { %v611_v10 = vadd.f32 %v3318_v45, %v610_v41  ;;  %v845_v41 = vld [vmem:[%s4909_s5 + $0x60] sm:$0xff] }
 0x14d   :  { %v1325_v21 = vpop.xlane.xlu2 %1324  ;;  %v972_v25 = vpop.xlane.xlu0 %971  ;;  %2460 = vmatpush.msra.mxu3 %v846_v1  ;;  %856 = vmatpush.msrb.mxu0 %v845_v41 }
 0x14e   :  { %v347_v63 = vpop.f32.mrf.mxu1  ;;  %v694_v0 = vmax.f32 %v611_v10, 0.0  ;;  %v1417_v27 = vsub.f32 %v3180_v22, %v1325_v21  ;;  %v844_v10 = vld [vmem:[%s4909_s5 + $0x58] sm:$0xff]  ;;  %v1064_v29 = vsub.f32 %v3180_v22, %v972_v25  ;;  %v839_v22 = vld [vmem:[%s4909_s5 + $0x30] sm:$0xff]  ;;  %v837_v25 = vld [vmem:[%s4909_s5 + $0x20] sm:$0xff] }
 0x14f   :  { %v3390_v3 = vadd.f32 %v347_v63, %v3159_v13  ;;  %v3434_v63 = vpop.f32.mrf.mxu3  ;;  %857 = vmatpush.msrb.mxu0 %v844_v10  ;;  %2461 = vmatpush.msra.mxu3 %v845_v41 }
 0x150   :  { %754 = vmatmul.f32.gmra.mxu3 %v694_v0  ;;  %v3392_v9 = vpop.eup %2516  ;;  %v1450_v37 = vmul.f32 1.442695, %v1417_v27  ;;  %v843_v0 = vld [vmem:[%s4909_s5 + $0x50] sm:$0xff]  ;;  %v1097_v21 = vmul.f32 1.442695, %v1064_v29 }
 0x151   :  { %v1015_v23 = vsel %vm966_vm2, %v3390_v3, -inf  ;;  %v1159_v46 = vsel %vm966_vm2, %v3392_v9, 0.0  ;;  %v1368_v19 = vsel %vm1319_vm1, %v3390_v3, -inf  ;;  %v3406_v15 = vpop.eup %2518  ;;  %858 = vmatpush.msrb.mxu0 %v843_v0  ;;  %2462 = vmatpush.msra.mxu3 %v844_v10 }
 0x152   :  { %1016 = vmax.xlane.f32.xlu1 %v1015_v23  ;;  %1160 = vadd.xlane.f32.xlu2 %v1159_v46  ;;  %2520 = vpow2.f32 %v1450_v37  ;;  %v842_v46 = vld [vmem:[%s4909_s5 + $0x48] sm:$0xff] }
 0x153   :  { %v613_v14 = vpop.f32.mrf.mxu2  ;;  %859 = vmatpush.msrb.mxu0 %v842_v46  ;;  %2463 = vmatpush.msra.mxu3 %v843_v0 }
 0x154   :  { %v614_v12 = vadd.f32 %v3318_v45, %v613_v14 }
 0x155   :  { %v1328_v47 = vpop.xlane.xlu0 %1327  ;;  %2464 = vmatpush.msra.mxu3 %v842_v46  ;;  %v975_v37 = vpop.xlane.xlu1 %974 }
 0x156   :  { %v695_v16 = vmax.f32 %v614_v12, 0.0  ;;  %v350_v24 = vpop.f32.mrf.mxu1  ;;  %v1418_v55 = vsub.f32 %v3198_v59, %v1328_v47  ;;  %v841_v12 = vld [vmem:[%s4909_s5 + $0x40] sm:$0xff] }
 0x157   :  { %v3404_v30 = vadd.f32 %v350_v24, %v3159_v13  ;;  %860 = vmatpush.msrb.mxu0 %v841_v12  ;;  %2465 = vmatpush.msra.mxu3 %v841_v12 }
 0x158   :  { %757 = vmatmul.f32.gmra.mxu3 %v695_v16  ;;  %v3416_v48 = vpop.eup %2520  ;;  %v1452_v62 = vmul.f32 1.442695, %v1418_v55  ;;  %v840_v16 = vld [vmem:[%s4909_s5 + $0x38] sm:$0xff] }
 0x159   :  { %v1018_v38 = vsel %vm966_vm2, %v3404_v30, -inf  ;;  %861 = vmatpush.msrb.mxu0 %v840_v16  ;;  %2466 = vmatpush.msra.mxu3 %v840_v16 }
 0x15a   :  { %1369 = vmax.xlane.f32.xlu2 %v1368_v19  ;;  %2522 = vpow2.f32 %v1452_v62  ;;  %v1371_v62 = vsel %vm1319_vm1, %v3404_v30, -inf }
 0x15b   :  { %v616_v43 = vpop.f32.mrf.mxu2  ;;  %862 = vmatpush.msrb.mxu0 %v839_v22  ;;  %2524 = vpow2.f32 %v1097_v21  ;;  %2467 = vmatpush.msra.mxu3 %v839_v22 }
 0x15c   :  { %v617_v33 = vadd.f32 %v3318_v45, %v616_v43 }
 0x15e   :  { %v696_v34 = vmax.f32 %v617_v33, 0.0  ;;  %1544 = vrot.lane.b32.xlu0 %v3406_v15, %s2800_s18  ;;  %v3457_v43 = vpop.f32.mrf.mxu3  ;;  %v838_v33 = vld [vmem:[%s4909_s5 + $0x28] sm:$0xff]  ;;  %v353_v0 = vpop.f32.mrf.mxu1 }
 0x15f   :  { %863 = vmatpush.msrb.mxu0 %v838_v33  ;;  %2468 = vmatpush.msra.mxu3 %v838_v33  ;;  %v3494_v29 = vadd.f32 %v353_v0, %v3159_v13 }
 0x160   :  { %760 = vmatmul.f32.gmra.mxu3 %v696_v34  ;;  %v3450_v19 = vpop.eup %2522 }
 0x161   :  { %4957 = vst [vmem:[#allocation2_spill] sm:$0xff] %v3450_v19  ;;  %864 = vmatpush.msrb.mxu0 %v837_v25  ;;  %2469 = vmatpush.msra.mxu3 %v837_v25  ;;  %v3476_v47 = vpop.eup %2524  ;;  %v1021_v22 = vsel %vm966_vm2, %v3494_v29, -inf }
 0x162   :  { %1019 = vmax.xlane.f32.xlu2 %v1018_v38  ;;  %v836_v38 = vld [vmem:[%s4909_s5 + $0x18] sm:$0xff]  ;;  %v1162_v1 = vsel %vm966_vm2, %v3476_v47, 0.0 }
 0x163   :  { %v619_v40 = vpop.f32.mrf.mxu2  ;;  %865 = vmatpush.msrb.mxu0 %v836_v38  ;;  %2470 = vmatpush.msra.mxu3 %v836_v38 }
 0x164   :  { %v620_v58 = vadd.f32 %v3318_v45, %v619_v40  ;;  %v835_v40 = vld [vmem:[%s4909_s5 + $0x10] sm:$0xff] }
 0x165   :  { %866 = vmatpush.msrb.mxu0 %v835_v40  ;;  %2471 = vmatpush.msra.mxu3 %v835_v40  ;;  %v1374_v40 = vsel %vm1319_vm1, %v3494_v29, -inf }
 0x166   :  { %v697_v5 = vmax.f32 %v620_v58, 0.0  ;;  %v1065_v58 = vsub.f32 %v3198_v59, %v975_v37  ;;  %v833_v59 = vld [vmem:[%s4909_s5] sm:$0xff]  ;;  %v356_v37 = vpop.f32.mrf.mxu1 }
 0x167   :  { %867 = vmatpush.msrb.mxu0 %v834_v8  ;;  %2472 = vmatpush.msra.mxu3 %v834_v8  ;;  %v3509_v8 = vadd.f32 %v356_v37, %v3159_v13 }
 0x168   :  { %763 = vmatmul.f32.gmra.mxu3 %v697_v5 }
 0x169   :  { %868 = vmatpush.msrb.mxu0 %v833_v59  ;;  %2473 = vmatpush.msra.mxu3 %v833_v59  ;;  %v1024_v59 = vsel %vm966_vm2, %v3509_v8, -inf  ;;  %v1377_v0 = vsel %vm1319_vm1, %v3509_v8, -inf }
 0x16b   :  { %1546 = vrot.lane.b32.xlu1 %v3416_v48, %s2800_s18  ;;  %v622_v53 = vpop.f32.mrf.mxu2 }
 0x16c   :  { %v623_v61 = vadd.f32 %v3318_v45, %v622_v53  ;;  %v3479_v53 = vpop.f32.mrf.mxu3 }
 0x16e   :  { %v698_v51 = vmax.f32 %v623_v61, 0.0  ;;  %v1099_v61 = vmul.f32 1.442695, %v1065_v58 }
 0x170   :  { %766 = vmatmul.f32.gmra.mxu3 %v698_v51  ;;  %2526 = vpow2.f32 %v1099_v61 }
 0x173   :  { %v625_v2 = vpop.f32.mrf.mxu2 }
 0x174   :  { %v626_v23 = vadd.f32 %v3318_v45, %v625_v2  ;;  %v978_v2 = vpop.xlane.xlu1 %977 }
 0x176   :  { %v699_v14 = vmax.f32 %v626_v23, 0.0  ;;  %v3489_v23 = vpop.f32.mrf.mxu3  ;;  %v3491_v46 = vpop.eup %2526 }
 0x177   :  { %v1165_v21 = vsel %vm966_vm2, %v3491_v46, 0.0 }
 0x178   :  { %769 = vmatmul.f32.gmra.mxu3 %v699_v14  ;;  %v1066_v14 = vsub.f32 %v3218_v7, %v978_v2 }
 0x17a   :  { %1548 = vrot.lane.b32.xlu2 %v3450_v19, %s2800_s18 }
 0x17b   :  { %v628_v24 = vpop.f32.mrf.mxu2 }
 0x17c   :  { %v629_v27 = vadd.f32 %v3318_v45, %v628_v24  ;;  %v1101_v24 = vmul.f32 1.442695, %v1066_v14 }
 0x17e   :  { %v700_v34 = vmax.f32 %v629_v27, 0.0  ;;  %v3502_v33 = vpop.f32.mrf.mxu3  ;;  %2528 = vpow2.f32 %v1101_v24 }
 0x180   :  { %772 = vmatmul.f32.gmra.mxu3 %v700_v34  ;;  %v1331_v34 = vpop.xlane.xlu1 %1330 }
 0x181   :  { %v1419_v58 = vsub.f32 %v3218_v7, %v1331_v34 }
 0x183   :  { %v631_v5 = vpop.f32.mrf.mxu2 }
 0x184   :  { %v632_v49 = vadd.f32 %v3318_v45, %v631_v5 }
 0x186   :  { %v701_v55 = vmax.f32 %v632_v49, 0.0  ;;  %v3511_v49 = vpop.eup %2528 }
 0x187   :  { %v1168_v61 = vsel %vm966_vm2, %v3511_v49, 0.0 }
 0x188   :  { %1163 = vadd.xlane.f32.xlu0 %v1162_v1  ;;  %775 = vmatmul.f32.gmra.mxu3 %v701_v55  ;;  %v1454_v55 = vmul.f32 1.442695, %v1419_v58 }
 0x18a   :  { %2530 = vpow2.f32 %v1454_v55 }
 0x18b   :  { %v634_v51 = vpop.f32.mrf.mxu2 }
 0x18c   :  { %v635_v41 = vadd.f32 %v3318_v45, %v634_v51 }
 0x18e   :  { %v702_v10 = vmax.f32 %v635_v41, 0.0 }
 0x190   :  { %1372 = vmax.xlane.f32.xlu0 %v1371_v62  ;;  %778 = vmatmul.f32.gmra.mxu3 %v702_v10  ;;  %v981_v10 = vpop.xlane.xlu2 %980  ;;  %v3521_v2 = vpop.eup %2530 }
 0x191   :  { %4958 = vst [vmem:[#allocation3_spill] sm:$0xff] %v3521_v2 }
 0x193   :  { %v637_v12 = vpop.f32.mrf.mxu2 }
 0x194   :  { %v638_v16 = vadd.f32 %v3318_v45, %v637_v12 }
 0x195   :  { %1166 = vadd.xlane.f32.xlu1 %v1165_v21 }
 0x196   :  { %v703_v27 = vmax.f32 %v638_v16, 0.0  ;;  %v1337_v16 = vpop.xlane.xlu0 %1336 }
 0x198   :  { %1022 = vmax.xlane.f32.xlu0 %v1021_v22  ;;  %781 = vmatmul.f32.gmra.mxu3 %v703_v27  ;;  %v1421_v27 = vsub.f32 %v3256_v44, %v1337_v16  ;;  %v1334_v34 = vpop.xlane.xlu2 %1333 }
 0x19b   :  { %v640_v25 = vpop.f32.mrf.mxu2 }
 0x19c   :  { %v641_v38 = vadd.f32 %v3318_v45, %v640_v25  ;;  %v1458_v25 = vmul.f32 1.442695, %v1421_v27 }
 0x19d   :  { %1375 = vmax.xlane.f32.xlu1 %v1374_v40  ;;  %v1420_v40 = vsub.f32 %v3236_v32, %v1334_v34 }
 0x19e   :  { %v704_v5 = vmax.f32 %v641_v38, 0.0  ;;  %2532 = vpow2.f32 %v1458_v25 }
 0x19f   :  { %v1456_v58 = vmul.f32 1.442695, %v1420_v40 }
 0x1a0   :  { %784 = vmatmul.f32.gmra.mxu3 %v704_v5  ;;  %v984_v16 = vpop.xlane.xlu2 %983 }
 0x1a1   :  { %2534 = vpow2.f32 %v1456_v58 }
 0x1a3   :  { %v643_v1 = vpop.f32.mrf.mxu2  ;;  %v737_v51 = vpop.f32.mrf.mxu3  ;;  %1169 = vadd.xlane.f32.xlu2 %v1168_v61 }
 0x1a4   :  { %v644_v7 = vadd.f32 %v3318_v45, %v643_v1  ;;  %v738_v41 = vadd.f32 %v3318_v45, %v737_v51  ;;  %v1067_v51 = vsub.f32 %v3236_v32, %v981_v10  ;;  %v1068_v10 = vsub.f32 %v3256_v44, %v984_v16  ;;  %v987_v44 = vpop.xlane.xlu0 %986 }
 0x1a5   :  { %1025 = vmax.xlane.f32.xlu1 %v1024_v59  ;;  %v3531_v59 = vpop.eup %2532  ;;  %v1069_v58 = vsub.f32 %v3276_v57, %v987_v44 }
 0x1a6   :  { %v705_v62 = vmax.f32 %v644_v7, 0.0  ;;  %869 = vmatmul.f32.vlgmr.msrb.gmra.mxu0 %v738_v41  ;;  %4959 = vst [vmem:[#allocation4_spill] sm:$0xff] %v3531_v59  ;;  %v1103_v41 = vmul.f32 1.442695, %v1067_v51  ;;  %v1105_v27 = vmul.f32 1.442695, %v1068_v10 }
 0x1a7   :  { %v3535_v61 = vpop.eup %2534 }
 0x1a8   :  { %787 = vmatmul.f32.gmra.mxu3 %v705_v62  ;;  %4960 = vst [vmem:[#allocation5_spill] sm:$0xff] %v3535_v61  ;;  %2536 = vpow2.f32 %v1103_v41 }
 0x1a9   :  { %2538 = vpow2.f32 %v1105_v27 }
 0x1ab   :  { %v646_v14 = vpop.f32.mrf.mxu2  ;;  %v740_v12 = vpop.f32.mrf.mxu3  ;;  %1378 = vmax.xlane.f32.xlu2 %v1377_v0 }
 0x1ac   :  { %v647_v21 = vadd.f32 %v3318_v45, %v646_v14  ;;  %1550 = vrot.lane.b32.xlu0 %v3521_v2, %s2800_s18  ;;  %v741_v22 = vadd.f32 %v3318_v45, %v740_v12  ;;  %v359_v12 = vpop.f32.mrf.mxu1 }
 0x1ae   :  { %v706_v24 = vmax.f32 %v647_v21, 0.0  ;;  %872 = vmatmul.f32.gmra.mxu0 %v741_v22  ;;  %v3542_v14 = vpop.eup %2536 }
 0x1af   :  { %v1171_v32 = vsel %vm966_vm2, %v3542_v14, 0.0 }
 0x1b0   :  { %790 = vmatmul.f32.gmra.mxu3 %v706_v24  ;;  %v3549_v24 = vadd.f32 %v359_v12, %v3159_v13 }
 0x1b2   :  { %v1380_v25 = vsel %vm1319_vm1, %v3549_v24, -inf  ;;  %v1027_v16 = vsel %vm966_vm2, %v3549_v24, -inf }
 0x1b3   :  { %v743_v37 = vpop.f32.mrf.mxu3 }
 0x1b4   :  { %v744_v38 = vadd.f32 %v3318_v45, %v743_v37 }
 0x1b6   :  { %875 = vmatmul.f32.gmra.mxu0 %v744_v38  ;;  %v362_v38 = vpop.f32.mrf.mxu1 }
 0x1b7   :  { %v3555_v40 = vadd.f32 %v362_v38, %v3159_v13 }
 0x1b9   :  { %v1383_v10 = vsel %vm1319_vm1, %v3555_v40, -inf }
 0x1bb   :  { %v746_v5 = vpop.f32.mrf.mxu3 }
 0x1bc   :  { %v747_v55 = vadd.f32 %v3318_v45, %v746_v5 }
 0x1be   :  { %1554 = vrot.lane.b32.xlu1 %v3531_v59, %s2800_s18  ;;  %878 = vmatmul.f32.gmra.mxu0 %v747_v55  ;;  %v1030_v55 = vsel %vm966_vm2, %v3555_v40, -inf }
 0x1c3   :  { %v749_v1 = vpop.f32.mrf.mxu3  ;;  %1552 = vrot.lane.b32.xlu2 %v3535_v61, %s2800_s18 }
 0x1c4   :  { %v750_v7 = vadd.f32 %v3318_v45, %v749_v1  ;;  %v3560_v1 = vpop.eup %2538 }
 0x1c5   :  { %v1174_v41 = vsel %vm966_vm2, %v3560_v1, 0.0 }
 0x1c6   :  { %881 = vmatmul.f32.gmra.mxu0 %v750_v7  ;;  %v1107_v7 = vmul.f32 1.442695, %v1069_v58 }
 0x1c8   :  { %2540 = vpow2.f32 %v1107_v7 }
 0x1cb   :  { %v752_v62 = vpop.f32.mrf.mxu3 }
 0x1cc   :  { %v753_v0 = vadd.f32 %v3318_v45, %v752_v62  ;;  %v1340_v62 = vpop.xlane.xlu1 %1339 }
 0x1ce   :  { %884 = vmatmul.f32.gmra.mxu0 %v753_v0  ;;  %v1422_v0 = vsub.f32 %v3276_v57, %v1340_v62  ;;  %v3571_v27 = vpop.eup %2540 }
 0x1d3   :  { %v755_v21 = vpop.f32.mrf.mxu3 }
 0x1d4   :  { %v756_v22 = vadd.f32 %v3318_v45, %v755_v21 }
 0x1d6   :  { %1172 = vadd.xlane.f32.xlu0 %v1171_v32  ;;  %887 = vmatmul.f32.gmra.mxu0 %v756_v22  ;;  %v365_v22 = vpop.f32.mrf.mxu1  ;;  %v1460_v32 = vmul.f32 1.442695, %v1422_v0 }
 0x1d8   :  { %2542 = vpow2.f32 %v1460_v32 }
 0x1db   :  { %v758_v34 = vpop.f32.mrf.mxu3 }
 0x1dc   :  { %v759_v37 = vadd.f32 %v3318_v45, %v758_v34  ;;  %v3574_v34 = vadd.f32 %v365_v22, %v3159_v13 }
 0x1de   :  { %1381 = vmax.xlane.f32.xlu0 %v1380_v25  ;;  %890 = vmatmul.f32.gmra.mxu0 %v759_v37  ;;  %v1177_v37 = vsel %vm966_vm2, %v3571_v27, 0.0  ;;  %v1033_v38 = vsel %vm966_vm2, %v3574_v34, -inf  ;;  %v3581_v44 = vpop.eup %2542  ;;  %v1386_v58 = vsel %vm1319_vm1, %v3574_v34, -inf }
 0x1df   :  { %4961 = vst [vmem:[#allocation6_spill] sm:$0xff] %v3581_v44 }
 0x1e3   :  { %v761_v5 = vpop.f32.mrf.mxu3 }
 0x1e4   :  { %v762_v51 = vadd.f32 %v3318_v45, %v761_v5 }
 0x1e6   :  { %1031 = vmax.xlane.f32.xlu0 %v1030_v55  ;;  %893 = vmatmul.f32.gmra.mxu0 %v762_v51  ;;  %v1346_v51 = vpop.xlane.xlu0 %1345 }
 0x1e7   :  { %v1424_v7 = vsub.f32 %v3302_v20, %v1346_v51 }
 0x1e8   :  { %1175 = vadd.xlane.f32.xlu1 %v1174_v41  ;;  %v1343_v41 = vpop.xlane.xlu2 %1342 }
 0x1eb   :  { %v764_v12 = vpop.f32.mrf.mxu3 }
 0x1ec   :  { %v765_v21 = vadd.f32 %v3318_v45, %v764_v12  ;;  %1028 = vmax.xlane.f32.xlu2 %v1027_v16  ;;  %v1423_v12 = vsub.f32 %v3289_v6, %v1343_v41  ;;  %v1464_v16 = vmul.f32 1.442695, %v1424_v7 }
 0x1ee   :  { %896 = vmatmul.f32.gmra.mxu0 %v765_v21  ;;  %v1462_v21 = vmul.f32 1.442695, %v1423_v12  ;;  %2544 = vpow2.f32 %v1464_v16 }
 0x1f0   :  { %1384 = vmax.xlane.f32.xlu1 %v1383_v10  ;;  %2546 = vpow2.f32 %v1462_v21  ;;  %v990_v10 = vpop.xlane.xlu1 %989 }
 0x1f3   :  { %v767_v57 = vpop.f32.mrf.mxu3 }
 0x1f4   :  { %v768_v25 = vadd.f32 %v3318_v45, %v767_v57  ;;  %1178 = vadd.xlane.f32.xlu2 %v1177_v37  ;;  %v3592_v57 = vpop.eup %2544 }
 0x1f5   :  { %4962 = vst [vmem:[#allocation7_spill] sm:$0xff] %v3592_v57 }
 0x1f6   :  { %899 = vmatmul.f32.gmra.mxu0 %v768_v25  ;;  %v1070_v25 = vsub.f32 %v3289_v6, %v990_v10 }
 0x1f8   :  { %1034 = vmax.xlane.f32.xlu1 %v1033_v38  ;;  %v3597_v38 = vpop.eup %2546 }
 0x1f9   :  { %4963 = vst [vmem:[#allocation8_spill] sm:$0xff] %v3597_v38 }
 0x1fa   :  { %1556 = vrot.lane.b32.xlu0 %v3581_v44, %s2800_s18 }
 0x1fb   :  { %v770_v5 = vpop.f32.mrf.mxu3 }
 0x1fc   :  { %v771_v55 = vadd.f32 %v3318_v45, %v770_v5  ;;  %1387 = vmax.xlane.f32.xlu2 %v1386_v58  ;;  %v244_v58 = vadd.f32 %v3161_v17, %v3111_v52 }
 0x1fe   :  { %902 = vmatmul.f32.gmra.mxu0 %v771_v55  ;;  %v1109_v55 = vmul.f32 1.442695, %v1070_v25  ;;  %v414_v51 = vmul.f32 0.5, %v244_v58 }
 0x200   :  { %2548 = vpow2.f32 %v1109_v55 }
 0x201   :  { %2550 = vtanh.f32 %v414_v51 }
 0x203   :  { %v773_v62 = vpop.f32.mrf.mxu3 }
 0x204   :  { %v774_v0 = vadd.f32 %v3318_v45, %v773_v62  ;;  %v368_v62 = vpop.f32.mrf.mxu1 }
 0x206   :  { %905 = vmatmul.f32.gmra.mxu0 %v774_v0  ;;  %v3605_v6 = vpop.eup %2548 }
 0x207   :  { %v2551_v0 = vpop.eup %2550  ;;  %v1180_v17 = vsel %vm966_vm2, %v3605_v6, 0.0 }
 0x208   :  { %v478_v21 = vadd.f32 1.0, %v2551_v0 }
 0x20b   :  { %v776_v22 = vpop.f32.mrf.mxu3 }
 0x20c   :  { %v777_v32 = vadd.f32 %v3318_v45, %v776_v22  ;;  %v3611_v22 = vadd.f32 %v368_v62, %v3159_v13  ;;  %v371_v58 = vpop.f32.mrf.mxu1  ;;  %v247_v62 = vadd.f32 %v3177_v39, %v3111_v52 }
 0x20e   :  { %908 = vmatmul.f32.gmra.mxu0 %v777_v32  ;;  %v993_v32 = vpop.xlane.xlu2 %992  ;;  %v1389_v25 = vsel %vm1319_vm1, %v3611_v22, -inf }
 0x20f   :  { %v1071_v10 = vsub.f32 %v3302_v20, %v993_v32  ;;  %v996_v20 = vpop.xlane.xlu0 %995  ;;  %v1349_v32 = vpop.xlane.xlu1 %1348 }
 0x211   :  { %1560 = vrot.lane.b32.xlu1 %v3592_v57, %s2800_s18 }
 0x213   :  { %v779_v37 = vpop.f32.mrf.mxu3 }
 0x214   :  { %v780_v5 = vadd.f32 %v3318_v45, %v779_v37  ;;  %1558 = vrot.lane.b32.xlu2 %v3597_v38, %s2800_s18  ;;  %v510_v37 = vmul.f32 0.5, %v478_v21  ;;  %v415_v21 = vmul.f32 0.5, %v247_v62 }
 0x216   :  { %911 = vmatmul.f32.gmra.mxu0 %v780_v5  ;;  %v562_v55 = vmax.f32 %v510_v37, 0.0  ;;  %v1425_v37 = vsub.f32 %v3313_v42, %v1349_v32 }
 0x218   :  { %648 = vmatmul.f32.gmra.mxu2 %v562_v55  ;;  %v1036_v55 = vsel %vm966_vm2, %v3611_v22, -inf }
 0x21b   :  { %v782_v7 = vpop.f32.mrf.mxu3 }
 0x21c   :  { %v783_v41 = vadd.f32 %v3318_v45, %v782_v7  ;;  %v1111_v7 = vmul.f32 1.442695, %v1071_v10 }
 0x21e   :  { %914 = vmatmul.f32.gmra.mxu0 %v783_v41  ;;  %v3618_v41 = vadd.f32 %v371_v58, %v3159_v13  ;;  %2552 = vpow2.f32 %v1111_v7  ;;  %v374_v7 = vpop.f32.mrf.mxu1 }
 0x21f   :  { %2554 = vtanh.f32 %v415_v21 }
 0x220   :  { %v1039_v0 = vsel %vm966_vm2, %v3618_v41, -inf }
 0x223   :  { %v785_v12 = vpop.f32.mrf.mxu3 }
 0x224   :  { %v786_v16 = vadd.f32 %v3318_v45, %v785_v12  ;;  %1181 = vadd.xlane.f32.xlu0 %v1180_v17  ;;  %v1072_v17 = vsub.f32 %v3313_v42, %v996_v20  ;;  %v3626_v10 = vpop.eup %2552  ;;  %v1392_v42 = vsel %vm1319_vm1, %v3618_v41, -inf  ;;  %v3640_v20 = vadd.f32 %v374_v7, %v3159_v13 }
 0x225   :  { %v1183_v58 = vsel %vm966_vm2, %v3626_v10, 0.0 }
 0x226   :  { %917 = vmatmul.f32.gmra.mxu0 %v786_v16  ;;  %v1113_v39 = vmul.f32 1.442695, %v1072_v17  ;;  %v1042_v21 = vsel %vm966_vm2, %v3640_v20, -inf }
 0x228   :  { %2556 = vpow2.f32 %v1113_v39  ;;  %v1395_v39 = vsel %vm1319_vm1, %v3640_v20, -inf }
 0x22b   :  { %v788_v5 = vpop.f32.mrf.mxu3 }
 0x22c   :  { %v789_v51 = vadd.f32 %v3318_v45, %v788_v5  ;;  %1390 = vmax.xlane.f32.xlu0 %v1389_v25  ;;  %v250_v25 = vadd.f32 %v3200_v60, %v3111_v52 }
 0x22e   :  { %920 = vmatmul.f32.gmra.mxu0 %v789_v51  ;;  %v416_v5 = vmul.f32 0.5, %v250_v25  ;;  %v2555_v51 = vpop.eup %2554 }
 0x22f   :  { %v3635_v60 = vpop.eup %2556  ;;  %v479_v62 = vadd.f32 1.0, %v2555_v51 }
 0x230   :  { %2558 = vtanh.f32 %v416_v5  ;;  %v1355_v5 = vpop.xlane.xlu0 %1354 }
 0x231   :  { %v511_v17 = vmul.f32 0.5, %v479_v62  ;;  %v253_v62 = vadd.f32 %v3229_v11, %v3111_v52 }
 0x233   :  { %v791_v12 = vpop.f32.mrf.mxu3  ;;  %v563_v32 = vmax.f32 %v511_v17, 0.0 }
 0x234   :  { %v792_v16 = vadd.f32 %v3318_v45, %v791_v12  ;;  %1040 = vmax.xlane.f32.xlu0 %v1039_v0  ;;  %v1466_v45 = vmul.f32 1.442695, %v1425_v37  ;;  %v1186_v0 = vsel %vm966_vm2, %v3635_v60, 0.0 }
 0x235   :  { %651 = vmatmul.f32.gmra.mxu2 %v563_v32 }
 0x236   :  { %923 = vmatmul.f32.gmra.mxu0 %v792_v16  ;;  %2560 = vpow2.f32 %v1466_v45  ;;  %v2559_v12 = vpop.eup %2558  ;;  %v1352_v45 = vpop.xlane.xlu2 %1351 }
 0x237   :  { %v480_v25 = vadd.f32 1.0, %v2559_v12  ;;  %v1426_v51 = vsub.f32 %v3328_v26, %v1352_v45  ;;  %v417_v12 = vmul.f32 0.5, %v253_v62 }
 0x239   :  { %v512_v37 = vmul.f32 0.5, %v480_v25 }
 0x23b   :  { %1184 = vadd.xlane.f32.xlu1 %v1183_v58  ;;  %v564_v58 = vmax.f32 %v512_v37, 0.0 }
 0x23c   :  { %v3644_v16 = vpop.eup %2560 }
 0x23d   :  { %1037 = vmax.xlane.f32.xlu2 %v1036_v55  ;;  %4964 = vst [vmem:[#allocation9_spill] sm:$0xff] %v3644_v16  ;;  %654 = vmatmul.f32.gmra.mxu2 %v564_v58  ;;  %v1427_v55 = vsub.f32 %v3338_v4, %v1355_v5  ;;  %v377_v58 = vpop.f32.mrf.mxu1 }
 0x23e   :  { %v1002_v62 = vpop.xlane.xlu2 %1001 }
 0x23f   :  { %v1470_v7 = vmul.f32 1.442695, %v1427_v55  ;;  %v3670_v55 = vadd.f32 %v377_v58, %v3159_v13  ;;  %v1005_v58 = vpop.xlane.xlu0 %1004 }
 0x241   :  { %2562 = vpow2.f32 %v1470_v7 }
 0x243   :  { %1393 = vmax.xlane.f32.xlu1 %v1392_v42  ;;  %v1468_v42 = vmul.f32 1.442695, %v1426_v51  ;;  %v1398_v51 = vsel %vm1319_vm1, %v3670_v55, -inf }
 0x245   :  { %1187 = vadd.xlane.f32.xlu2 %v1186_v0  ;;  %v999_v0 = vpop.xlane.xlu1 %998  ;;  %2564 = vpow2.f32 %v1468_v42  ;;  %v380_v7 = vpop.f32.mrf.mxu1  ;;  %v256_v42 = vadd.f32 %v3251_v36, %v3111_v52  ;;  %v1075_v36 = vsub.f32 %v3348_v18, %v1005_v58 }
 0x246   :  { %v1073_v17 = vsub.f32 %v3328_v26, %v999_v0  ;;  %2566 = vtanh.f32 %v417_v12  ;;  %v3677_v0 = vadd.f32 %v380_v7, %v3159_v13  ;;  %v1074_v12 = vsub.f32 %v3338_v4, %v1002_v62 }
 0x247   :  { %v1119_v4 = vmul.f32 1.442695, %v1075_v36 }
 0x248   :  { %1562 = vrot.lane.b32.xlu0 %v3644_v16, %s2800_s18  ;;  %v1115_v32 = vmul.f32 1.442695, %v1073_v17  ;;  %v418_v17 = vmul.f32 0.5, %v256_v42  ;;  %v1401_v36 = vsel %vm1319_vm1, %v3677_v0, -inf }
 0x24a   :  { %2568 = vpow2.f32 %v1115_v32  ;;  %v1048_v32 = vsel %vm966_vm2, %v3677_v0, -inf }
 0x24b   :  { %1043 = vmax.xlane.f32.xlu1 %v1042_v21  ;;  %v3657_v21 = vpop.eup %2562  ;;  %2570 = vtanh.f32 %v418_v17 }
 0x24c   :  { %4965 = vst [vmem:[#allocation10_spill] sm:$0xff] %v3657_v21  ;;  %v3661_v25 = vpop.eup %2564 }
 0x24d   :  { %1396 = vmax.xlane.f32.xlu2 %v1395_v39  ;;  %4966 = vst [vmem:[#allocation11_spill] sm:$0xff] %v3661_v25  ;;  %v2567_v11 = vpop.eup %2566  ;;  %v383_v58 = vpop.f32.mrf.mxu1 }
 0x24e   :  { %v481_v39 = vadd.f32 1.0, %v2567_v11  ;;  %v1117_v11 = vmul.f32 1.442695, %v1074_v12  ;;  %v1045_v12 = vsel %vm966_vm2, %v3670_v55, -inf }
 0x250   :  { %v3665_v37 = vpop.eup %2568  ;;  %v513_v5 = vmul.f32 0.5, %v481_v39  ;;  %v259_v39 = vadd.f32 %v3273_v50, %v3111_v52  ;;  %2572 = vpow2.f32 %v1117_v11 }
 0x251   :  { %v1189_v26 = vsel %vm966_vm2, %v3665_v37, 0.0 }
 0x252   :  { %v565_v45 = vmax.f32 %v513_v5, 0.0  ;;  %v1358_v5 = vpop.xlane.xlu1 %1357 }
 0x254   :  { %657 = vmatmul.f32.gmra.mxu2 %v565_v45  ;;  %v1428_v45 = vsub.f32 %v3348_v18, %v1358_v5 }
 0x256   :  { %v1472_v42 = vmul.f32 1.442695, %v1428_v45  ;;  %v3703_v45 = vadd.f32 %v383_v58, %v3159_v13 }
 0x264   :  { %1566 = vrot.lane.b32.xlu1 %v3657_v21, %s2800_s18 }
 0x265   :  { %1564 = vrot.lane.b32.xlu2 %v3661_v25, %s2800_s18 }
 0x272   :  { %1190 = vadd.xlane.f32.xlu0 %v1189_v26  ;;  %v419_v26 = vmul.f32 0.5, %v259_v39 }
 0x274   :  { %2574 = vtanh.f32 %v419_v26 }
 0x275   :  { %2576 = vpow2.f32 %v1119_v4 }
 0x276   :  { %2578 = vpow2.f32 %v1472_v42  ;;  %v1404_v42 = vsel %vm1319_vm1, %v3703_v45, -inf }
 0x27a   :  { %1399 = vmax.xlane.f32.xlu0 %v1398_v51  ;;  %v2571_v51 = vpop.eup %2570 }
 0x27b   :  { %v3686_v7 = vpop.eup %2572  ;;  %v482_v62 = vadd.f32 1.0, %v2571_v51 }
 0x27c   :  { %v1192_v50 = vsel %vm966_vm2, %v3686_v7, 0.0 }
 0x27d   :  { %v514_v17 = vmul.f32 0.5, %v482_v62  ;;  %v1051_v62 = vsel %vm966_vm2, %v3703_v45, -inf }
 0x27f   :  { %v566_v18 = vmax.f32 %v514_v17, 0.0  ;;  %v1361_v17 = vpop.xlane.xlu2 %1360 }
 0x281   :  { %660 = vmatmul.f32.gmra.mxu2 %v566_v18  ;;  %v1429_v18 = vsub.f32 %v3358_v31, %v1361_v17 }
 0x282   :  { %1049 = vmax.xlane.f32.xlu0 %v1048_v32  ;;  %v2575_v32 = vpop.eup %2574 }
 0x283   :  { %v3692_v11 = vpop.eup %2576  ;;  %v483_v39 = vadd.f32 1.0, %v2575_v32  ;;  %v1364_v32 = vpop.xlane.xlu0 %1363  ;;  %v1474_v58 = vmul.f32 1.442695, %v1429_v18 }
 0x284   :  { %v3694_v5 = vpop.eup %2578  ;;  %v1195_v26 = vsel %vm966_vm2, %v3692_v11, 0.0 }
 0x285   :  { %4967 = vst [vmem:[#allocation12_spill] sm:$0xff] %v3694_v5  ;;  %v515_v51 = vmul.f32 0.5, %v483_v39  ;;  %v1430_v39 = vsub.f32 %v3368_v35, %v1364_v32 }
 0x287   :  { %v567_v4 = vmax.f32 %v515_v51, 0.0 }
 0x289   :  { %663 = vmatmul.f32.gmra.mxu2 %v567_v4 }
 0x28e   :  { %1193 = vadd.xlane.f32.xlu1 %v1192_v50  ;;  %1046 = vmax.xlane.f32.xlu2 %v1045_v12  ;;  %v262_v50 = vadd.f32 %v3291_v28, %v3111_v52  ;;  %v3717_v28 = vld [vmem:[%s4908_s4] ss:$0 sm:$0xff] }
 0x290   :  { %v420_v12 = vmul.f32 0.5, %v262_v50 }
 0x292   :  { %2580 = vtanh.f32 %v420_v12 }
 0x293   :  { %2582 = vpow2.f32 %v1474_v58 }
 0x296   :  { %1568 = vrot.lane.b32.xlu0 %v3694_v5, %s2800_s18  ;;  %1402 = vmax.xlane.f32.xlu1 %v1401_v36  ;;  %v1008_v36 = vpop.xlane.xlu1 %1007 }
 0x297   :  { %1196 = vadd.xlane.f32.xlu2 %v1195_v26  ;;  %v1476_v26 = vmul.f32 1.442695, %v1430_v39  ;;  %v1076_v4 = vsub.f32 %v3358_v31, %v1008_v36  ;;  %v386_v36 = vpop.f32.mrf.mxu1 }
 0x298   :  { %v2581_v51 = vpop.eup %2580 }
 0x299   :  { %2584 = vpow2.f32 %v1476_v26  ;;  %v1121_v12 = vmul.f32 1.442695, %v1076_v4  ;;  %v3720_v32 = vpop.eup %2582  ;;  %v265_v4 = vadd.f32 %v3308_v54, %v3111_v52 }
 0x29a   :  { %4968 = vst [vmem:[#allocation13_spill] sm:$0xff] %v3720_v32 }
 0x29b   :  { %2586 = vpow2.f32 %v1121_v12 }
 0x29e   :  { %1052 = vmax.xlane.f32.xlu1 %v1051_v62  ;;  %v649_v62 = vpop.f32.mrf.mxu2  ;;  %v1367_v16 = vpop.xlane.xlu1 %1366 }
 0x29f   :  { %1405 = vmax.xlane.f32.xlu2 %v1404_v42  ;;  %v484_v42 = vadd.f32 1.0, %v2581_v51  ;;  %v650_v50 = vadd.f32 %v3717_v28, %v649_v62  ;;  %v3722_v39 = vpop.eup %2584  ;;  %v3733_v51 = vadd.f32 %v386_v36, %v3159_v13 }
 0x2a0   :  { %4969 = vst [vmem:[#allocation14_spill] sm:$0xff] %v3722_v39 }
 0x2a1   :  { %v707_v17 = vmax.f32 %v650_v50, 0.0  ;;  %v516_v18 = vmul.f32 0.5, %v484_v42  ;;  %v3728_v58 = vpop.eup %2586  ;;  %v1407_v62 = vsel %vm1319_vm1, %v3733_v51, -inf  ;;  %v389_v42 = vpop.f32.mrf.mxu1  ;;  %v421_v50 = vmul.f32 0.5, %v265_v4 }
 0x2a2   :  { %v1198_v26 = vsel %vm966_vm2, %v3728_v58, 0.0  ;;  %v3740_v12 = vadd.f32 %v389_v42, %v3159_v13  ;;  %v268_v4 = vadd.f32 %v3434_v63, %v3111_v52  ;;  %v1014_v42 = vpop.xlane.xlu0 %1013 }
 0x2a3   :  { %793 = vmatmul.f32.gmra.mxu3 %v707_v17  ;;  %v568_v31 = vmax.f32 %v516_v18, 0.0  ;;  %2588 = vtanh.f32 %v421_v50  ;;  %v1011_v17 = vpop.xlane.xlu2 %1010  ;;  %v1078_v21 = vsub.f32 %v3379_v56, %v1014_v42 }
 0x2a4   :  { %v1057_v18 = vsel %vm966_vm2, %v3740_v12, -inf  ;;  %v422_v25 = vmul.f32 0.5, %v268_v4 }
 0x2a5   :  { %666 = vmatmul.f32.gmra.mxu2 %v568_v31 }
 0x2a9   :  { %v2589_v5 = vpop.eup %2588 }
 0x2aa   :  { %v485_v50 = vadd.f32 1.0, %v2589_v5 }
 0x2b7   :  { %1570 = vrot.lane.b32.xlu2 %v3720_v32, %s2800_s18  ;;  %1572 = vrot.lane.b32.xlu1 %v3722_v39, %s2800_s18  ;;  %v1431_v32 = vsub.f32 %v3379_v56, %v1367_v16  ;;  %v1054_v16 = vsel %vm966_vm2, %v3733_v51, -inf }
 0x2b8   :  { %v652_v31 = vpop.f32.mrf.mxu2 }
 0x2b9   :  { %v653_v36 = vadd.f32 %v3717_v28, %v652_v31 }
 0x2bb   :  { %v708_v54 = vmax.f32 %v653_v36, 0.0  ;;  %v1125_v36 = vmul.f32 1.442695, %v1078_v21 }
 0x2bd   :  { %796 = vmatmul.f32.gmra.mxu3 %v708_v54 }
 0x2c0   :  { %1199 = vadd.xlane.f32.xlu0 %v1198_v26  ;;  %v1077_v26 = vsub.f32 %v3368_v35, %v1011_v17  ;;  %v655_v44 = vpop.f32.mrf.mxu2  ;;  %v1478_v17 = vmul.f32 1.442695, %v1431_v32  ;;  %v271_v32 = vadd.f32 %v3457_v43, %v3111_v52  ;;  %v1545_v43 = vpop.permute.xlu0 %1544 }
 0x2c1   :  { %v656_v31 = vadd.f32 %v3717_v28, %v655_v44 }
 0x2c3   :  { %v709_v35 = vmax.f32 %v656_v31, 0.0 }
 0x2c5   :  { %799 = vmatmul.f32.gmra.mxu3 %v709_v35 }
 0x2c8   :  { %1408 = vmax.xlane.f32.xlu0 %v1407_v62  ;;  %v1123_v62 = vmul.f32 1.442695, %v1077_v26  ;;  %v392_v26 = vpop.f32.mrf.mxu1 }
 0x2c9   :  { %v3770_v31 = vadd.f32 %v392_v26, %v3159_v13 }
 0x2ca   :  { %2590 = vpow2.f32 %v1123_v62  ;;  %v1410_v62 = vsel %vm1319_vm1, %v3740_v12, -inf }
 0x2cb   :  { %2592 = vtanh.f32 %v422_v25  ;;  %v1060_v13 = vsel %vm966_vm2, %v3770_v31, -inf }
 0x2cc   :  { %2594 = vpow2.f32 %v1478_v17  ;;  %v3772_v17 = vpop.xlane.xlu2 %1160 }
 0x2cd   :  { %2596 = vpow2.f32 %v1125_v36  ;;  %v1640_v36 = vsel %vm966_vm2, %v1545_v43, 0.0 }
 0x2d0   :  { %1058 = vmax.xlane.f32.xlu0 %v1057_v18  ;;  %v517_v18 = vmul.f32 0.5, %v485_v50  ;;  %v3751_v63 = vpop.eup %2590  ;;  %v423_v50 = vmul.f32 0.5, %v271_v32 }
 0x2d1   :  { %v1201_v56 = vsel %vm966_vm2, %v3751_v63, 0.0  ;;  %v2593_v44 = vpop.eup %2592 }
 0x2d2   :  { %v569_v54 = vmax.f32 %v517_v18, 0.0  ;;  %v3757_v5 = vpop.eup %2594  ;;  %v486_v25 = vadd.f32 1.0, %v2593_v44  ;;  %2598 = vtanh.f32 %v423_v50  ;;  %v1413_v18 = vsel %vm1319_vm1, %v3770_v31, -inf  ;;  %v3777_v44 = vpop.xlane.xlu0 %1163 }
 0x2d3   :  { %4970 = vst [vmem:[#allocation15_spill] sm:$0xff] %v3757_v5  ;;  %v3759_v21 = vpop.eup %2596 }
 0x2d4   :  { %669 = vmatmul.f32.gmra.mxu2 %v569_v54  ;;  %v1204_v4 = vsel %vm966_vm2, %v3759_v21, 0.0  ;;  %v518_v42 = vmul.f32 0.5, %v486_v25 }
 0x2d6   :  { %v570_v35 = vmax.f32 %v518_v42, 0.0 }
 0x2d7   :  { %v658_v25 = vpop.f32.mrf.mxu2 }
 0x2d8   :  { %v2599_v54 = vpop.eup %2598  ;;  %v659_v32 = vadd.f32 %v3717_v28, %v658_v25 }
 0x2da   :  { %v1373_v43 = vpop.xlane.xlu0 %1372 }
 0x2dc   :  { %672 = vmatmul.f32.gmra.mxu2 %v570_v35  ;;  %v1017_v35 = vpop.xlane.xlu1 %1016 }
 0x2e0   :  { %1055 = vmax.xlane.f32.xlu2 %v1054_v16  ;;  %v1370_v16 = vpop.xlane.xlu2 %1369 }
 0x2e1   :  { %1202 = vadd.xlane.f32.xlu1 %v1201_v56  ;;  %v487_v56 = vadd.f32 1.0, %v2599_v54  ;;  %v1432_v26 = vsub.f32 %v3390_v3, %v1370_v16 }
 0x2e3   :  { %v1480_v50 = vmul.f32 1.442695, %v1432_v26 }
 0x2e4   :  { %1574 = vrot.lane.b32.xlu0 %v3757_v5, %s2800_s18  ;;  %v1547_v54 = vpop.permute.xlu1 %1546 }
 0x2e5   :  { %2600 = vpow2.f32 %v1480_v50  ;;  %v1643_v16 = vsel %vm966_vm2, %v1547_v54, 0.0  ;;  %v274_v50 = vadd.f32 %v3479_v53, %v3111_v52 }
 0x2e7   :  { %v424_v54 = vmul.f32 0.5, %v274_v50 }
 0x2e8   :  { %1205 = vadd.xlane.f32.xlu2 %v1204_v4  ;;  %v710_v4 = vmax.f32 %v659_v32, 0.0 }
 0x2e9   :  { %1411 = vmax.xlane.f32.xlu1 %v1410_v62  ;;  %v519_v62 = vmul.f32 0.5, %v487_v56 }
 0x2ea   :  { %802 = vmatmul.f32.gmra.mxu3 %v710_v4 }
 0x2eb   :  { %v571_v42 = vmax.f32 %v519_v62, 0.0  ;;  %v3785_v57 = vpop.eup %2600 }
 0x2ec   :  { %4971 = vst [vmem:[#allocation16_spill] sm:$0xff] %v3785_v57  ;;  %v3790_v56 = vpop.xlane.xlu1 %1166 }
 0x2ed   :  { %675 = vmatmul.f32.gmra.mxu2 %v571_v42 }
 0x2f0   :  { %1414 = vmax.xlane.f32.xlu2 %v1413_v18  ;;  %v1433_v18 = vsub.f32 %v3404_v30, %v1373_v43 }
 0x2f1   :  { %1641 = vadd.xlane.f32.xlu1 %v1640_v36  ;;  %v1079_v36 = vsub.f32 %v3390_v3, %v1017_v35 }
 0x2f2   :  { %v1482_v25 = vmul.f32 1.442695, %v1433_v18 }
 0x2f3   :  { %v1127_v38 = vmul.f32 1.442695, %v1079_v36 }
 0x2f4   :  { %2602 = vpow2.f32 %v1482_v25  ;;  %v1020_v25 = vpop.xlane.xlu2 %1019 }
 0x2f5   :  { %2604 = vpow2.f32 %v1127_v38  ;;  %v1376_v38 = vpop.xlane.xlu1 %1375  ;;  %v1080_v53 = vsub.f32 %v3404_v30, %v1020_v25 }
 0x2f6   :  { %v1434_v42 = vsub.f32 %v3494_v29, %v1376_v38 }
 0x2f8   :  { %v1484_v43 = vmul.f32 1.442695, %v1434_v42 }
 0x2f9   :  { %1061 = vmax.xlane.f32.xlu1 %v1060_v13 }
 0x2fa   :  { %v3792_v13 = vpop.eup %2602  ;;  %2606 = vpow2.f32 %v1484_v43 }
 0x2fb   :  { %4972 = vst [vmem:[#allocation17_spill] sm:$0xff] %v3792_v13  ;;  %v3794_v32 = vpop.eup %2604  ;;  %2608 = vtanh.f32 %v424_v54 }
 0x2fc   :  { %v1207_v3 = vsel %vm966_vm2, %v3794_v32, 0.0  ;;  %v1549_v50 = vpop.permute.xlu2 %1548 }
 0x304   :  { %v661_v26 = vpop.f32.mrf.mxu2  ;;  %v3816_v54 = vpop.xlane.xlu2 %1169 }
 0x305   :  { %v662_v4 = vadd.f32 %v3717_v28, %v661_v26 }
 0x307   :  { %v711_v62 = vmax.f32 %v662_v4, 0.0  ;;  %v3808_v4 = vpop.eup %2606 }
 0x308   :  { %1576 = vrot.lane.b32.xlu2 %v3785_v57, %s2800_s18  ;;  %4973 = vst [vmem:[#allocation18_spill] sm:$0xff] %v3808_v4  ;;  %v2609_v42 = vpop.eup %2608 }
 0x309   :  { %805 = vmatmul.f32.gmra.mxu3 %v711_v62  ;;  %v488_v43 = vadd.f32 1.0, %v2609_v42 }
 0x30c   :  { %v664_v35 = vpop.f32.mrf.mxu2 }
 0x30d   :  { %v665_v18 = vadd.f32 %v3717_v28, %v664_v35  ;;  %v1129_v35 = vmul.f32 1.442695, %v1080_v53 }
 0x30e   :  { %1644 = vadd.xlane.f32.xlu0 %v1643_v16  ;;  %v1023_v16 = vpop.xlane.xlu0 %1022 }
 0x30f   :  { %v712_v36 = vmax.f32 %v665_v18, 0.0  ;;  %v1081_v26 = vsub.f32 %v3494_v29, %v1023_v16  ;;  %v1646_v18 = vsel %vm966_vm2, %v1549_v50, 0.0  ;;  %v280_v50 = vadd.f32 %v3502_v33, %v3111_v52 }
 0x311   :  { %808 = vmatmul.f32.gmra.mxu3 %v712_v36  ;;  %v1131_v62 = vmul.f32 1.442695, %v1081_v26 }
 0x312   :  { %1578 = vrot.lane.b32.xlu1 %v3792_v13, %s2800_s18 }
 0x316   :  { %1208 = vadd.xlane.f32.xlu0 %v1207_v3  ;;  %v277_v3 = vadd.f32 %v3489_v23, %v3111_v52  ;;  %v520_v23 = vmul.f32 0.5, %v488_v43 }
 0x318   :  { %v425_v38 = vmul.f32 0.5, %v277_v3  ;;  %v572_v30 = vmax.f32 %v520_v23, 0.0  ;;  %v1379_v23 = vpop.xlane.xlu2 %1378 }
 0x31a   :  { %2610 = vtanh.f32 %v425_v38  ;;  %678 = vmatmul.f32.gmra.mxu2 %v572_v30  ;;  %v1551_v38 = vpop.permute.xlu0 %1550  ;;  %v426_v30 = vmul.f32 0.5, %v280_v50 }
 0x31b   :  { %2612 = vpow2.f32 %v1131_v62 }
 0x31c   :  { %2614 = vpow2.f32 %v1129_v35 }
 0x31d   :  { %2616 = vtanh.f32 %v426_v30 }
 0x320   :  { %v2611_v29 = vpop.eup %2610 }
 0x321   :  { %v3814_v36 = vpop.eup %2612  ;;  %v489_v25 = vadd.f32 1.0, %v2611_v29 }
 0x322   :  { %4974 = vst [vmem:[#allocation19_spill] sm:$0xff] %v3814_v36  ;;  %v3818_v16 = vpop.eup %2614  ;;  %v1213_v3 = vsel %vm966_vm2, %v3814_v36, 0.0 }
 0x323   :  { %4975 = vst [vmem:[#allocation20_spill] sm:$0xff] %v3818_v16  ;;  %v1210_v62 = vsel %vm966_vm2, %v3818_v16, 0.0  ;;  %v521_v42 = vmul.f32 0.5, %v489_v25  ;;  %v1026_v25 = vpop.xlane.xlu1 %1025  ;;  %v2617_v33 = vpop.eup %2616 }
 0x326   :  { %v794_v26 = vpop.f32.mrf.mxu3 }
 0x327   :  { %v795_v53 = vadd.f32 %v3717_v28, %v794_v26  ;;  %v1435_v26 = vsub.f32 %v3509_v8, %v1379_v23 }
 0x328   :  { %v667_v35 = vpop.f32.mrf.mxu2 }
 0x329   :  { %926 = vmatmul.f32.gmra.mxu0 %v795_v53  ;;  %v668_v43 = vadd.f32 %v3717_v28, %v667_v35  ;;  %v1649_v53 = vsel %vm966_vm2, %v1551_v38, 0.0  ;;  %v1486_v52 = vmul.f32 1.442695, %v1435_v26 }
 0x32a   :  { %1580 = vrot.lane.b32.xlu0 %v3808_v4, %s2800_s18 }
 0x32b   :  { %v713_v29 = vmax.f32 %v668_v43, 0.0  ;;  %2618 = vpow2.f32 %v1486_v52  ;;  %v1555_v35 = vpop.permute.xlu1 %1554  ;;  %v490_v43 = vadd.f32 1.0, %v2617_v33 }
 0x32d   :  { %811 = vmatmul.f32.gmra.mxu3 %v713_v29  ;;  %v1553_v29 = vpop.permute.xlu2 %1552  ;;  %v522_v38 = vmul.f32 0.5, %v490_v43 }
 0x32e   :  { %v1652_v30 = vsel %vm966_vm2, %v1553_v29, 0.0 }
 0x32f   :  { %v574_v26 = vmax.f32 %v522_v38, 0.0 }
 0x331   :  { %1647 = vadd.xlane.f32.xlu2 %v1646_v18  ;;  %v573_v18 = vmax.f32 %v521_v42, 0.0  ;;  %v3834_v13 = vpop.eup %2618 }
 0x332   :  { %4976 = vst [vmem:[#allocation21_spill] sm:$0xff] %v3834_v13 }
 0x333   :  { %681 = vmatmul.f32.gmra.mxu2 %v573_v18 }
 0x339   :  { %1214 = vadd.xlane.f32.xlu2 %v1213_v3  ;;  %v3828_v3 = vpop.xlane.xlu0 %1172 }
 0x33b   :  { %684 = vmatmul.f32.gmra.mxu2 %v574_v26 }
 0x33c   :  { %1211 = vadd.xlane.f32.xlu1 %v1210_v62  ;;  %v1082_v62 = vsub.f32 %v3509_v8, %v1026_v25  ;;  %v3839_v8 = vpop.xlane.xlu1 %1175 }
 0x33e   :  { %v1133_v18 = vmul.f32 1.442695, %v1082_v62 }
 0x340   :  { %2620 = vpow2.f32 %v1133_v18 }
 0x341   :  { %v1382_v42 = vpop.xlane.xlu0 %1381 }
 0x342   :  { %v1436_v50 = vsub.f32 %v3549_v24, %v1382_v42 }
 0x344   :  { %1650 = vadd.xlane.f32.xlu1 %v1649_v53  ;;  %v1488_v23 = vmul.f32 1.442695, %v1436_v50  ;;  %v797_v53 = vpop.f32.mrf.mxu3  ;;  %v1385_v43 = vpop.xlane.xlu1 %1384 }
 0x345   :  { %v798_v25 = vadd.f32 %v3717_v28, %v797_v53  ;;  %v1437_v29 = vsub.f32 %v3555_v40, %v1385_v43 }
 0x346   :  { %2622 = vpow2.f32 %v1488_v23  ;;  %v3842_v52 = vpop.eup %2620 }
 0x347   :  { %4977 = vst [vmem:[#allocation22_spill] sm:$0xff] %v3842_v52  ;;  %929 = vmatmul.f32.gmra.mxu0 %v798_v25  ;;  %v1216_v33 = vsel %vm966_vm2, %v3842_v52, 0.0 }
 0x349   :  { %v1032_v26 = vpop.xlane.xlu0 %1031 }
 0x34c   :  { %v3846_v62 = vpop.eup %2622  ;;  %v800_v42 = vpop.f32.mrf.mxu3 }
 0x34d   :  { %4978 = vst [vmem:[#allocation23_spill] sm:$0xff] %v3846_v62  ;;  %v801_v18 = vadd.f32 %v3717_v28, %v800_v42 }
 0x34f   :  { %932 = vmatmul.f32.gmra.mxu0 %v801_v18  ;;  %v1029_v18 = vpop.xlane.xlu2 %1028 }
 0x351   :  { %1582 = vrot.lane.b32.xlu2 %v3834_v13, %s2800_s18 }
 0x354   :  { %1653 = vadd.xlane.f32.xlu0 %v1652_v30  ;;  %v1490_v30 = vmul.f32 1.442695, %v1437_v29 }
 0x356   :  { %2624 = vpow2.f32 %v1490_v30 }
 0x357   :  { %v670_v50 = vpop.f32.mrf.mxu2 }
 0x358   :  { %v671_v38 = vadd.f32 %v3717_v28, %v670_v50  ;;  %v1083_v50 = vsub.f32 %v3549_v24, %v1029_v18  ;;  %v1557_v24 = vpop.permute.xlu0 %1556 }
 0x35a   :  { %v714_v23 = vmax.f32 %v671_v38, 0.0  ;;  %v1135_v29 = vmul.f32 1.442695, %v1083_v50  ;;  %v1655_v38 = vsel %vm966_vm2, %v1555_v35, 0.0 }
 0x35c   :  { %1217 = vadd.xlane.f32.xlu0 %v1216_v33  ;;  %814 = vmatmul.f32.gmra.mxu3 %v714_v23  ;;  %v3853_v53 = vpop.eup %2624  ;;  %v1084_v33 = vsub.f32 %v3555_v40, %v1032_v26  ;;  %v3863_v40 = vpop.xlane.xlu2 %1178 }
 0x35d   :  { %1584 = vrot.lane.b32.xlu1 %v3846_v62, %s2800_s18  ;;  %4979 = vst [vmem:[#allocation24_spill] sm:$0xff] %v3853_v53 }
 0x35e   :  { %v1137_v43 = vmul.f32 1.442695, %v1084_v33 }
 0x35f   :  { %v673_v25 = vpop.f32.mrf.mxu2 }
 0x360   :  { %v674_v42 = vadd.f32 %v3717_v28, %v673_v25  ;;  %2626 = vpow2.f32 %v1137_v43  ;;  %v1035_v43 = vpop.xlane.xlu1 %1034 }
 0x361   :  { %2628 = vpow2.f32 %v1135_v29 }
 0x362   :  { %v715_v62 = vmax.f32 %v674_v42, 0.0 }
 0x364   :  { %817 = vmatmul.f32.gmra.mxu3 %v715_v62  ;;  %v1388_v33 = vpop.xlane.xlu2 %1387 }
 0x365   :  { %v1438_v50 = vsub.f32 %v3574_v34, %v1388_v33 }
 0x366   :  { %v3861_v23 = vpop.eup %2626 }
 0x367   :  { %4980 = vst [vmem:[#allocation25_spill] sm:$0xff] %v3861_v23  ;;  %v1222_v25 = vsel %vm966_vm2, %v3861_v23, 0.0  ;;  %v3868_v62 = vpop.eup %2628 }
 0x368   :  { %4981 = vst [vmem:[#allocation26_spill] sm:$0xff] %v3868_v62  ;;  %v1219_v35 = vsel %vm966_vm2, %v3868_v62, 0.0 }
 0x36c   :  { %v1559_v62 = vpop.permute.xlu2 %1558 }
 0x36d   :  { %v803_v30 = vpop.f32.mrf.mxu3 }
 0x36e   :  { %v804_v26 = vadd.f32 %v3717_v28, %v803_v30  ;;  %v1658_v30 = vsel %vm966_vm2, %v1557_v24, 0.0 }
 0x370   :  { %1586 = vrot.lane.b32.xlu0 %v3853_v53, %s2800_s18  ;;  %935 = vmatmul.f32.gmra.mxu0 %v804_v26  ;;  %v676_v42 = vpop.f32.mrf.mxu2  ;;  %v1492_v26 = vmul.f32 1.442695, %v1438_v50  ;;  %v1561_v53 = vpop.permute.xlu1 %1560 }
 0x371   :  { %v677_v18 = vadd.f32 %v3717_v28, %v676_v42 }
 0x372   :  { %2630 = vpow2.f32 %v1492_v26 }
 0x373   :  { %v716_v29 = vmax.f32 %v677_v18, 0.0  ;;  %v1661_v18 = vsel %vm966_vm2, %v1559_v62, 0.0 }
 0x375   :  { %820 = vmatmul.f32.gmra.mxu3 %v716_v29 }
 0x378   :  { %v3878_v42 = vpop.eup %2630  ;;  %v3882_v4 = vpop.xlane.xlu1 %1184 }
 0x379   :  { %4982 = vst [vmem:[#allocation27_spill] sm:$0xff] %v3878_v42 }
 0x37a   :  { %1656 = vadd.xlane.f32.xlu2 %v1655_v38  ;;  %v3874_v38 = vpop.xlane.xlu0 %1181 }
 0x382   :  { %1223 = vadd.xlane.f32.xlu2 %v1222_v25  ;;  %v1085_v25 = vsub.f32 %v3574_v34, %v1035_v43  ;;  %v1391_v13 = vpop.xlane.xlu0 %1390 }
 0x383   :  { %v1439_v33 = vsub.f32 %v3611_v22, %v1391_v13  ;;  %v1394_v13 = vpop.xlane.xlu1 %1393 }
 0x384   :  { %v1440_v26 = vsub.f32 %v3618_v41, %v1394_v13 }
 0x385   :  { %v1494_v24 = vmul.f32 1.442695, %v1439_v33 }
 0x386   :  { %v1496_v33 = vmul.f32 1.442695, %v1440_v26  ;;  %v1664_v26 = vsel %vm966_vm2, %v1561_v53, 0.0 }
 0x387   :  { %1220 = vadd.xlane.f32.xlu1 %v1219_v35  ;;  %v1139_v35 = vmul.f32 1.442695, %v1085_v25 }
 0x389   :  { %2632 = vpow2.f32 %v1139_v35  ;;  %v3897_v35 = vpop.f32.mrf.mxu0 }
 0x38a   :  { %2634 = vpow2.f32 %v1494_v24  ;;  %v1041_v24 = vpop.xlane.xlu0 %1040 }
 0x38b   :  { %2636 = vpow2.f32 %v1496_v33 }
 0x38c   :  { %v806_v43 = vpop.f32.mrf.mxu3 }
 0x38d   :  { %v807_v50 = vadd.f32 %v3717_v28, %v806_v43  ;;  %v1087_v43 = vsub.f32 %v3618_v41, %v1041_v24 }
 0x38f   :  { %1659 = vadd.xlane.f32.xlu1 %v1658_v30  ;;  %v3886_v34 = vpop.eup %2632  ;;  %938 = vmatmul.f32.gmra.mxu0 %v807_v50  ;;  %v1038_v50 = vpop.xlane.xlu2 %1037 }
 0x390   :  { %4983 = vst [vmem:[#allocation28_spill] sm:$0xff] %v3886_v34  ;;  %v1225_v29 = vsel %vm966_vm2, %v3886_v34, 0.0  ;;  %v3891_v30 = vpop.eup %2634 }
 0x391   :  { %4984 = vst [vmem:[#allocation29_spill] sm:$0xff] %v3891_v30 }
 0x394   :  { %v809_v62 = vpop.f32.mrf.mxu3 }
 0x395   :  { %v810_v25 = vadd.f32 %v3717_v28, %v809_v62  ;;  %v1143_v62 = vmul.f32 1.442695, %v1087_v43  ;;  %v3913_v43 = vpop.f32.mrf.mxu0 }
 0x397   :  { %941 = vmatmul.f32.gmra.mxu0 %v810_v25  ;;  %2638 = vpow2.f32 %v1143_v62  ;;  %v3907_v33 = vpop.xlane.xlu2 %1187 }
 0x39a   :  { %1588 = vrot.lane.b32.xlu2 %v3878_v42, %s2800_s18  ;;  %1662 = vadd.xlane.f32.xlu0 %v1661_v18  ;;  %v3899_v18 = vpop.eup %2636 }
 0x39b   :  { %4985 = vst [vmem:[#allocation30_spill] sm:$0xff] %v3899_v18 }
 0x39f   :  { %v1397_v53 = vpop.xlane.xlu2 %1396 }
 0x3a2   :  { %1226 = vadd.xlane.f32.xlu0 %v1225_v29  ;;  %v679_v29 = vpop.f32.mrf.mxu2 }
 0x3a3   :  { %v680_v13 = vadd.f32 %v3717_v28, %v679_v29  ;;  %v3911_v29 = vpop.eup %2638 }
 0x3a4   :  { %4986 = vst [vmem:[#allocation31_spill] sm:$0xff] %v3911_v29 }
 0x3a5   :  { %v717_v42 = vmax.f32 %v680_v13, 0.0  ;;  %v1441_v13 = vsub.f32 %v3640_v20, %v1397_v53 }
 0x3a7   :  { %823 = vmatmul.f32.gmra.mxu3 %v717_v42 }
 0x3a8   :  { %1590 = vrot.lane.b32.xlu1 %v3891_v30, %s2800_s18  ;;  %v1086_v30 = vsub.f32 %v3611_v22, %v1038_v50  ;;  %v1231_v22 = vsel %vm966_vm2, %v3911_v29, 0.0  ;;  %v1563_v50 = vpop.permute.xlu0 %1562 }
 0x3aa   :  { %v1141_v34 = vmul.f32 1.442695, %v1086_v30 }
 0x3ac   :  { %2640 = vpow2.f32 %v1141_v34  ;;  %v1498_v34 = vmul.f32 1.442695, %v1441_v13 }
 0x3ae   :  { %2642 = vpow2.f32 %v1498_v34 }
 0x3b0   :  { %v812_v41 = vpop.f32.mrf.mxu3 }
 0x3b1   :  { %v813_v23 = vadd.f32 %v3717_v28, %v812_v41  ;;  %v1667_v41 = vsel %vm966_vm2, %v1563_v50, 0.0 }
 0x3b2   :  { %v3917_v42 = vpop.eup %2640 }
 0x3b3   :  { %944 = vmatmul.f32.gmra.mxu0 %v813_v23  ;;  %4987 = vst [vmem:[#allocation32_spill] sm:$0xff] %v3917_v42  ;;  %v1228_v30 = vsel %vm966_vm2, %v3917_v42, 0.0  ;;  %v3923_v23 = vpop.xlane.xlu0 %1190 }
 0x3b6   :  { %1592 = vrot.lane.b32.xlu0 %v3899_v18, %s2800_s18  ;;  %v682_v25 = vpop.f32.mrf.mxu2 }
 0x3b7   :  { %v683_v18 = vadd.f32 %v3717_v28, %v682_v25 }
 0x3b9   :  { %v718_v24 = vmax.f32 %v683_v18, 0.0  ;;  %v1044_v18 = vpop.xlane.xlu1 %1043 }
 0x3ba   :  { %v1088_v62 = vsub.f32 %v3640_v20, %v1044_v18  ;;  %v3928_v18 = vpop.eup %2642 }
 0x3bb   :  { %826 = vmatmul.f32.gmra.mxu3 %v718_v24  ;;  %v1400_v20 = vpop.xlane.xlu0 %1399  ;;  %4988 = vst [vmem:[#allocation33_spill] sm:$0xff] %v3928_v18 }
 0x3bc   :  { %v1442_v13 = vsub.f32 %v3670_v55, %v1400_v20 }
 0x3be   :  { %v685_v25 = vpop.f32.mrf.mxu2 }
 0x3bf   :  { %v686_v24 = vadd.f32 %v3717_v28, %v685_v25 }
 0x3c1   :  { %v719_v29 = vmax.f32 %v686_v24, 0.0  ;;  %v1567_v42 = vpop.permute.xlu1 %1566  ;;  %v3942_v24 = vpop.f32.mrf.mxu0 }
 0x3c3   :  { %1665 = vadd.xlane.f32.xlu2 %v1664_v26  ;;  %v1565_v26 = vpop.permute.xlu2 %1564  ;;  %829 = vmatmul.f32.gmra.mxu3 %v719_v29  ;;  %v1500_v29 = vmul.f32 1.442695, %v1442_v13  ;;  %v1050_v2 = vpop.xlane.xlu0 %1049 }
 0x3c4   :  { %v1670_v53 = vsel %vm966_vm2, %v1565_v26, 0.0 }
 0x3c9   :  { %v3937_v34 = vpop.xlane.xlu1 %1193 }
 0x3cb   :  { %1232 = vadd.xlane.f32.xlu2 %v1231_v22  ;;  %v1145_v22 = vmul.f32 1.442695, %v1088_v62  ;;  %v1569_v57 = vpop.permute.xlu0 %1568 }
 0x3cd   :  { %2644 = vpow2.f32 %v1145_v22 }
 0x3ce   :  { %2646 = vpow2.f32 %v1500_v29 }
 0x3d2   :  { %1229 = vadd.xlane.f32.xlu1 %v1228_v30  ;;  %v1047_v30 = vpop.xlane.xlu2 %1046 }
 0x3d3   :  { %v3932_v50 = vpop.eup %2644  ;;  %v3971_v59 = vpop.xlane.xlu0 %1199 }
 0x3d4   :  { %4989 = vst [vmem:[#allocation34_spill] sm:$0xff] %v3932_v50  ;;  %v1234_v62 = vsel %vm966_vm2, %v3932_v50, 0.0  ;;  %v3944_v22 = vpop.eup %2646  ;;  %v3959_v50 = vpop.f32.mrf.mxu0 }
 0x3d5   :  { %4990 = vst [vmem:[#allocation35_spill] sm:$0xff] %v3944_v22 }
 0x3da   :  { %1668 = vadd.xlane.f32.xlu1 %v1667_v41  ;;  %v3939_v25 = vpop.xlane.xlu2 %1196 }
 0x3df   :  { %v815_v26 = vpop.f32.mrf.mxu3 }
 0x3e0   :  { %1671 = vadd.xlane.f32.xlu0 %v1670_v53  ;;  %v816_v41 = vadd.f32 %v3717_v28, %v815_v26  ;;  %v1403_v53 = vpop.xlane.xlu1 %1402 }
 0x3e1   :  { %v1443_v13 = vsub.f32 %v3677_v0, %v1403_v53 }
 0x3e2   :  { %947 = vmatmul.f32.gmra.mxu0 %v816_v41  ;;  %v3946_v20 = vpop.xlane.xlu2 %1405 }
 0x3e3   :  { %1594 = vrot.lane.b32.xlu2 %v3928_v18, %s2800_s18  ;;  %v1502_v41 = vmul.f32 1.442695, %v1443_v13 }
 0x3e5   :  { %2648 = vpow2.f32 %v1502_v41  ;;  %v1673_v41 = vsel %vm966_vm2, %v1567_v42, 0.0  ;;  %v1409_v42 = vpop.xlane.xlu0 %1408 }
 0x3e6   :  { %2650 = vrcp.f32 %v3772_v17 }
 0x3e7   :  { %v818_v26 = vpop.f32.mrf.mxu3 }
 0x3e8   :  { %1235 = vadd.xlane.f32.xlu0 %v1234_v62  ;;  %v3954_v62 = vld [vmem:[%s4910_s6] ss:$0 sm:$0xff]  ;;  %v819_v18 = vadd.f32 %v3717_v28, %v818_v26  ;;  %v1053_v16 = vpop.xlane.xlu1 %1052  ;;  %v1089_v26 = vsub.f32 %v3670_v55, %v1047_v30 }
 0x3e9   :  { %v871_v29 = vadd.f32 %v3954_v62, %v3897_v35 }
 0x3ea   :  { %950 = vmatmul.f32.gmra.mxu0 %v819_v18  ;;  %v1571_v53 = vpop.permute.xlu2 %1570  ;;  %v1090_v18 = vsub.f32 %v3677_v0, %v1050_v2  ;;  %v1147_v36 = vmul.f32 1.442695, %v1089_v26  ;;  %v3980_v2 = vpop.f32.mrf.mxu0  ;;  %v1091_v26 = vsub.f32 %v3703_v45, %v1053_v16 }
 0x3ec   :  { %v1149_v5 = vmul.f32 1.442695, %v1090_v18  ;;  %v874_v18 = vadd.f32 %v3954_v62, %v3913_v43  ;;  %v1444_v43 = vsub.f32 %v3703_v45, %v3946_v20 }
 0x3ee   :  { %2652 = vpow2.f32 %v1149_v5  ;;  %v1504_v16 = vmul.f32 1.442695, %v1444_v43 }
 0x3ef   :  { %2654 = vpow2.f32 %v1147_v36  ;;  %v3996_v36 = vpop.xlane.xlu0 %1058 }
 0x3f0   :  { %v3974_v52 = vpop.permute.xlu1 %1572  ;;  %2656 = vrcp.f32 %v3777_v44  ;;  %v1151_v44 = vmul.f32 1.442695, %v1091_v26 }
 0x3f2   :  { %v3967_v13 = vpop.xlane.xlu2 %1055  ;;  %2658 = vpow2.f32 %v1151_v44 }
 0x3f3   :  { %1596 = vrot.lane.b32.xlu1 %v3944_v22, %s2800_s18  ;;  %v3962_v22 = vpop.eup %2648  ;;  %2660 = vrcp.f32 %v3790_v56 }
 0x3f4   :  { %4991 = vst [vmem:[#allocation36_spill] sm:$0xff] %v3962_v22  ;;  %v2651_v35 = vpop.eup %2650  ;;  %2662 = vpow2.f32 %v1504_v16 }
 0x3f5   :  { %v1287_v17 = vmul.f32 %v2651_v35, %v3392_v9  ;;  %v3985_v9 = vpop.eup %2652 }
 0x3f6   :  { %4992 = vst [vmem:[#allocation37_spill] sm:$0xff] %v3985_v9  ;;  %v3987_v30 = vpop.eup %2654 }
 0x3f7   :  { %4993 = vst [vmem:[#allocation38_spill] sm:$0xff] %v3987_v30  ;;  %v1237_v5 = vsel %vm966_vm2, %v3987_v30, 0.0 }
 0x3f8   :  { %v821_v61 = vpop.f32.mrf.mxu3  ;;  %v3983_v0 = vpop.xlane.xlu1 %1202 }
 0x3f9   :  { %v822_v19 = vadd.f32 %v3717_v28, %v821_v61  ;;  %v1240_v61 = vsel %vm966_vm2, %v3985_v9, 0.0 }
 0x3fa   :  { %v3977_v39 = vpop.xlane.xlu2 %1205 }
 0x3fb   :  { %953 = vmatmul.f32.gmra.mxu0 %v822_v19 }
 0x3fc   :  { %1993 = vrot.lane.b32.xlu0 %v871_v29, %s2801_s27 }
 0x400   :  { %v1412_v19 = vpop.xlane.xlu1 %1411 }
 0x402   :  { %v3989_v35 = vpop.xlane.xlu2 %1414 }
 0x404   :  { %1598 = vrot.lane.b32.xlu0 %v3962_v22, %s2800_s18  ;;  %v1800_v22 = vmul.f32 %v1287_v17, %v871_v29 }
 0x406   :  { %v1832_v55 = vsel %vm966_vm2, %v1800_v22, 0.0  ;;  %v2657_v22 = vpop.eup %2656 }
 0x407   :  { %v1288_v17 = vmul.f32 %v2657_v22, %v3476_v47  ;;  %v4018_v22 = vpop.eup %2658 }
 0x408   :  { %4994 = vst [vmem:[#allocation39_spill] sm:$0xff] %v4018_v22  ;;  %v1243_v56 = vsel %vm966_vm2, %v4018_v22, 0.0 }
 0x40a   :  { %v3998_v29 = vpop.permute.xlu2 %1576 }
 0x40c   :  { %1674 = vadd.xlane.f32.xlu2 %v1673_v41  ;;  %v1676_v41 = vsel %vm966_vm2, %v1569_v57, 0.0  ;;  %v1679_v57 = vsel %vm966_vm2, %v1571_v53, 0.0 }
 0x412   :  { %v4009_v30 = vpop.xlane.xlu2 %1647 }
 0x414   :  { %1833 = vadd.xlane.f32.xlu2 %v1832_v55  ;;  %v4005_v55 = vpop.permute.xlu0 %1574 }
 0x41a   :  { %v4025_v45 = vpop.xlane.xlu2 %1214 }
 0x41b   :  { %4995 = vst [vmem:[#allocation40_spill] sm:$0xff] %v4025_v45 }
 0x41c   :  { %1241 = vadd.xlane.f32.xlu2 %v1240_v61  ;;  %v4007_v61 = vpop.xlane.xlu1 %1641  ;;  %v4016_v47 = vpop.xlane.xlu0 %1644 }
 0x41d   :  { %1238 = vadd.xlane.f32.xlu1 %v1237_v5  ;;  %v1801_v5 = vmul.f32 %v1288_v17, %v874_v18  ;;  %v877_v17 = vadd.f32 %v3954_v62, %v3942_v24 }
 0x41f   :  { %v1835_v9 = vsel %vm966_vm2, %v1801_v5, 0.0 }
 0x422   :  { %v4040_v43 = vpop.permute.xlu2 %1582 }
 0x424   :  { %v4020_v26 = vpop.xlane.xlu1 %1061  ;;  %v4030_v53 = vpop.xlane.xlu0 %1208 }
 0x425   :  { %1677 = vadd.xlane.f32.xlu1 %v1676_v41  ;;  %v2661_v41 = vpop.eup %2660 }
 0x426   :  { %v1289_v20 = vmul.f32 %v2661_v41, %v3491_v46  ;;  %v4034_v5 = vpop.eup %2662 }
 0x427   :  { %4996 = vst [vmem:[#allocation41_spill] sm:$0xff] %v4034_v5 }
 0x42a   :  { %v824_v16 = vpop.f32.mrf.mxu3 }
 0x42c   :  { %v4032_v44 = vpop.permute.xlu1 %1578 }
 0x42d   :  { %1836 = vadd.xlane.f32.xlu1 %v1835_v9  ;;  %v1802_v9 = vmul.f32 %v1289_v20, %v877_v17  ;;  %v4047_v20 = vpop.f32.mrf.mxu0 }
 0x42e   :  { %1680 = vadd.xlane.f32.xlu0 %v1679_v57  ;;  %v4042_v57 = vpop.permute.xlu0 %1580 }
 0x42f   :  { %v1838_v24 = vsel %vm966_vm2, %v1802_v9, 0.0  ;;  %v4050_v9 = vpop.xlane.xlu2 %1656 }
 0x430   :  { %4998 = vst [vmem:[#allocation43_spill] sm:$0xff] %v4050_v9 }
 0x434   :  { %1995 = vrot.lane.b32.xlu2 %v874_v18, %s2801_s27  ;;  %v1445_v18 = vsub.f32 %v3733_v51, %v1409_v42  ;;  %v4044_v46 = vpop.xlane.xlu1 %1211 }
 0x435   :  { %4997 = vst [vmem:[#allocation42_spill] sm:$0xff] %v4044_v46 }
 0x436   :  { %1244 = vadd.xlane.f32.xlu0 %v1243_v56  ;;  %v1506_v41 = vmul.f32 1.442695, %v1445_v18  ;;  %v825_v56 = vadd.f32 %v3717_v28, %v824_v16 }
 0x438   :  { %956 = vmatmul.f32.gmra.mxu0 %v825_v56  ;;  %2664 = vpow2.f32 %v1506_v41  ;;  %v4064_v41 = vpop.xlane.xlu2 %1223 }
 0x439   :  { %5002 = vst [vmem:[#allocation47_spill] sm:$0xff] %v4064_v41 }
 0x43c   :  { %1600 = vrot.lane.b32.xlu2 %v4034_v5, %s2800_s18  ;;  %v1446_v5 = vsub.f32 %v3740_v12, %v1412_v19  ;;  %v4056_v46 = vpop.xlane.xlu1 %1650 }
 0x43d   :  { %5000 = vst [vmem:[#allocation45_spill] sm:$0xff] %v4056_v46  ;;  %v1093_v46 = vsub.f32 %v3740_v12, %v3996_v36 }
 0x43e   :  { %1839 = vadd.xlane.f32.xlu0 %v1838_v24  ;;  %v4052_v24 = vpop.xlane.xlu0 %1653  ;;  %v827_v42 = vpop.f32.mrf.mxu3  ;;  %v1508_v16 = vmul.f32 1.442695, %v1446_v5 }
 0x43f   :  { %4999 = vst [vmem:[#allocation44_spill] sm:$0xff] %v4052_v24  ;;  %v828_v22 = vadd.f32 %v3717_v28, %v827_v42  ;;  %v4058_v18 = vpop.eup %2664 }
 0x440   :  { %5001 = vst [vmem:[#allocation46_spill] sm:$0xff] %v4058_v18  ;;  %2666 = vpow2.f32 %v1508_v16  ;;  %v4077_v5 = vpop.permute.xlu2 %1588 }
 0x441   :  { %959 = vmatmul.f32.vlgmr.msra.gmra.mxu3 %v828_v22  ;;  %2668 = vrcp.f32 %v3816_v54 }
 0x444   :  { %v4069_v56 = vpop.permute.xlu1 %1584 }
 0x446   :  { %1997 = vrot.lane.b32.xlu1 %v877_v17, %s2801_s27  ;;  %v880_v17 = vadd.f32 %v3954_v62, %v3959_v50  ;;  %v4067_v19 = vpop.xlane.xlu0 %1217  ;;  %v4071_v42 = vpop.eup %2666 }
 0x447   :  { %5003 = vst [vmem:[#allocation48_spill] sm:$0xff] %v4067_v19  ;;  %v830_v50 = vpop.f32.mrf.mxu3  ;;  %v2669_v41 = vpop.eup %2668 }
 0x448   :  { %5004 = vst [vmem:[#allocation49_spill] sm:$0xff] %v4071_v42  ;;  %v831_v16 = vadd.f32 %v3717_v28, %v830_v50  ;;  %v4087_v19 = vpop.xlane.xlu2 %1665  ;;  %v1290_v28 = vmul.f32 %v2669_v41, %v3511_v49  ;;  %v1155_v50 = vmul.f32 1.442695, %v1093_v46 }
 0x44a   :  { %962 = vmatmul.f32.gmra.mxu3 %v831_v16  ;;  %v1803_v45 = vmul.f32 %v1290_v28, %v880_v17  ;;  %2670 = vpow2.f32 %v1155_v50  ;;  %v883_v50 = vadd.f32 %v3954_v62, %v3980_v2  ;;  %v1447_v2 = vsub.f32 %v3770_v31, %v3989_v35 }
 0x44b   :  { %v1694_v35 = vsel %vm966_vm2, %v4042_v57, 0.0 }
 0x44c   :  { %v1841_v12 = vsel %vm966_vm2, %v1803_v45, 0.0 }
 0x44e   :  { %1602 = vrot.lane.b32.xlu1 %v4058_v18, %s2800_s18  ;;  %v4075_v22 = vpop.permute.xlu0 %1586  ;;  %v4079_v18 = vpop.xlane.xlu1 %1220 }
 0x44f   :  { %5005 = vst [vmem:[#allocation50_spill] sm:$0xff] %v4079_v18  ;;  %v1092_v18 = vsub.f32 %v3733_v51, %v3967_v13 }
 0x450   :  { %v4099_v16 = vpop.xlane.xlu2 %1232 }
 0x451   :  { %v1153_v24 = vmul.f32 1.442695, %v1092_v18  ;;  %v1094_v18 = vsub.f32 %v3770_v31, %v4020_v26  ;;  %v1688_v26 = vsel %vm966_vm2, %v3998_v29, 0.0  ;;  %v1510_v29 = vmul.f32 1.442695, %v1447_v2 }
 0x452   :  { %1999 = vrot.lane.b32.xlu0 %v880_v17, %s2801_s27 }
 0x453   :  { %2672 = vpow2.f32 %v1153_v24  ;;  %v1157_v28 = vmul.f32 1.442695, %v1094_v18 }
 0x454   :  { %2674 = vrcp.f32 %v3828_v3  ;;  %v1685_v3 = vsel %vm966_vm2, %v4005_v55, 0.0 }
 0x455   :  { %2676 = vpow2.f32 %v1157_v28 }
 0x456   :  { %v4085_v9 = vpop.xlane.xlu0 %1662  ;;  %v4093_v54 = vpop.xlane.xlu1 %1659  ;;  %2678 = vpow2.f32 %v1510_v29 }
 0x457   :  { %2680 = vrcp.f32 %v3863_v40 }
 0x458   :  { %v4114_v46 = vpop.permute.xlu2 %1594  ;;  %2682 = vrcp.f32 %v3839_v8 }
 0x459   :  { %2684 = vrcp.f32 %v3874_v38 }
 0x45a   :  { %1604 = vrot.lane.b32.xlu0 %v4071_v42, %s2800_s18  ;;  %v1682_v42 = vsel %vm966_vm2, %v3974_v52, 0.0  ;;  %2686 = vrcp.f32 %v3907_v33 }
 0x45b   :  { %2688 = vrcp.f32 %v3882_v4 }
 0x45c   :  { %2690 = vrcp.f32 %v3923_v23 }
 0x45d   :  { %2692 = vrcp.f32 %v3937_v34 }
 0x45e   :  { %v4097_v36 = vpop.xlane.xlu0 %1226  ;;  %v4101_v52 = vpop.permute.xlu1 %1590  ;;  %2694 = vrcp.f32 %v3939_v25 }
 0x45f   :  { %2696 = vrcp.f32 %v3971_v59 }
 0x460   :  { %2698 = vrcp.f32 %v4016_v47 }
 0x461   :  { %2700 = vrcp.f32 %v3983_v0 }
 0x465   :  { %1683 = vadd.xlane.f32.xlu2 %v1682_v42  ;;  %v4103_v42 = vpop.eup %2670  ;;  %2702 = vrcp.f32 %v3977_v39 }
 0x466   :  { %5006 = vst [vmem:[#allocation51_spill] sm:$0xff] %v4103_v42  ;;  %v4105_v51 = vpop.eup %2672  ;;  %v1249_v49 = vsel %vm966_vm2, %v4103_v42, 0.0  ;;  %v4109_v13 = vpop.permute.xlu0 %1592  ;;  %2704 = vrcp.f32 %v4007_v61 }
 0x467   :  { %5007 = vst [vmem:[#allocation52_spill] sm:$0xff] %v4105_v51  ;;  %v4112_v45 = vpop.xlane.xlu1 %1229  ;;  %v1246_v24 = vsel %vm966_vm2, %v4105_v51, 0.0  ;;  %v2675_v17 = vpop.eup %2674  ;;  %2706 = vrcp.f32 %v4030_v53 }
 0x468   :  { %5008 = vst [vmem:[#allocation53_spill] sm:$0xff] %v4112_v45  ;;  %v4138_v45 = vpop.eup %2676  ;;  %2708 = vrcp.f32 %v4009_v30 }
 0x469   :  { %5010 = vst [vmem:[#allocation55_spill] sm:$0xff] %v4138_v45 }
 0x46d   :  { %1842 = vadd.xlane.f32.xlu2 %v1841_v12 }
 0x46e   :  { %v4120_v41 = vpop.xlane.xlu0 %1671 }
 0x46f   :  { %v4129_v42 = vpop.xlane.xlu1 %1668 }
 0x470   :  { %5009 = vst [vmem:[#allocation54_spill] sm:$0xff] %v4129_v42 }
 0x475   :  { %1250 = vadd.xlane.f32.xlu2 %v1249_v49  ;;  %v1291_v49 = vmul.f32 %v2675_v17, %v3542_v14  ;;  %v1252_v17 = vsel %vm966_vm2, %v4138_v45, 0.0 }
 0x476   :  { %v4135_v18 = vpop.xlane.xlu0 %1235 }
 0x477   :  { %v4140_v14 = vpop.permute.xlu1 %1596 }
 0x478   :  { %1247 = vadd.xlane.f32.xlu1 %v1246_v24  ;;  %v1804_v24 = vmul.f32 %v1291_v49, %v883_v50 }
 0x47a   :  { %v1844_v55 = vsel %vm966_vm2, %v1804_v24, 0.0  ;;  %v888_v24 = vpop.f32.mrf.mxu0 }
 0x47b   :  { %v889_v2 = vadd.f32 %v3954_v62, %v888_v24 }
 0x47e   :  { %v4149_v31 = vpop.permute.xlu0 %1993 }
 0x47f   :  { %v4124_v12 = vpop.xlane.xlu2 %1674 }
 0x480   :  { %1686 = vadd.xlane.f32.xlu1 %v1685_v3  ;;  %v4155_v3 = vpop.eup %2678 }
 0x481   :  { %5012 = vst [vmem:[#allocation57_spill] sm:$0xff] %v4155_v3 }
 0x484   :  { %1689 = vadd.xlane.f32.xlu0 %v1688_v26 }
 0x486   :  { %v4161_v49 = vpop.permute.xlu0 %1598 }
 0x487   :  { %v1834_v51 = vpop.xlane.xlu2 %1833 }
 0x488   :  { %1929 = vst.msk [vmem:[%s4911_s7] sm:$0xff] %vm1928_vm3, %v1834_v51  ;;  %1845 = vadd.xlane.f32.xlu1 %v1844_v55 }
 0x48c   :  { %1253 = vadd.xlane.f32.xlu0 %v1252_v17 }
 0x48d   :  { %2001 = vrot.lane.b32.xlu2 %v883_v50, %s2801_s27  ;;  %v886_v50 = vadd.f32 %v3954_v62, %v4047_v20  ;;  %v2681_v20 = vpop.eup %2680 }
 0x48e   :  { %v2683_v24 = vpop.eup %2682 }
 0x48f   :  { %v4182_v17 = vpop.xlane.xlu2 %1241  ;;  %v1292_v45 = vmul.f32 %v2683_v24, %v3560_v1  ;;  %v2685_v8 = vpop.eup %2684  ;;  %v1697_v1 = vsel %vm966_vm2, %v4040_v43, 0.0 }
 0x490   :  { %v4153_v28 = vpop.xlane.xlu1 %1238  ;;  %1695 = vadd.xlane.f32.xlu1 %v1694_v35  ;;  %v1691_v35 = vsel %vm966_vm2, %v4032_v44, 0.0 }
 0x491   :  { %5011 = vst [vmem:[#allocation56_spill] sm:$0xff] %v4153_v28  ;;  %v1805_v40 = vmul.f32 %v1292_v45, %v886_v50  ;;  %v891_v28 = vpop.f32.mrf.mxu0 }
 0x492   :  { %v892_v44 = vadd.f32 %v3954_v62, %v891_v28  ;;  %v1703_v28 = vsel %vm966_vm2, %v4075_v22, 0.0 }
 0x493   :  { %v1847_v42 = vsel %vm966_vm2, %v1805_v40, 0.0  ;;  %v2687_v40 = vpop.eup %2686 }
 0x495   :  { %1606 = vrot.lane.b32.xlu2 %v4155_v3, %s2800_s18 }
 0x498   :  { %v4159_v51 = vpop.xlane.xlu1 %1677 }
 0x499   :  { %5013 = vst [vmem:[#allocation58_spill] sm:$0xff] %v4159_v51  ;;  %v4190_v51 = vpop.permute.xlu2 %1995  ;;  %v894_v43 = vpop.f32.mrf.mxu0 }
 0x4a0   :  { %v1837_v26 = vpop.xlane.xlu1 %1836  ;;  %2003 = vrot.lane.b32.xlu0 %v886_v50, %s2801_s27 }
 0x4a1   :  { %1930 = vst.msk [vmem:[%s4911_s7 + $0x8] sm:$0xff] %vm1928_vm3, %v1837_v26  ;;  %v4170_v57 = vpop.xlane.xlu0 %1680  ;;  %v1293_v26 = vmul.f32 %v2681_v20, %v3571_v27  ;;  %v1294_v27 = vmul.f32 %v2685_v8, %v3605_v6  ;;  %v4195_v38 = vpop.permute.xlu2 %1600 }
 0x4a2   :  { %v2689_v8 = vpop.eup %2688 }
 0x4a3   :  { %v1806_v3 = vmul.f32 %v1293_v26, %v889_v2  ;;  %v1807_v20 = vmul.f32 %v1294_v27, %v892_v44  ;;  %v897_v26 = vpop.f32.mrf.mxu0  ;;  %v1296_v27 = vmul.f32 %v2687_v40, %v3635_v60 }
 0x4a4   :  { %v898_v22 = vadd.f32 %v3954_v62, %v897_v26 }
 0x4a5   :  { %v1853_v45 = vsel %vm966_vm2, %v1807_v20, 0.0  ;;  %v1295_v20 = vmul.f32 %v2689_v8, %v3626_v10  ;;  %v1712_v8 = vsel %vm966_vm2, %v4109_v13, 0.0 }
 0x4a9   :  { %2005 = vrot.lane.b32.xlu1 %v889_v2, %s2801_s27  ;;  %v4174_v55 = vpop.xlane.xlu0 %1244  ;;  %v895_v2 = vadd.f32 %v3954_v62, %v894_v43 }
 0x4ab   :  { %v900_v43 = vpop.f32.mrf.mxu0 }
 0x4ac   :  { %v901_v10 = vadd.f32 %v3954_v62, %v900_v43 }
 0x4b1   :  { %v1840_v29 = vpop.xlane.xlu0 %1839 }
 0x4b2   :  { %1931 = vst.msk [vmem:[%s4911_s7 + $0x10] sm:$0xff] %vm1928_vm3, %v1840_v29  ;;  %v1850_v29 = vsel %vm966_vm2, %v1806_v3, 0.0 }
 0x4b8   :  { %v4202_v50 = vpop.permute.xlu1 %1997 }
 0x4be   :  { %1692 = vadd.xlane.f32.xlu2 %v1691_v35 }
 0x4c4   :  { %v4234_v4 = vpop.permute.xlu0 %1999 }
 0x4c6   :  { %1851 = vadd.xlane.f32.xlu2 %v1850_v29 }
 0x4ca   :  { %1848 = vadd.xlane.f32.xlu0 %v1847_v42  ;;  %v4211_v42 = vpop.permute.xlu1 %1602 }
 0x4cc   :  { %v4242_v26 = vpop.permute.xlu0 %1604 }
 0x4cd   :  { %v1730_v30 = vsel %vm966_vm2, %v4242_v26, 0.0 }
 0x4d2   :  { %1698 = vadd.xlane.f32.xlu0 %v1697_v1  ;;  %v1809_v1 = vmul.f32 %v1296_v27, %v898_v22 }
 0x4d3   :  { %1854 = vadd.xlane.f32.xlu1 %v1853_v45  ;;  %v1808_v45 = vmul.f32 %v1295_v20, %v895_v2 }
 0x4d5   :  { %v1856_v33 = vsel %vm966_vm2, %v1808_v45, 0.0 }
 0x4d8   :  { %v4200_v3 = vpop.xlane.xlu2 %1683 }
 0x4db   :  { %1704 = vadd.xlane.f32.xlu1 %v1703_v28  ;;  %v1859_v28 = vsel %vm966_vm2, %v1809_v1, 0.0 }
 0x4de   :  { %2007 = vrot.lane.b32.xlu2 %v892_v44, %s2801_s27  ;;  %v1700_v44 = vsel %vm966_vm2, %v4069_v56, 0.0 }
 0x4e0   :  { %v1843_v6 = vpop.xlane.xlu2 %1842 }
 0x4e1   :  { %1932 = vst.msk [vmem:[%s4911_s7 + $0x18] sm:$0xff] %vm1928_vm3, %v1843_v6  ;;  %v2691_v6 = vpop.eup %2690 }
 0x4e2   :  { %v1297_v60 = vmul.f32 %v2691_v6, %v3665_v37  ;;  %v903_v37 = vpop.f32.mrf.mxu0 }
 0x4e4   :  { %v1810_v23 = vmul.f32 %v1297_v60, %v901_v10 }
 0x4e6   :  { %2009 = vrot.lane.b32.xlu0 %v895_v2, %s2801_s27  ;;  %v1706_v2 = vsel %vm966_vm2, %v4077_v5, 0.0  ;;  %v904_v5 = vadd.f32 %v3954_v62, %v903_v37 }
 0x4e8   :  { %v4236_v56 = vpop.xlane.xlu2 %1250 }
 0x4ea   :  { %v906_v13 = vpop.f32.mrf.mxu0 }
 0x4eb   :  { %v4215_v35 = vpop.xlane.xlu1 %1247 }
 0x4f3   :  { %v4218_v24 = vpop.xlane.xlu1 %1686 }
 0x4f4   :  { %2011 = vrot.lane.b32.xlu1 %v898_v22, %s2801_s27  ;;  %v1862_v22 = vsel %vm966_vm2, %v1810_v23, 0.0 }
 0x4f7   :  { %v4247_v40 = vpop.xlane.xlu0 %1689 }
 0x4fb   :  { %v1846_v29 = vpop.xlane.xlu1 %1845 }
 0x4fc   :  { %1933 = vst.msk [vmem:[%s4911_s7 + $0x20] sm:$0xff] %vm1928_vm3, %v1846_v29  ;;  %v4245_v29 = vpop.permute.xlu2 %2001 }
 0x4ff   :  { %v4256_v27 = vpop.xlane.xlu0 %1253 }
 0x503   :  { %v4262_v45 = vpop.xlane.xlu1 %1695 }
 0x507   :  { %1701 = vadd.xlane.f32.xlu2 %v1700_v44  ;;  %v4252_v44 = vpop.permute.xlu2 %1606 }
 0x50f   :  { %1860 = vadd.xlane.f32.xlu2 %v1859_v28 }
 0x510   :  { %1857 = vadd.xlane.f32.xlu0 %v1856_v33  ;;  %v907_v33 = vadd.f32 %v3954_v62, %v906_v13 }
 0x512   :  { %v4260_v1 = vpop.permute.xlu0 %2003 }
 0x518   :  { %1707 = vadd.xlane.f32.xlu0 %v1706_v2 }
 0x51b   :  { %v4269_v43 = vpop.permute.xlu1 %2005 }
 0x51e   :  { %1863 = vadd.xlane.f32.xlu1 %v1862_v22  ;;  %v1709_v22 = vsel %vm966_vm2, %v4101_v52, 0.0 }
 0x526   :  { %1713 = vadd.xlane.f32.xlu1 %v1712_v8 }
 0x527   :  { %2013 = vrot.lane.b32.xlu2 %v901_v10, %s2801_s27  ;;  %v2693_v10 = vpop.eup %2692 }
 0x528   :  { %v2695_v2 = vpop.eup %2694  ;;  %v1298_v23 = vmul.f32 %v2693_v10, %v3686_v7  ;;  %v1715_v7 = vsel %vm966_vm2, %v4114_v46, 0.0  ;;  %v1721_v10 = vsel %vm966_vm2, %v4161_v49, 0.0 }
 0x529   :  { %v1299_v8 = vmul.f32 %v2695_v2, %v3692_v11  ;;  %v2697_v13 = vpop.eup %2696 }
 0x52a   :  { %v1811_v37 = vmul.f32 %v1298_v23, %v904_v5  ;;  %v1300_v52 = vmul.f32 %v2697_v13, %v3728_v58 }
 0x52b   :  { %v1812_v34 = vmul.f32 %v1299_v8, %v907_v33 }
 0x52c   :  { %2015 = vrot.lane.b32.xlu0 %v904_v5, %s2801_s27  ;;  %v1865_v25 = vsel %vm966_vm2, %v1811_v37, 0.0 }
 0x531   :  { %v4258_v20 = vpop.xlane.xlu2 %1692 }
 0x539   :  { %v1852_v28 = vpop.xlane.xlu2 %1851 }
 0x53a   :  { %1935 = vst.msk [vmem:[%s4911_s7 + $0x30] sm:$0xff] %vm1928_vm3, %v1852_v28  ;;  %v1868_v28 = vsel %vm966_vm2, %v1812_v34, 0.0 }
 0x53d   :  { %v1849_v6 = vpop.xlane.xlu0 %1848 }
 0x53e   :  { %1934 = vst.msk [vmem:[%s4911_s7 + $0x28] sm:$0xff] %vm1928_vm3, %v1849_v6  ;;  %v909_v6 = vpop.f32.mrf.mxu0 }
 0x53f   :  { %2017 = vrot.lane.b32.xlu1 %v907_v33, %s2801_s27  ;;  %v910_v11 = vadd.f32 %v3954_v62, %v909_v6 }
 0x541   :  { %v1813_v5 = vmul.f32 %v1300_v52, %v910_v11  ;;  %v4298_v46 = vpop.permute.xlu2 %2007 }
 0x543   :  { %v1871_v33 = vsel %vm966_vm2, %v1813_v5, 0.0 }
 0x545   :  { %v4301_v58 = vpop.xlane.xlu0 %1698 }
 0x546   :  { %v1855_v60 = vpop.xlane.xlu1 %1854 }
 0x547   :  { %1936 = vst.msk [vmem:[%s4911_s7 + $0x38] sm:$0xff] %vm1928_vm3, %v1855_v60  ;;  %v912_v60 = vpop.f32.mrf.mxu0 }
 0x548   :  { %v913_v59 = vadd.f32 %v3954_v62, %v912_v60 }
 0x54f   :  { %v915_v37 = vpop.f32.mrf.mxu0 }
 0x550   :  { %1710 = vadd.xlane.f32.xlu2 %v1709_v22  ;;  %v4307_v22 = vpop.xlane.xlu1 %1704  ;;  %v916_v34 = vadd.f32 %v3954_v62, %v915_v37 }
 0x556   :  { %1866 = vadd.xlane.f32.xlu0 %v1865_v25 }
 0x558   :  { %1869 = vadd.xlane.f32.xlu2 %v1868_v28  ;;  %v4305_v23 = vpop.permute.xlu0 %2009  ;;  %v2699_v28 = vpop.eup %2698 }
 0x559   :  { %v1769_v13 = vmul.f32 %v2699_v28, %v3416_v48  ;;  %v1718_v48 = vsel %vm966_vm2, %v4140_v14, 0.0 }
 0x55b   :  { %v2090_v6 = vmul.f32 %v4190_v51, %v1769_v13 }
 0x55e   :  { %1716 = vadd.xlane.f32.xlu0 %v1715_v7  ;;  %v2701_v7 = vpop.eup %2700 }
 0x55f   :  { %v1301_v0 = vmul.f32 %v2701_v7, %v3751_v63  ;;  %v2703_v47 = vpop.eup %2702 }
 0x560   :  { %v1302_v39 = vmul.f32 %v2703_v47, %v3759_v21  ;;  %v2705_v60 = vpop.eup %2704  ;;  %v918_v21 = vpop.f32.mrf.mxu0  ;;  %v5015_v47 = vld [vmem:[#allocation44_spill] sm:$0xff] }
 0x561   :  { %v1768_v63 = vmul.f32 %v2705_v60, %v3406_v15  ;;  %v2707_v14 = vpop.eup %2706  ;;  %2710 = vrcp.f32 %v5015_v47  ;;  %v5016_v60 = vld [vmem:[#allocation40_spill] sm:$0xff] }
 0x562   :  { %v1815_v5 = vmul.f32 %v1302_v39, %v916_v34  ;;  %v2709_v61 = vpop.eup %2708  ;;  %2712 = vrcp.f32 %v4200_v3 }
 0x563   :  { %2714 = vrcp.f32 %v5016_v60 }
 0x564   :  { %2716 = vrcp.f32 %v4218_v24 }
 0x566   :  { %v4319_v25 = vpop.permute.xlu1 %2011 }
 0x569   :  { %1872 = vadd.xlane.f32.xlu1 %v1871_v33  ;;  %v1877_v33 = vsel %vm966_vm2, %v1815_v5, 0.0  ;;  %v2711_v5 = vpop.eup %2710 }
 0x570   :  { %2019 = vrot.lane.b32.xlu2 %v910_v11, %s2801_s27  ;;  %v1814_v11 = vmul.f32 %v1301_v0, %v913_v59 }
 0x571   :  { %1722 = vadd.xlane.f32.xlu1 %v1721_v10  ;;  %v1303_v10 = vmul.f32 %v2707_v14, %v3794_v32 }
 0x572   :  { %2021 = vrot.lane.b32.xlu0 %v913_v59, %s2801_s27  ;;  %v1874_v51 = vsel %vm966_vm2, %v1814_v11, 0.0  ;;  %v2089_v59 = vmul.f32 %v4149_v31, %v1768_v63  ;;  %v5014_v31 = vld [vmem:[#allocation2_spill] sm:$0xff]  ;;  %v1724_v11 = vsel %vm966_vm2, %v4195_v38, 0.0  ;;  %v5017_v38 = vld [vmem:[#allocation5_spill] sm:$0xff] }
 0x573   :  { %v1772_v63 = vmul.f32 %v2711_v5, %v5017_v38  ;;  %v5023_v5 = vld [vmem:[#allocation42_spill] sm:$0xff] }
 0x575   :  { %v2093_v3 = vmul.f32 %v4245_v29, %v1772_v63 }
 0x57a   :  { %v4303_v2 = vpop.xlane.xlu2 %1701 }
 0x582   :  { %v1861_v8 = vpop.xlane.xlu2 %1860 }
 0x583   :  { %1938 = vst.msk [vmem:[%s4911_s7 + $0x48] sm:$0xff] %vm1928_vm3, %v1861_v8  ;;  %v1858_v49 = vpop.xlane.xlu0 %1857  ;;  %v919_v8 = vadd.f32 %v3954_v62, %v918_v21 }
 0x584   :  { %1937 = vst.msk [vmem:[%s4911_s7 + $0x40] sm:$0xff] %vm1928_vm3, %v1858_v49 }
 0x585   :  { %v1816_v49 = vmul.f32 %v1303_v10, %v919_v8 }
 0x587   :  { %v1880_v15 = vsel %vm966_vm2, %v1816_v49, 0.0  ;;  %v1727_v49 = vsel %vm966_vm2, %v4211_v42, 0.0  ;;  %v5021_v42 = vld [vmem:[#allocation48_spill] sm:$0xff] }
 0x588   :  { %2718 = vrcp.f32 %v5021_v42 }
 0x58a   :  { %2023 = vrot.lane.b32.xlu1 %v916_v34, %s2801_s27  ;;  %v4348_v53 = vpop.permute.xlu2 %2013  ;;  %v1770_v34 = vmul.f32 %v2709_v61, %v5014_v31  ;;  %v5019_v61 = vld [vmem:[#allocation19_spill] sm:$0xff] }
 0x58b   :  { %v4345_v37 = vpop.xlane.xlu0 %1707 }
 0x58c   :  { %v2091_v28 = vmul.f32 %v4202_v50, %v1770_v34  ;;  %v921_v50 = vpop.f32.mrf.mxu0 }
 0x58d   :  { %v922_v31 = vadd.f32 %v3954_v62, %v921_v50 }
 0x591   :  { %v1864_v52 = vpop.xlane.xlu1 %1863 }
 0x592   :  { %1939 = vst.msk [vmem:[%s4911_s7 + $0x50] sm:$0xff] %vm1928_vm3, %v1864_v52  ;;  %2155 = vrot.lane.b32.xlu1 %v2090_v6, %s2800_s18 }
 0x594   :  { %v924_v26 = vpop.f32.mrf.mxu0 }
 0x599   :  { %1719 = vadd.xlane.f32.xlu2 %v1718_v48  ;;  %v4364_v52 = vpop.xlane.xlu1 %1713  ;;  %v925_v48 = vadd.f32 %v3954_v62, %v924_v26 }
 0x59c   :  { %1875 = vadd.xlane.f32.xlu0 %v1874_v51  ;;  %v927_v50 = vpop.f32.mrf.mxu0 }
 0x59d   :  { %v928_v24 = vadd.f32 %v3954_v62, %v927_v50 }
 0x59e   :  { %v4353_v32 = vpop.permute.xlu0 %2015 }
 0x5a1   :  { %1878 = vadd.xlane.f32.xlu2 %v1877_v33  ;;  %v2713_v33 = vpop.eup %2712 }
 0x5b0   :  { %2153 = vrot.lane.b32.xlu0 %v2089_v59, %s2800_s18  ;;  %v5018_v59 = vld [vmem:[#allocation14_spill] sm:$0xff] }
 0x5b1   :  { %v4370_v0 = vpop.permute.xlu1 %2017  ;;  %v1782_v14 = vmul.f32 %v2713_v33, %v5018_v59  ;;  %v5024_v33 = vld [vmem:[#allocation22_spill] sm:$0xff] }
 0x5b9   :  { %2025 = vrot.lane.b32.xlu2 %v919_v8, %s2801_s27  ;;  %v2715_v8 = vpop.eup %2714 }
 0x5bc   :  { %1881 = vadd.xlane.f32.xlu1 %v1880_v15  ;;  %v1305_v15 = vmul.f32 %v2715_v8, %v5019_v61  ;;  %v5026_v61 = vld [vmem:[#allocation20_spill] sm:$0xff] }
 0x5be   :  { %v1818_v34 = vmul.f32 %v1305_v15, %v925_v48 }
 0x5c0   :  { %v1886_v29 = vsel %vm966_vm2, %v1818_v34, 0.0 }
 0x5c1   :  { %2157 = vrot.lane.b32.xlu2 %v2091_v28, %s2800_s18 }
 0x5c3   :  { %v4358_v13 = vpop.xlane.xlu2 %1710 }
 0x5c4   :  { %1731 = vadd.xlane.f32.xlu1 %v1730_v30  ;;  %v2717_v30 = vpop.eup %2716 }
 0x5c9   :  { %v1867_v7 = vpop.xlane.xlu0 %1866 }
 0x5ca   :  { %1940 = vst.msk [vmem:[%s4911_s7 + $0x58] sm:$0xff] %vm1928_vm3, %v1867_v7  ;;  %v5020_v7 = vld [vmem:[#allocation15_spill] sm:$0xff] }
 0x5cb   :  { %v1870_v6 = vpop.xlane.xlu2 %1869 }
 0x5cc   :  { %1941 = vst.msk [vmem:[%s4911_s7 + $0x60] sm:$0xff] %vm1928_vm3, %v1870_v6  ;;  %v1783_v6 = vmul.f32 %v2717_v30, %v5020_v7 }
 0x5d1   :  { %v4377_v39 = vpop.xlane.xlu0 %1716 }
 0x5da   :  { %1725 = vadd.xlane.f32.xlu0 %v1724_v11  ;;  %v2719_v11 = vpop.eup %2718 }
 0x5db   :  { %v1306_v60 = vmul.f32 %v2719_v11, %v5024_v33  ;;  %v5029_v33 = vld [vmem:[#allocation3_spill] sm:$0xff] }
 0x5dc   :  { %v1873_v51 = vpop.xlane.xlu1 %1872 }
 0x5dd   :  { %1942 = vst.msk [vmem:[%s4911_s7 + $0x68] sm:$0xff] %vm1928_vm3, %v1873_v51  ;;  %2029 = vrot.lane.b32.xlu1 %v925_v48, %s2801_s27  ;;  %v4404_v48 = vpop.permute.xlu2 %2019  ;;  %v5022_v51 = vld [vmem:[#allocation43_spill] sm:$0xff]  ;;  %v1819_v38 = vmul.f32 %v1306_v60, %v928_v24 }
 0x5de   :  { %2720 = vrcp.f32 %v5022_v51 }
 0x5df   :  { %2722 = vrcp.f32 %v5023_v5  ;;  %v1889_v8 = vsel %vm966_vm2, %v1819_v38, 0.0 }
 0x5e0   :  { %2724 = vrcp.f32 %v4247_v40  ;;  %v5028_v40 = vld [vmem:[#allocation45_spill] sm:$0xff] }
 0x5e1   :  { %2726 = vrcp.f32 %v5028_v40 }
 0x5e2   :  { %2728 = vrcp.f32 %v4085_v9 }
 0x5e4   :  { %v2022_v21 = vpop.permute.xlu0 %2021  ;;  %v4398_v28 = vpop.xlane.xlu1 %1722 }
 0x5e5   :  { %v4388_v10 = vmul.f32 %v2022_v21, %v1782_v14  ;;  %2161 = vrot.lane.b32.xlu1 %v2093_v3, %s2800_s18  ;;  %v2721_v63 = vpop.eup %2720  ;;  %v5025_v14 = vld [vmem:[#allocation4_spill] sm:$0xff] }
 0x5e6   :  { %v2723_v3 = vpop.eup %2722  ;;  %v1773_v21 = vmul.f32 %v2721_v63, %v5025_v14  ;;  %v5030_v63 = vld [vmem:[#allocation47_spill] sm:$0xff]  ;;  %v5031_v14 = vld [vmem:[#allocation8_spill] sm:$0xff] }
 0x5e7   :  { %v1304_v15 = vmul.f32 %v2723_v3, %v5026_v61  ;;  %2730 = vrcp.f32 %v5030_v63  ;;  %v5032_v61 = vld [vmem:[#allocation25_spill] sm:$0xff] }
 0x5e8   :  { %v2094_v34 = vmul.f32 %v4260_v1, %v1773_v21  ;;  %v930_v1 = vpop.f32.mrf.mxu0  ;;  %2732 = vrcp.f32 %v4262_v45 }
 0x5e9   :  { %2734 = vrcp.f32 %v4097_v36 }
 0x5ea   :  { %1728 = vadd.xlane.f32.xlu2 %v1727_v49  ;;  %2736 = vrcp.f32 %v4087_v19  ;;  %v5035_v19 = vld [vmem:[#allocation7_spill] sm:$0xff] }
 0x5eb   :  { %2738 = vrcp.f32 %v4258_v20 }
 0x5ec   :  { %2740 = vrcp.f32 %v4301_v58 }
 0x5ed   :  { %2742 = vrcp.f32 %v4120_v41 }
 0x5ee   :  { %2027 = vrot.lane.b32.xlu0 %v922_v31, %s2801_s27  ;;  %2744 = vrcp.f32 %v4099_v16 }
 0x5f0   :  { %v933_v51 = vpop.f32.mrf.mxu0 }
 0x5f1   :  { %v934_v5 = vadd.f32 %v3954_v62, %v933_v51 }
 0x5f2   :  { %1887 = vadd.xlane.f32.xlu2 %v1886_v29  ;;  %v1817_v29 = vmul.f32 %v1304_v15, %v922_v31 }
 0x5f4   :  { %v1883_v7 = vsel %vm966_vm2, %v1817_v29, 0.0 }
 0x5fc   :  { %v2024_v26 = vpop.permute.xlu1 %2023 }
 0x5fd   :  { %v4402_v47 = vmul.f32 %v2024_v26, %v1783_v6  ;;  %v2725_v6 = vpop.eup %2724  ;;  %v5027_v26 = vld [vmem:[#allocation16_spill] sm:$0xff] }
 0x5fe   :  { %v1784_v42 = vmul.f32 %v2725_v6, %v5027_v26  ;;  %v2727_v31 = vpop.eup %2726  ;;  %v5033_v6 = vld [vmem:[#allocation18_spill] sm:$0xff] }
 0x5ff   :  { %v1771_v60 = vmul.f32 %v2727_v31, %v5029_v33  ;;  %v2729_v38 = vpop.eup %2728  ;;  %v5034_v31 = vld [vmem:[#allocation28_spill] sm:$0xff]  ;;  %v1733_v33 = vsel %vm966_vm2, %v4252_v44, 0.0  ;;  %v5036_v44 = vld [vmem:[#allocation17_spill] sm:$0xff] }
 0x600   :  { %v1775_v21 = vmul.f32 %v2729_v38, %v5031_v14 }
 0x601   :  { %v2092_v3 = vmul.f32 %v4234_v4, %v1771_v60 }
 0x602   :  { %v2096_v9 = vmul.f32 %v4298_v46, %v1775_v21 }
 0x60a   :  { %2031 = vrot.lane.b32.xlu2 %v928_v24, %s2801_s27  ;;  %v4434_v24 = vpop.permute.xlu1 %2155 }
 0x60c   :  { %v4411_v59 = vpop.xlane.xlu2 %1719 }
 0x60f   :  { %v1876_v49 = vpop.xlane.xlu0 %1875  ;;  %1890 = vadd.xlane.f32.xlu1 %v1889_v8  ;;  %v2731_v8 = vpop.eup %2730 }
 0x610   :  { %1943 = vst.msk [vmem:[%s4911_s7 + $0x70] sm:$0xff] %vm1928_vm3, %v1876_v49  ;;  %v1308_v15 = vmul.f32 %v2731_v8, %v5032_v61  ;;  %v2733_v46 = vpop.eup %2732 }
 0x611   :  { %v1786_v26 = vmul.f32 %v2733_v46, %v5033_v6 }
 0x612   :  { %2163 = vrot.lane.b32.xlu2 %v2094_v34, %s2800_s18  ;;  %v1821_v34 = vmul.f32 %v1308_v15, %v934_v5 }
 0x614   :  { %v1879_v30 = vpop.xlane.xlu2 %1878  ;;  %v1895_v4 = vsel %vm966_vm2, %v1821_v34, 0.0 }
 0x615   :  { %1944 = vst.msk [vmem:[%s4911_s7 + $0x78] sm:$0xff] %vm1928_vm3, %v1879_v30  ;;  %v2735_v30 = vpop.eup %2734 }
 0x616   :  { %v1309_v45 = vmul.f32 %v2735_v30, %v5034_v31 }
 0x618   :  { %1884 = vadd.xlane.f32.xlu0 %v1883_v7  ;;  %v936_v7 = vpop.f32.mrf.mxu0 }
 0x619   :  { %v937_v51 = vadd.f32 %v3954_v62, %v936_v7 }
 0x61b   :  { %v1822_v36 = vmul.f32 %v1309_v45, %v937_v51 }
 0x61c   :  { %v2026_v11 = vpop.permute.xlu2 %2025 }
 0x61d   :  { %v4429_v50 = vmul.f32 %v2026_v11, %v1784_v42 }
 0x620   :  { %v939_v20 = vpop.f32.mrf.mxu0 }
 0x622   :  { %v4456_v11 = vpop.permute.xlu0 %2153 }
 0x624   :  { %v4465_v60 = vpop.permute.xlu2 %2157 }
 0x628   :  { %2035 = vrot.lane.b32.xlu1 %v934_v5, %s2801_s27  ;;  %v2737_v5 = vpop.eup %2736  ;;  %v942_v30 = vpop.f32.mrf.mxu0 }
 0x629   :  { %v1776_v38 = vmul.f32 %v2737_v5, %v5035_v19  ;;  %v2739_v14 = vpop.eup %2738  ;;  %v5039_v5 = vld [vmem:[#allocation31_spill] sm:$0xff] }
 0x62a   :  { %v2741_v34 = vpop.eup %2740 }
 0x62b   :  { %v2097_v62 = vmul.f32 %v4305_v23, %v1776_v38  ;;  %v4487_v23 = vld [vmem:[%s4910_s6] ss:$0 sm:$0xff] }
 0x62c   :  { %2159 = vrot.lane.b32.xlu0 %v2092_v3, %s2800_s18  ;;  %v1898_v3 = vsel %vm966_vm2, %v1822_v36, 0.0  ;;  %v931_v15 = vadd.f32 %v4487_v23, %v930_v1  ;;  %v943_v6 = vadd.f32 %v4487_v23, %v942_v30 }
 0x62f   :  { %v1882_v49 = vpop.xlane.xlu1 %1881 }
 0x630   :  { %1945 = vst.msk [vmem:[%s4911_s7 + $0x80] sm:$0xff] %vm1928_vm3, %v1882_v49  ;;  %2167 = vrot.lane.b32.xlu1 %v2096_v9, %s2800_s18  ;;  %v1785_v9 = vmul.f32 %v2739_v14, %v5036_v44 }
 0x637   :  { %v4451_v29 = vpop.xlane.xlu1 %1731 }
 0x63b   :  { %1896 = vadd.xlane.f32.xlu2 %v1895_v4  ;;  %v5037_v4 = vld [vmem:[#allocation21_spill] sm:$0xff] }
 0x63c   :  { %v1787_v46 = vmul.f32 %v2741_v34, %v5037_v4  ;;  %v5042_v34 = vld [vmem:[#allocation24_spill] sm:$0xff] }
 0x64d   :  { %v4469_v63 = vpop.xlane.xlu0 %1725 }
 0x64f   :  { %v2030_v42 = vpop.permute.xlu1 %2029 }
 0x650   :  { %v4458_v40 = vmul.f32 %v2030_v42, %v1786_v26  ;;  %v2743_v26 = vpop.eup %2742  ;;  %v5038_v42 = vld [vmem:[#allocation11_spill] sm:$0xff] }
 0x651   :  { %v1778_v1 = vmul.f32 %v2743_v26, %v5038_v42  ;;  %v5044_v26 = vld [vmem:[#allocation10_spill] sm:$0xff] }
 0x653   :  { %2037 = vrot.lane.b32.xlu2 %v937_v51, %s2801_s27  ;;  %v2745_v51 = vpop.eup %2744  ;;  %v2099_v31 = vmul.f32 %v4348_v53, %v1778_v1 }
 0x654   :  { %v1311_v36 = vmul.f32 %v2745_v51, %v5039_v5  ;;  %v5045_v51 = vld [vmem:[#allocation6_spill] sm:$0xff] }
 0x656   :  { %1734 = vadd.xlane.f32.xlu0 %v1733_v33  ;;  %v1824_v41 = vmul.f32 %v1311_v36, %v943_v6  ;;  %v5040_v33 = vld [vmem:[#allocation50_spill] sm:$0xff] }
 0x657   :  { %v4500_v45 = vpop.permute.xlu1 %2161  ;;  %2746 = vrcp.f32 %v5040_v33 }
 0x658   :  { %v1904_v16 = vsel %vm966_vm2, %v1824_v41, 0.0  ;;  %2748 = vrcp.f32 %v4307_v22  ;;  %v5043_v22 = vld [vmem:[#allocation34_spill] sm:$0xff]  ;;  %v940_v41 = vadd.f32 %v4487_v23, %v939_v20 }
 0x659   :  { %2750 = vrcp.f32 %v4135_v18 }
 0x65a   :  { %1899 = vadd.xlane.f32.xlu1 %v1898_v3  ;;  %2752 = vrcp.f32 %v4124_v12 }
 0x65b   :  { %2169 = vrot.lane.b32.xlu2 %v2097_v62, %s2800_s18  ;;  %v5041_v62 = vld [vmem:[#allocation26_spill] sm:$0xff]  ;;  %2754 = vrcp.f32 %v4093_v54 }
 0x65c   :  { %2756 = vrcp.f32 %v4345_v37 }
 0x65d   :  { %v4474_v21 = vpop.xlane.xlu2 %1728  ;;  %v2747_v38 = vpop.eup %2746  ;;  %2758 = vrcp.f32 %v4170_v57 }
 0x65e   :  { %v1307_v3 = vmul.f32 %v2747_v38, %v5041_v62  ;;  %2760 = vrcp.f32 %v4182_v17 }
 0x660   :  { %v2028_v8 = vpop.permute.xlu0 %2027  ;;  %v1820_v14 = vmul.f32 %v1307_v3, %v931_v15 }
 0x661   :  { %v4477_v49 = vmul.f32 %v2028_v8, %v1785_v9  ;;  %v2749_v9 = vpop.eup %2748  ;;  %v945_v8 = vpop.f32.mrf.mxu0 }
 0x662   :  { %v1892_v44 = vsel %vm966_vm2, %v1820_v14, 0.0  ;;  %v1789_v4 = vmul.f32 %v2749_v9, %v5042_v34  ;;  %v5047_v14 = vld [vmem:[#allocation13_spill] sm:$0xff] }
 0x663   :  { %v5048_v9 = vld [vmem:[#allocation37_spill] sm:$0xff] }
 0x665   :  { %v1888_v61 = vpop.xlane.xlu2 %1887 }
 0x666   :  { %1947 = vst.msk [vmem:[%s4911_s7 + $0x90] sm:$0xff] %vm1928_vm3, %v1888_v61  ;;  %v2751_v61 = vpop.eup %2750 }
 0x667   :  { %v1312_v30 = vmul.f32 %v2751_v61, %v5043_v22  ;;  %v2753_v18 = vpop.eup %2752 }
 0x668   :  { %v1779_v42 = vmul.f32 %v2753_v18, %v5044_v26  ;;  %v2755_v1 = vpop.eup %2754 }
 0x66a   :  { %2033 = vrot.lane.b32.xlu0 %v931_v15, %s2801_s27  ;;  %v2100_v12 = vmul.f32 %v4353_v32, %v1779_v42  ;;  %v948_v32 = vpop.f32.mrf.mxu0 }
 0x66d   :  { %v2032_v58 = vpop.permute.xlu2 %2031 }
 0x66e   :  { %v4493_v7 = vmul.f32 %v2032_v58, %v1787_v46  ;;  %v946_v46 = vadd.f32 %v4487_v23, %v945_v8 }
 0x672   :  { %v951_v62 = vpop.f32.mrf.mxu0 }
 0x673   :  { %2041 = vrot.lane.b32.xlu1 %v943_v6, %s2801_s27  ;;  %v1825_v6 = vmul.f32 %v1312_v30, %v946_v46  ;;  %v952_v37 = vadd.f32 %v4487_v23, %v951_v62  ;;  %v5054_v62 = vld [vmem:[#allocation39_spill] sm:$0xff] }
 0x675   :  { %v1907_v5 = vsel %vm966_vm2, %v1825_v6, 0.0  ;;  %v4532_v36 = vpop.permute.xlu2 %2163 }
 0x67b   :  { %2173 = vrot.lane.b32.xlu1 %v2099_v31, %s2800_s18  ;;  %v1774_v31 = vmul.f32 %v2755_v1, %v5045_v51  ;;  %v5051_v1 = vld [vmem:[#allocation23_spill] sm:$0xff] }
 0x67d   :  { %v2095_v54 = vmul.f32 %v4269_v43, %v1774_v31 }
 0x682   :  { %v1891_v19 = vpop.xlane.xlu1 %1890 }
 0x683   :  { %1948 = vst.msk [vmem:[%s4911_s7 + $0x98] sm:$0xff] %vm1928_vm3, %v1891_v19  ;;  %v2757_v19 = vpop.eup %2756 }
 0x684   :  { %1905 = vadd.xlane.f32.xlu2 %v1904_v16  ;;  %v5046_v16 = vld [vmem:[#allocation27_spill] sm:$0xff]  ;;  %v2759_v20 = vpop.eup %2758 }
 0x685   :  { %v1790_v43 = vmul.f32 %v2757_v19, %v5046_v16  ;;  %v2761_v3 = vpop.eup %2760  ;;  %v5053_v19 = vld [vmem:[#allocation30_spill] sm:$0xff] }
 0x686   :  { %v1314_v8 = vmul.f32 %v2761_v3, %v5048_v9 }
 0x688   :  { %v1827_v57 = vmul.f32 %v1314_v8, %v952_v37  ;;  %v949_v8 = vadd.f32 %v4487_v23, %v948_v32  ;;  %v5057_v32 = vld [vmem:[#allocation56_spill] sm:$0xff] }
 0x68b   :  { %v1885_v53 = vpop.xlane.xlu0 %1884 }
 0x68c   :  { %1946 = vst.msk [vmem:[%s4911_s7 + $0x88] sm:$0xff] %vm1928_vm3, %v1885_v53 }
 0x694   :  { %1893 = vadd.xlane.f32.xlu0 %v1892_v44  ;;  %v1781_v44 = vmul.f32 %v2759_v20, %v5047_v14  ;;  %v5055_v20 = vld [vmem:[#allocation9_spill] sm:$0xff] }
 0x696   :  { %v2102_v61 = vmul.f32 %v4404_v48, %v1781_v44  ;;  %v5050_v48 = vld [vmem:[#allocation32_spill] sm:$0xff] }
 0x69a   :  { %v2036_v58 = vpop.permute.xlu1 %2035 }
 0x69b   :  { %v4522_v15 = vmul.f32 %v2036_v58, %v1789_v4  ;;  %v5049_v4 = vld [vmem:[#allocation53_spill] sm:$0xff] }
 0x69c   :  { %2043 = vrot.lane.b32.xlu2 %v946_v46, %s2801_s27  ;;  %2762 = vrcp.f32 %v5049_v4  ;;  %v1913_v46 = vsel %vm966_vm2, %v1827_v57, 0.0 }
 0x69d   :  { %2764 = vrcp.f32 %v4303_v2 }
 0x69e   :  { %v4556_v17 = vpop.permute.xlu0 %2159  ;;  %2766 = vrcp.f32 %v4364_v52 }
 0x69f   :  { %2768 = vrcp.f32 %v4174_v55 }
 0x6a2   :  { %v4552_v34 = vpop.permute.xlu1 %2167  ;;  %v2763_v22 = vpop.eup %2762 }
 0x6a3   :  { %v1310_v30 = vmul.f32 %v2763_v22, %v5050_v48  ;;  %v2765_v26 = vpop.eup %2764 }
 0x6a4   :  { %2175 = vrot.lane.b32.xlu2 %v2100_v12, %s2800_s18  ;;  %v1788_v12 = vmul.f32 %v2765_v26, %v5051_v1  ;;  %v5058_v26 = vld [vmem:[#allocation51_spill] sm:$0xff]  ;;  %v2249_v1 = vsel %vm966_vm2, %v4456_v11, 0.0 }
 0x6a5   :  { %1908 = vadd.xlane.f32.xlu1 %v1907_v5  ;;  %v1823_v6 = vmul.f32 %v1310_v30, %v940_v41  ;;  %v954_v5 = vpop.f32.mrf.mxu0 }
 0x6a6   :  { %v955_v2 = vadd.f32 %v4487_v23, %v954_v5 }
 0x6a7   :  { %v1901_v42 = vsel %vm966_vm2, %v1823_v6, 0.0 }
 0x6a8   :  { %2165 = vrot.lane.b32.xlu0 %v2095_v54, %s2800_s18  ;;  %v2767_v54 = vpop.eup %2766 }
 0x6a9   :  { %v1792_v16 = vmul.f32 %v2767_v54, %v5053_v19 }
 0x6ae   :  { %v1897_v33 = vpop.xlane.xlu2 %1896 }
 0x6af   :  { %1950 = vst.msk [vmem:[%s4911_s7 + $0xa8] sm:$0xff] %vm1928_vm3, %v1897_v33  ;;  %v5052_v33 = vld [vmem:[#allocation54_spill] sm:$0xff] }
 0x6b0   :  { %2039 = vrot.lane.b32.xlu0 %v940_v41, %s2801_s27  ;;  %2770 = vrcp.f32 %v5052_v33  ;;  %v2769_v41 = vpop.eup %2768 }
 0x6b1   :  { %2772 = vrcp.f32 %v4377_v39  ;;  %v960_v39 = vpop.f32.mrf.mxu3 }
 0x6b2   :  { %2774 = vrcp.f32 %v4236_v56  ;;  %v961_v22 = vadd.f32 %v4487_v23, %v960_v39  ;;  %v2255_v39 = vsel %vm966_vm2, %v4465_v60, 0.0 }
 0x6b3   :  { %2776 = vrcp.f32 %v5057_v32 }
 0x6b4   :  { %2778 = vrcp.f32 %v4358_v13 }
 0x6b5   :  { %2780 = vrcp.f32 %v4398_v28 }
 0x6b6   :  { %v2038_v38 = vpop.permute.xlu2 %2037 }
 0x6b7   :  { %v4543_v53 = vmul.f32 %v2038_v38, %v1790_v43  ;;  %v2771_v38 = vpop.eup %2770 }
 0x6b8   :  { %v1777_v3 = vmul.f32 %v2771_v38, %v5055_v20 }
 0x6ba   :  { %v2098_v14 = vmul.f32 %v4319_v25, %v1777_v3  ;;  %v2773_v25 = vpop.eup %2772  ;;  %v5063_v3 = vld [vmem:[#allocation12_spill] sm:$0xff] }
 0x6bb   :  { %v2775_v30 = vpop.eup %2774 }
 0x6bc   :  { %v2777_v6 = vpop.eup %2776 }
 0x6be   :  { %2047 = vrot.lane.b32.xlu1 %v952_v37, %s2801_s27  ;;  %v1315_v37 = vmul.f32 %v2769_v41, %v5054_v62  ;;  %v4585_v44 = vpop.permute.xlu2 %2169  ;;  %v5060_v41 = vld [vmem:[#allocation29_spill] sm:$0xff] }
 0x6c0   :  { %v1828_v55 = vmul.f32 %v1315_v37, %v955_v2  ;;  %v5062_v37 = vld [vmem:[#allocation36_spill] sm:$0xff] }
 0x6c2   :  { %v1916_v9 = vsel %vm966_vm2, %v1828_v55, 0.0 }
 0x6c6   :  { %2179 = vrot.lane.b32.xlu1 %v2102_v61, %s2800_s18 }
 0x6c9   :  { %v4565_v18 = vpop.xlane.xlu0 %1734 }
 0x6cd   :  { %1914 = vadd.xlane.f32.xlu2 %v1913_v46  ;;  %v1900_v58 = vpop.xlane.xlu1 %1899 }
 0x6ce   :  { %1951 = vst.msk [vmem:[%s4911_s7 + $0xb0] sm:$0xff] %vm1928_vm3, %v1900_v58 }
 0x6da   :  { %1902 = vadd.xlane.f32.xlu0 %v1901_v42  ;;  %v1317_v42 = vmul.f32 %v2775_v30, %v5058_v26 }
 0x6dc   :  { %v2034_v51 = vpop.permute.xlu0 %2033 }
 0x6dd   :  { %v4570_v31 = vmul.f32 %v2034_v51, %v1788_v12  ;;  %v1830_v51 = vmul.f32 %v1317_v42, %v961_v22 }
 0x6df   :  { %v1922_v33 = vsel %vm966_vm2, %v1830_v51, 0.0 }
 0x6e5   :  { %2049 = vrot.lane.b32.xlu2 %v955_v2, %s2801_s27  ;;  %v2042_v43 = vpop.permute.xlu1 %2041  ;;  %v2779_v2 = vpop.eup %2778 }
 0x6e6   :  { %v4577_v52 = vmul.f32 %v2042_v43, %v1792_v16  ;;  %v1791_v19 = vmul.f32 %v2779_v2, %v5060_v41  ;;  %v5061_v43 = vld [vmem:[#allocation58_spill] sm:$0xff]  ;;  %v2781_v38 = vpop.eup %2780 }
 0x6e7   :  { %2782 = vrcp.f32 %v5061_v43  ;;  %v1795_v20 = vmul.f32 %v2781_v38, %v5062_v37  ;;  %v2264_v37 = vsel %vm966_vm2, %v4532_v36, 0.0 }
 0x6e8   :  { %2784 = vrcp.f32 %v4256_v27 }
 0x6e9   :  { %2786 = vrcp.f32 %v4469_v63 }
 0x6ea   :  { %2788 = vrcp.f32 %v4215_v35 }
 0x6eb   :  { %2790 = vrcp.f32 %v4411_v59 }
 0x6ec   :  { %2792 = vrcp.f32 %v4451_v29 }
 0x6ed   :  { %2181 = vrot.lane.b32.xlu2 %v4388_v10, %s2800_s18  ;;  %v5056_v10 = vld [vmem:[#allocation33_spill] sm:$0xff]  ;;  %v4607_v48 = vpop.permute.xlu1 %2173  ;;  %v2783_v62 = vpop.eup %2782  ;;  %2794 = vrcp.f32 %v4565_v18 }
 0x6ee   :  { %2171 = vrot.lane.b32.xlu0 %v2098_v14, %s2800_s18  ;;  %v1793_v4 = vmul.f32 %v2773_v25, %v5056_v10  ;;  %v1780_v55 = vmul.f32 %v2783_v62, %v5063_v3  ;;  %v2785_v28 = vpop.eup %2784  ;;  %v963_v25 = vpop.f32.mrf.mxu3  ;;  %v5069_v3 = vld [vmem:[#allocation57_spill] sm:$0xff]  ;;  %2796 = vrcp.f32 %v4474_v21  ;;  %v2273_v21 = vsel %vm966_vm2, %v4585_v44, 0.0 }
 0x6ef   :  { %v2787_v32 = vpop.eup %2786 }
 0x6f0   :  { %1917 = vadd.xlane.f32.xlu1 %v1916_v9  ;;  %v2789_v63 = vpop.eup %2788 }
 0x6f6   :  { %2045 = vrot.lane.b32.xlu0 %v949_v8, %s2801_s27 }
 0x6f7   :  { %v1906_v61 = vpop.xlane.xlu2 %1905 }
 0x6f8   :  { %1953 = vst.msk [vmem:[%s4911_s7 + $0xc0] sm:$0xff] %vm1928_vm3, %v1906_v61  ;;  %v957_v61 = vpop.f32.mrf.mxu0 }
 0x6ff   :  { %v2044_v57 = vpop.permute.xlu2 %2043 }
 0x700   :  { %v4596_v46 = vmul.f32 %v2044_v57, %v1793_v4  ;;  %v958_v4 = vadd.f32 %v4487_v23, %v957_v61  ;;  %v964_v57 = vadd.f32 %v4487_v23, %v963_v25 }
 0x707   :  { %v1894_v58 = vpop.xlane.xlu0 %1893  ;;  %v4637_v10 = vpop.permute.xlu2 %2175 }
 0x708   :  { %1949 = vst.msk [vmem:[%s4911_s7 + $0xa0] sm:$0xff] %vm1928_vm3, %v1894_v58  ;;  %v5064_v58 = vld [vmem:[#allocation55_spill] sm:$0xff] }
 0x709   :  { %2185 = vrot.lane.b32.xlu1 %v4429_v50, %s2800_s18  ;;  %v5059_v50 = vld [vmem:[#allocation38_spill] sm:$0xff]  ;;  %v1318_v27 = vmul.f32 %v2785_v28, %v5064_v58  ;;  %v2252_v28 = vsel %vm966_vm2, %v4434_v24, 0.0 }
 0x70a   :  { %v1313_v12 = vmul.f32 %v2777_v6, %v5059_v50 }
 0x70c   :  { %v1826_v54 = vmul.f32 %v1313_v12, %v949_v8  ;;  %v2101_v8 = vmul.f32 %v4370_v0, %v1780_v55  ;;  %v1831_v0 = vmul.f32 %v1318_v27, %v964_v57 }
 0x70e   :  { %v1910_v11 = vsel %vm966_vm2, %v1826_v54, 0.0  ;;  %v1925_v23 = vsel %vm966_vm2, %v1831_v0, 0.0  ;;  %v2791_v54 = vpop.eup %2790 }
 0x711   :  { %2053 = vrot.lane.b32.xlu1 %v961_v22, %s2801_s27  ;;  %v5065_v22 = vld [vmem:[#allocation41_spill] sm:$0xff] }
 0x712   :  { %v1796_v60 = vmul.f32 %v2787_v32, %v5065_v22  ;;  %v2270_v32 = vsel %vm966_vm2, %v4552_v34, 0.0 }
 0x716   :  { %2250 = vadd.xlane.f32.xlu2 %v2249_v1  ;;  %v5066_v1 = vld [vmem:[#allocation52_spill] sm:$0xff] }
 0x717   :  { %v1316_v50 = vmul.f32 %v2789_v63, %v5066_v1  ;;  %v2279_v1 = vsel %vm966_vm2, %v4607_v48, 0.0 }
 0x718   :  { %v1909_v56 = vpop.xlane.xlu1 %1908 }
 0x719   :  { %1954 = vst.msk [vmem:[%s4911_s7 + $0xc8] sm:$0xff] %vm1928_vm3, %v1909_v56  ;;  %v1829_v56 = vmul.f32 %v1316_v50, %v958_v4 }
 0x71a   :  { %v4619_v5 = vpop.permute.xlu0 %2165 }
 0x71b   :  { %v1919_v35 = vsel %vm966_vm2, %v1829_v56, 0.0  ;;  %v2267_v18 = vsel %vm966_vm2, %v4619_v5, 0.0 }
 0x71e   :  { %1923 = vadd.xlane.f32.xlu2 %v1922_v33  ;;  %v2258_v33 = vsel %vm966_vm2, %v4556_v17, 0.0  ;;  %v5068_v17 = vld [vmem:[#allocation49_spill] sm:$0xff] }
 0x720   :  { %1911 = vadd.xlane.f32.xlu0 %v1910_v11 }
 0x722   :  { %v2040_v13 = vpop.permute.xlu0 %2039 }
 0x723   :  { %v4624_v16 = vmul.f32 %v2040_v13, %v1791_v19  ;;  %v2793_v19 = vpop.eup %2792 }
 0x724   :  { %v1798_v43 = vmul.f32 %v2793_v19, %v5068_v17 }
 0x730   :  { %v2048_v14 = vpop.permute.xlu1 %2047 }
 0x731   :  { %v4631_v9 = vmul.f32 %v2048_v14, %v1795_v20  ;;  %v2795_v20 = vpop.eup %2794 }
 0x732   :  { %v1799_v55 = vmul.f32 %v2795_v20, %v5069_v3  ;;  %v2797_v25 = vpop.eup %2796 }
 0x734   :  { %2177 = vrot.lane.b32.xlu0 %v2101_v8, %s2800_s18 }
 0x736   :  { %2187 = vrot.lane.b32.xlu2 %v4477_v49, %s2800_s18 }
 0x738   :  { %v4660_v42 = vpop.permute.xlu1 %2179 }
 0x73b   :  { %2256 = vadd.xlane.f32.xlu1 %v2255_v39 }
 0x73c   :  { %2051 = vrot.lane.b32.xlu0 %v958_v4, %s2801_s27  ;;  %v5070_v4 = vld [vmem:[#allocation46_spill] sm:$0xff] }
 0x73e   :  { %2055 = vrot.lane.b32.xlu2 %v964_v57, %s2801_s27  ;;  %v1797_v57 = vmul.f32 %v2797_v25, %v5070_v4 }
 0x740   :  { %v1915_v49 = vpop.xlane.xlu2 %1914 }
 0x741   :  { %1956 = vst.msk [vmem:[%s4911_s7 + $0xd8] sm:$0xff] %vm1928_vm3, %v1915_v49 }
 0x743   :  { %1926 = vadd.xlane.f32.xlu1 %v1925_v23 }
 0x748   :  { %v2050_v30 = vpop.permute.xlu2 %2049 }
 0x749   :  { %v4653_v6 = vmul.f32 %v2050_v30, %v1796_v60 }
 0x74d   :  { %v1903_v26 = vpop.xlane.xlu0 %1902 }
 0x74e   :  { %1952 = vst.msk [vmem:[%s4911_s7 + $0xb8] sm:$0xff] %vm1928_vm3, %v1903_v26 }
 0x750   :  { %v4681_v13 = vpop.permute.xlu2 %2181 }
 0x751   :  { %v2291_v30 = vsel %vm966_vm2, %v4681_v13, 0.0 }
 0x75c   :  { %2191 = vrot.lane.b32.xlu1 %v4493_v7, %s2800_s18  ;;  %v5067_v7 = vld [vmem:[#allocation35_spill] sm:$0xff] }
 0x75d   :  { %v1794_v2 = vmul.f32 %v2791_v54, %v5067_v7  ;;  %v2288_v7 = vsel %vm966_vm2, %v4660_v42, 0.0 }
 0x760   :  { %v2172_v12 = vpop.permute.xlu0 %2171 }
 0x761   :  { %v2276_v44 = vsel %vm966_vm2, %v2172_v12, 0.0 }
 0x763   :  { %v1918_v51 = vpop.xlane.xlu1 %1917 }
 0x764   :  { %1957 = vst.msk [vmem:[%s4911_s7 + $0xe0] sm:$0xff] %vm1928_vm3, %v1918_v51 }
 0x766   :  { %1920 = vadd.xlane.f32.xlu0 %v1919_v35 }
 0x767   :  { %2259 = vadd.xlane.f32.xlu2 %v2258_v33 }
 0x768   :  { %v2046_v11 = vpop.permute.xlu0 %2045 }
 0x769   :  { %v2115_v59 = vmul.f32 %v2046_v11, %v1794_v2 }
 0x77a   :  { %2183 = vrot.lane.b32.xlu0 %v4402_v47, %s2800_s18 }
 0x77b   :  { %v4677_v41 = vpop.permute.xlu1 %2185 }
 0x77f   :  { %2193 = vrot.lane.b32.xlu2 %v4570_v31, %s2800_s18 }
 0x783   :  { %v2054_v38 = vpop.permute.xlu1 %2053 }
 0x784   :  { %v4684_v62 = vmul.f32 %v2054_v38, %v1798_v43 }
 0x786   :  { %2265 = vadd.xlane.f32.xlu1 %v2264_v37 }
 0x789   :  { %v2251_v29 = vpop.xlane.xlu2 %2250 }
 0x78a   :  { %2346 = vst.msk [vmem:[%s4911_s7] sm:$0xff] %vm2345_vm4, %v2251_v29 }
 0x791   :  { %v1924_v47 = vpop.xlane.xlu2 %1923 }
 0x792   :  { %1959 = vst.msk [vmem:[%s4911_s7 + $0xf0] sm:$0xff] %vm1928_vm3, %v1924_v47 }
 0x793   :  { %v1912_v31 = vpop.xlane.xlu0 %1911 }
 0x794   :  { %1955 = vst.msk [vmem:[%s4911_s7 + $0xd0] sm:$0xff] %vm1928_vm3, %v1912_v31 }
 0x799   :  { %v2188_v36 = vpop.permute.xlu2 %2187 }
 0x79a   :  { %v2300_v63 = vsel %vm966_vm2, %v2188_v36, 0.0 }
 0x79f   :  { %2197 = vrot.lane.b32.xlu1 %v4543_v53, %s2800_s18 }
 0x7a1   :  { %v2056_v14 = vpop.permute.xlu2 %2055 }
 0x7a2   :  { %v4704_v8 = vmul.f32 %v2056_v14, %v1799_v55 }
 0x7a4   :  { %2253 = vadd.xlane.f32.xlu0 %v2252_v28 }
 0x7a6   :  { %v2178_v61 = vpop.permute.xlu0 %2177 }
 0x7a8   :  { %2268 = vadd.xlane.f32.xlu2 %v2267_v18 }
 0x7ae   :  { %v2052_v53 = vpop.permute.xlu0 %2051  ;;  %v2257_v58 = vpop.xlane.xlu1 %2256 }
 0x7af   :  { %v2118_v27 = vmul.f32 %v2052_v53, %v1797_v57  ;;  %2348 = vst.msk [vmem:[%s4911_s7 + $0x10] sm:$0xff] %vm2345_vm4, %v2257_v58 }
 0x7b6   :  { %v1927_v24 = vpop.xlane.xlu1 %1926 }
 0x7b7   :  { %1960 = vst.msk [vmem:[%s4911_s7 + $0xf8] sm:$0xff] %vm1928_vm3, %v1927_v24 }
 0x7b8   :  { %2189 = vrot.lane.b32.xlu0 %v4458_v40, %s2800_s18  ;;  %v2261_v40 = vsel %vm966_vm2, %v4500_v45, 0.0  ;;  %v2282_v45 = vsel %vm966_vm2, %v4637_v10, 0.0  ;;  %v2285_v10 = vsel %vm966_vm2, %v2178_v61, 0.0 }
 0x7c0   :  { %2199 = vrot.lane.b32.xlu2 %v4624_v16, %s2800_s18 }
 0x7c9   :  { %2274 = vadd.xlane.f32.xlu1 %v2273_v21 }
 0x7ce   :  { %v4739_v16 = vpop.permute.xlu1 %2191 }
 0x7cf   :  { %v2306_v47 = vsel %vm966_vm2, %v4739_v16, 0.0 }
 0x7d9   :  { %v1921_v5 = vpop.xlane.xlu0 %1920 }
 0x7da   :  { %1958 = vst.msk [vmem:[%s4911_s7 + $0xe8] sm:$0xff] %vm1928_vm3, %v1921_v5  ;;  %v2260_v39 = vpop.xlane.xlu2 %2259 }
 0x7db   :  { %2349 = vst.msk [vmem:[%s4911_s7 + $0x18] sm:$0xff] %vm2345_vm4, %v2260_v39 }
 0x7e2   :  { %2262 = vadd.xlane.f32.xlu0 %v2261_v40  ;;  %2203 = vrot.lane.b32.xlu1 %v4596_v46, %s2800_s18  ;;  %v2194_v49 = vpop.permute.xlu2 %2193 }
 0x7e9   :  { %2277 = vadd.xlane.f32.xlu2 %v2276_v44 }
 0x7ec   :  { %v2184_v46 = vpop.permute.xlu0 %2183 }
 0x7ed   :  { %v2294_v50 = vsel %vm966_vm2, %v2184_v46, 0.0 }
 0x7f6   :  { %2195 = vrot.lane.b32.xlu0 %v4522_v15, %s2800_s18 }
 0x7f9   :  { %v2266_v0 = vpop.xlane.xlu1 %2265 }
 0x7fa   :  { %2351 = vst.msk [vmem:[%s4911_s7 + $0x28] sm:$0xff] %vm2345_vm4, %v2266_v0 }
 0x801   :  { %2205 = vrot.lane.b32.xlu2 %v2115_v59, %s2800_s18  ;;  %v2297_v59 = vsel %vm966_vm2, %v4677_v41, 0.0 }
 0x80c   :  { %2283 = vadd.xlane.f32.xlu1 %v2282_v45 }
 0x811   :  { %v4763_v22 = vpop.permute.xlu1 %2197 }
 0x812   :  { %v2315_v3 = vsel %vm966_vm2, %v4763_v22, 0.0 }
 0x817   :  { %v2254_v23 = vpop.xlane.xlu0 %2253 }
 0x818   :  { %2347 = vst.msk [vmem:[%s4911_s7 + $0x8] sm:$0xff] %vm2345_vm4, %v2254_v23 }
 0x81b   :  { %v2269_v15 = vpop.xlane.xlu2 %2268 }
 0x81c   :  { %2352 = vst.msk [vmem:[%s4911_s7 + $0x30] sm:$0xff] %vm2345_vm4, %v2269_v15 }
 0x820   :  { %2271 = vadd.xlane.f32.xlu0 %v2270_v32 }
 0x825   :  { %2209 = vrot.lane.b32.xlu1 %v4653_v6, %s2800_s18  ;;  %v2200_v6 = vpop.permute.xlu2 %2199 }
 0x826   :  { %v2318_v11 = vsel %vm966_vm2, %v2200_v6, 0.0 }
 0x82a   :  { %2286 = vadd.xlane.f32.xlu2 %v2285_v10  ;;  %v2190_v34 = vpop.permute.xlu0 %2189 }
 0x82b   :  { %v2303_v12 = vsel %vm966_vm2, %v2190_v34, 0.0 }
 0x834   :  { %2201 = vrot.lane.b32.xlu0 %v4577_v52, %s2800_s18 }
 0x83c   :  { %v2275_v60 = vpop.xlane.xlu1 %2274 }
 0x83d   :  { %2354 = vst.msk [vmem:[%s4911_s7 + $0x40] sm:$0xff] %vm2345_vm4, %v2275_v60 }
 0x842   :  { %2211 = vrot.lane.b32.xlu2 %v2118_v27, %s2800_s18 }
 0x84f   :  { %2292 = vadd.xlane.f32.xlu1 %v2291_v30 }
 0x854   :  { %v2204_v56 = vpop.permute.xlu1 %2203 }
 0x855   :  { %v2263_v26 = vpop.xlane.xlu0 %2262  ;;  %v2324_v14 = vsel %vm966_vm2, %v2204_v56, 0.0 }
 0x856   :  { %2350 = vst.msk [vmem:[%s4911_s7 + $0x20] sm:$0xff] %vm2345_vm4, %v2263_v26 }
 0x857   :  { %2301 = vadd.xlane.f32.xlu1 %v2300_v63 }
 0x85c   :  { %v2278_v52 = vpop.xlane.xlu2 %2277 }
 0x85d   :  { %2355 = vst.msk [vmem:[%s4911_s7 + $0x48] sm:$0xff] %vm2345_vm4, %v2278_v52 }
 0x85e   :  { %2280 = vadd.xlane.f32.xlu0 %v2279_v1 }
 0x864   :  { %v2206_v33 = vpop.permute.xlu2 %2205 }
 0x865   :  { %v2327_v42 = vsel %vm966_vm2, %v2206_v33, 0.0 }
 0x868   :  { %v2196_v48 = vpop.permute.xlu0 %2195 }
 0x869   :  { %v2312_v51 = vsel %vm966_vm2, %v2196_v48, 0.0 }
 0x86b   :  { %2295 = vadd.xlane.f32.xlu2 %v2294_v50 }
 0x870   :  { %2215 = vrot.lane.b32.xlu1 %v4704_v8, %s2800_s18 }
 0x872   :  { %2207 = vrot.lane.b32.xlu0 %v4631_v9, %s2800_s18  ;;  %v2309_v9 = vsel %vm966_vm2, %v2194_v49, 0.0 }
 0x873   :  { %2304 = vadd.xlane.f32.xlu2 %v2303_v12 }
 0x87b   :  { %2313 = vadd.xlane.f32.xlu2 %v2312_v51 }
 0x87f   :  { %v2284_v54 = vpop.xlane.xlu1 %2283 }
 0x880   :  { %2357 = vst.msk [vmem:[%s4911_s7 + $0x58] sm:$0xff] %vm2345_vm4, %v2284_v54 }
 0x893   :  { %v2272_v35 = vpop.xlane.xlu0 %2271 }
 0x894   :  { %2353 = vst.msk [vmem:[%s4911_s7 + $0x38] sm:$0xff] %vm2345_vm4, %v2272_v35 }
 0x897   :  { %v2210_v38 = vpop.permute.xlu1 %2209 }
 0x898   :  { %v2333_v8 = vsel %vm966_vm2, %v2210_v38, 0.0 }
 0x89a   :  { %2310 = vadd.xlane.f32.xlu1 %v2309_v9 }
 0x89c   :  { %2289 = vadd.xlane.f32.xlu0 %v2288_v7 }
 0x89d   :  { %v2287_v2 = vpop.xlane.xlu2 %2286 }
 0x89e   :  { %2358 = vst.msk [vmem:[%s4911_s7 + $0x60] sm:$0xff] %vm2345_vm4, %v2287_v2 }
 0x8a2   :  { %2319 = vadd.xlane.f32.xlu1 %v2318_v11 }
 0x8a4   :  { %2298 = vadd.xlane.f32.xlu0 %v2297_v59 }
 0x8a5   :  { %v2212_v17 = vpop.permute.xlu2 %2211 }
 0x8a6   :  { %v2202_v19 = vpop.permute.xlu0 %2201  ;;  %v2336_v43 = vsel %vm966_vm2, %v2212_v17, 0.0 }
 0x8a7   :  { %v2321_v13 = vsel %vm966_vm2, %v2202_v19, 0.0 }
 0x8a8   :  { %2322 = vadd.xlane.f32.xlu2 %v2321_v13 }
 0x8aa   :  { %2328 = vadd.xlane.f32.xlu1 %v2327_v42 }
 0x8b2   :  { %2337 = vadd.xlane.f32.xlu1 %v2336_v43 }
 0x8b8   :  { %2213 = vrot.lane.b32.xlu0 %v4684_v62, %s2800_s18 }
 0x8c2   :  { %v2293_v37 = vpop.xlane.xlu1 %2292 }
 0x8c3   :  { %2360 = vst.msk [vmem:[%s4911_s7 + $0x70] sm:$0xff] %vm2345_vm4, %v2293_v37 }
 0x8ca   :  { %v2302_v41 = vpop.xlane.xlu1 %2301 }
 0x8cb   :  { %2363 = vst.msk [vmem:[%s4911_s7 + $0x88] sm:$0xff] %vm2345_vm4, %v2302_v41 }
 0x8d1   :  { %v2281_v29 = vpop.xlane.xlu0 %2280 }
 0x8d2   :  { %2356 = vst.msk [vmem:[%s4911_s7 + $0x50] sm:$0xff] %vm2345_vm4, %v2281_v29 }
 0x8de   :  { %v2296_v62 = vpop.xlane.xlu2 %2295 }
 0x8df   :  { %2361 = vst.msk [vmem:[%s4911_s7 + $0x78] sm:$0xff] %vm2345_vm4, %v2296_v62 }
 0x8e2   :  { %2307 = vadd.xlane.f32.xlu0 %v2306_v47  ;;  %v2216_v28 = vpop.permute.xlu1 %2215 }
 0x8e3   :  { %v2342_v61 = vsel %vm966_vm2, %v2216_v28, 0.0 }
 0x8e4   :  { %v2208_v31 = vpop.permute.xlu0 %2207 }
 0x8e5   :  { %v2330_v36 = vsel %vm966_vm2, %v2208_v31, 0.0 }
 0x8e6   :  { %v2305_v20 = vpop.xlane.xlu2 %2304  ;;  %2331 = vadd.xlane.f32.xlu2 %v2330_v36 }
 0x8e7   :  { %2364 = vst.msk [vmem:[%s4911_s7 + $0x90] sm:$0xff] %vm2345_vm4, %v2305_v20 }
 0x8ea   :  { %2316 = vadd.xlane.f32.xlu0 %v2315_v3 }
 0x8ee   :  { %v2314_v55 = vpop.xlane.xlu2 %2313 }
 0x8ef   :  { %2367 = vst.msk [vmem:[%s4911_s7 + $0xa8] sm:$0xff] %vm2345_vm4, %v2314_v55 }
 0x8f2   :  { %2325 = vadd.xlane.f32.xlu0 %v2324_v14 }
 0x8fa   :  { %2334 = vadd.xlane.f32.xlu0 %v2333_v8 }
 0x902   :  { %2343 = vadd.xlane.f32.xlu0 %v2342_v61 }
 0x90d   :  { %v2311_v18 = vpop.xlane.xlu1 %2310 }
 0x90e   :  { %2366 = vst.msk [vmem:[%s4911_s7 + $0xa0] sm:$0xff] %vm2345_vm4, %v2311_v18 }
 0x90f   :  { %v2290_v25 = vpop.xlane.xlu0 %2289 }
 0x910   :  { %2359 = vst.msk [vmem:[%s4911_s7 + $0x68] sm:$0xff] %vm2345_vm4, %v2290_v25 }
 0x915   :  { %v2320_v4 = vpop.xlane.xlu1 %2319 }
 0x916   :  { %2369 = vst.msk [vmem:[%s4911_s7 + $0xb8] sm:$0xff] %vm2345_vm4, %v2320_v4 }
 0x917   :  { %v2299_v57 = vpop.xlane.xlu0 %2298 }
 0x918   :  { %2362 = vst.msk [vmem:[%s4911_s7 + $0x80] sm:$0xff] %vm2345_vm4, %v2299_v57 }
 0x91b   :  { %v2323_v53 = vpop.xlane.xlu2 %2322 }
 0x91c   :  { %2370 = vst.msk [vmem:[%s4911_s7 + $0xc0] sm:$0xff] %vm2345_vm4, %v2323_v53 }
 0x91d   :  { %v2329_v58 = vpop.xlane.xlu1 %2328 }
 0x91e   :  { %2372 = vst.msk [vmem:[%s4911_s7 + $0xd0] sm:$0xff] %vm2345_vm4, %v2329_v58 }
 0x925   :  { %v2338_v27 = vpop.xlane.xlu1 %2337 }
 0x926   :  { %2375 = vst.msk [vmem:[%s4911_s7 + $0xe8] sm:$0xff] %vm2345_vm4, %v2338_v27 }
 0x92a   :  { %v2214_v24 = vpop.permute.xlu0 %2213 }
 0x92b   :  { %v2339_v21 = vsel %vm966_vm2, %v2214_v24, 0.0 }
 0x92c   :  { %2340 = vadd.xlane.f32.xlu2 %v2339_v21 }
 0x955   :  { %v2308_v5 = vpop.xlane.xlu0 %2307 }
 0x956   :  { %2365 = vst.msk [vmem:[%s4911_s7 + $0x98] sm:$0xff] %vm2345_vm4, %v2308_v5 }
 0x959   :  { %v2332_v39 = vpop.xlane.xlu2 %2331 }
 0x95a   :  { %2373 = vst.msk [vmem:[%s4911_s7 + $0xd8] sm:$0xff] %vm2345_vm4, %v2332_v39 }
 0x95d   :  { %v2317_v40 = vpop.xlane.xlu0 %2316 }
 0x95e   :  { %2368 = vst.msk [vmem:[%s4911_s7 + $0xb0] sm:$0xff] %vm2345_vm4, %v2317_v40 }
 0x965   :  { %v2326_v44 = vpop.xlane.xlu0 %2325 }
 0x966   :  { %2371 = vst.msk [vmem:[%s4911_s7 + $0xc8] sm:$0xff] %vm2345_vm4, %v2326_v44 }
 0x96d   :  { %v2335_v16 = vpop.xlane.xlu0 %2334 }
 0x96e   :  { %2374 = vst.msk [vmem:[%s4911_s7 + $0xe0] sm:$0xff] %vm2345_vm4, %v2335_v16 }
 0x975   :  { %v2344_v0 = vpop.xlane.xlu0 %2343 }
 0x976   :  { %2377 = vst.msk [vmem:[%s4911_s7 + $0xf8] sm:$0xff] %vm2345_vm4, %v2344_v0 }
 0x99f   :  { %v2341_v45 = vpop.xlane.xlu2 %2340 }
 0x9a0   :  { %2376 = vst.msk [vmem:[%s4911_s7 + $0xf0] sm:$0xff] %vm2345_vm4, %v2341_v45 }

</bundles_post_ra>
